<compile_context>
chip_gen: v6e
topology: v6e:2x2x1
jax: 0.10.0
libtpu: 0.0.40
codegen_flags: <defaults>
</compile_context>

<pallas_src>
import math

import jax
import jax.numpy as jnp
from jax.experimental import pallas as pl
from jax.experimental.pallas import tpu as pltpu

D = 56          # feature channels (module constant)
T = 600         # sequence length before conv (module constant)
K = 30          # conv kernel size
STRIDE = 15     # conv stride
L_OUT = (T - K) // STRIDE + 1   # = 39, conv output length
NBLK = T // STRIDE              # = 40 stride-sized input blocks (K == 2*STRIDE)


def _round_up(x, m):
    return (x + m - 1) // m * m


# ------------- Fused kernel: shift-add im2col matmul + LSTM + head + BCE ----
def fused_lstm_kernel(xb_ref, wcat_ref, bf_ref, whh_ref, wo_ref, bo_ref,
                      lab_ref, loss_ref, yh_ref, gates_ref):
    # xb_ref:    (NBLK*B_pad, 15*D) bf16   seq-major 15-step blocks, 8 rows/block
    # wcat_ref:  (15*D, 8H)        bf16   [W_top | W_bot] of the folded conv∘x-proj
    # bf_ref:    (1, 1, 4H)        f32    fused bias (conv bias projected + b_ih + b_hh)
    # whh_ref:   (H, 4H)           bf16   recurrent weights (gate order i, f, g, o)
    # wo_ref:    (1, H)            f32    Linear(H, 1) weights
    # bo_ref:    (1, 1)            f32    Linear bias
    # lab_ref:   (B, 1)            f32    labels
    # gates_ref: (L_OUT, B_pad, 4H) f32   VMEM scratch, sublane-aligned x-gates
    bsz = lab_ref.shape[0]
    n_t, b_pad, four_h = gates_ref.shape
    hid = four_h // 4
    nblk = n_t + 1

    # One lane-dense single-pass bf16 MXU matmul (M=NBLK*B_pad, K=15*D, N=8H)
    # produces both halves of the input-side gates for ALL timesteps.
    gcat = jnp.dot(xb_ref[...], wcat_ref[...],
                   preferred_element_type=jnp.float32)
    gcat = gcat.reshape(nblk, b_pad, 2 * four_h)      # tile-aligned reshape
    # Shift-add im2col (valid because K == 2*STRIDE):
    #   gates_x[t] = top(block t) + bot(block t+1) + bias
    gates_ref[...] = (gcat[:n_t, :, :four_h]
                      + gcat[1:, :, four_h:]
                      + bf_ref[...])

    whh = whh_ref[...]                                # bf16, reused every step
    h = jnp.zeros((b_pad, hid), jnp.float32)
    c = jnp.zeros((b_pad, hid), jnp.float32)

    # Serial recurrence; static trip count (39) -> fully unrolled, aligned
    # (8,128) gate loads, bf16 single-pass h@W_hh on the critical chain.
    # TODO(synk): hold W_hh weight-stationary in the MXU via
    # pltpu.matmul_push_rhs / matmul_acc_lhs / matmul_pop once that explicit
    # path is validated across v5e/v6e/v7x.
    for t in range(n_t):
        gx = gates_ref[t]                             # (B_pad, 4H) aligned vld
        gates = gx + jnp.dot(h.astype(jnp.bfloat16), whh,
                             preferred_element_type=jnp.float32)
        sig = jax.nn.sigmoid(gates)   # one full-width EUP push
        tnh = jnp.tanh(gates)         # one full-width EUP push
        i = sig[:, 0 * hid:1 * hid]
        f = sig[:, 1 * hid:2 * hid]
        g = tnh[:, 2 * hid:3 * hid]
        o = sig[:, 3 * hid:4 * hid]
        c = f * c + i * g
        h = o * jnp.tanh(c)

    # Linear(H, 1) head on the VPU (multiply + lane reduce) -- avoid N=1 MXU.
    # Only the first B (real) batch rows feed the outputs; padded rows drop.
    logits = jnp.sum(h * wo_ref[...], axis=-1, keepdims=True) + bo_ref[...]
    logits = logits[:bsz, :]
    labels = lab_ref[...]
    # numerically-stable binary_cross_entropy_with_logits, mean reduction
    loss_elem = (jnp.maximum(logits, 0.0) - logits * labels
                 + jnp.log1p(jnp.exp(-jnp.abs(logits))))
    loss_ref[...] = jnp.mean(loss_elem, axis=(0, 1), keepdims=True)
    yh_ref[...] = jax.nn.sigmoid(logits)


def fused_forward_pallas(xb, labels, params, b_pad):
    bsz = labels.shape[0]
    four_h = params['whh_t'].shape[1]
    return pl.pallas_call(
        fused_lstm_kernel,
        out_shape=(jax.ShapeDtypeStruct((1, 1), jnp.float32),
                   jax.ShapeDtypeStruct((bsz, 1), jnp.float32)),
        scratch_shapes=[pltpu.VMEM((L_OUT, b_pad, four_h), jnp.float32)],
    )(xb, params['w_cat'], params['b_fused'], params['whh_t'],
      params['wo'], params['b_out'], labels.astype(jnp.float32))


# ---------------- Parameter init (deterministic, PyTorch-style ranges) ------
def init_params(key, rnn_hid_size):
    keys = jax.random.split(key, 8)
    # Conv1d(D, D, K): weight (D_out, D_in, K), bias (D,)
    k_conv = 1.0 / math.sqrt(D * K)
    w_conv = jax.random.uniform(keys[0], (D, D, K), jnp.float32, -k_conv, k_conv)
    b_conv = jax.random.uniform(keys[1], (D,), jnp.float32, -k_conv, k_conv)
    # im2col matmul form: W_mat[k*D + ci, co] = w_conv[co, ci, k]
    w_conv_mat = jnp.transpose(w_conv, (2, 1, 0)).reshape(K * D, D)

    H = rnn_hid_size
    k_lstm = 1.0 / math.sqrt(H)
    w_ih = jax.random.uniform(keys[2], (4 * H, D), jnp.float32, -k_lstm, k_lstm)
    w_hh = jax.random.uniform(keys[3], (4 * H, H), jnp.float32, -k_lstm, k_lstm)
    b_ih = jax.random.uniform(keys[4], (4 * H,), jnp.float32, -k_lstm, k_lstm)
    b_hh = jax.random.uniform(keys[5], (4 * H,), jnp.float32, -k_lstm, k_lstm)

    k_out = 1.0 / math.sqrt(H)
    w_out = jax.random.uniform(keys[6], (1, H), jnp.float32, -k_out, k_out)
    b_out = jax.random.uniform(keys[7], (1,), jnp.float32, -k_out, k_out)

    wih_t = w_ih.T                                       # (D, 4H)
    b_lstm = (b_ih + b_hh).reshape(1, 4 * H)             # (1, 4H)

    # Fold the conv into the LSTM input projection (no nonlinearity between
    # the conv and the LSTM in the reference model, so this is exact):
    #   (patches @ Wc + bc) @ Wih^T + b == patches @ (Wc @ Wih^T) + (bc @ Wih^T + b)
    w_fused = w_conv_mat @ wih_t                         # (K*D, 4H) f32
    b_fused = b_conv.reshape(1, D) @ wih_t + b_lstm      # (1, 4H)   f32

    # Split for the in-kernel shift-add im2col (K == 2*STRIDE) and store the
    # matmul weights in bf16 (single-pass MXU, half the HBM bytes).
    w_top = w_fused[:STRIDE * D, :]                      # block t half
    w_bot = w_fused[STRIDE * D:, :]                      # block t+1 half
    w_cat = jnp.concatenate([w_top, w_bot], axis=1).astype(jnp.bfloat16)

    return {
        'w_cat': w_cat,                               # (15*D, 8H) bf16
        'b_fused': b_fused.reshape(1, 1, 4 * H),      # (1, 1, 4H) f32
        'whh_t': w_hh.T.astype(jnp.bfloat16),         # (H, 4H)    bf16
        'wo': w_out,                                  # (1, H)     f32
        'b_out': b_out.reshape(1, 1),                 # (1, 1)     f32
    }


# ---------------- Forward (mirrors Model.forward) ----------------------------
def model_forward(data, labels, params):
    B = data.shape[0]
    x = jnp.reshape(data, (B, T, D)).astype(jnp.float32)       # (B, T, D)

    # No duplicated im2col: just cut the sequence into 40 stride-sized blocks,
    # go seq-major, and pad the batch to a sublane multiple (8 rows / block).
    b_pad = _round_up(B, 8)
    xb = x.reshape(B, NBLK, STRIDE * D)                        # (B, 40, 15*D)
    xb = jnp.transpose(xb, (1, 0, 2))                          # (40, B, 15*D)
    xb = jnp.pad(xb, ((0, 0), (0, b_pad - B), (0, 0)))         # (40, B_pad, 15*D)
    xb = xb.reshape(NBLK * b_pad, STRIDE * D).astype(jnp.bfloat16)

    loss, y_h = fused_forward_pallas(xb, labels, params, b_pad)
    return loss[0, 0], y_h, 1.0


if __name__ == "__main__":
    key = jax.random.PRNGKey(0)
    k_data, k_lab, k_param = jax.random.split(key, 3)

    B = 2
    rnn_hid_size = 32

    data = jax.random.normal(k_data, (B, T, D), jnp.float32)
    labels = jax.random.bernoulli(k_lab, 0.5, (B, 1)).astype(jnp.float32)
    params = init_params(k_param, rnn_hid_size)

    fwd = jax.jit(lambda d, l: model_forward(d, l, params))
    y_loss, y_h, aux = fwd(data, labels)
    jax.block_until_ready((y_loss, y_h))
    assert y_h.shape == (B, 1)
    print("KERNEL_OK")
</pallas_src>

<mosaic_0001>
module attributes {stable_mosaic.version = 11 : i64} {
  func.func @fused_lstm_kernel(%arg0: memref<320x840xbf16, #tpu.memory_space<vmem>>, %arg1: memref<840x256xbf16, #tpu.memory_space<vmem>>, %arg2: memref<1x1x128xf32, #tpu.memory_space<vmem>>, %arg3: memref<32x128xbf16, #tpu.memory_space<vmem>>, %arg4: memref<1x32xf32, #tpu.memory_space<vmem>>, %arg5: memref<1x1xf32, #tpu.memory_space<vmem>>, %arg6: memref<2x1xf32, #tpu.memory_space<vmem>>, %arg7: memref<1x1xf32, #tpu.memory_space<vmem>>, %arg8: memref<2x1xf32, #tpu.memory_space<vmem>>, %arg9: memref<39x8x128xf32, #tpu.memory_space<vmem>>) attributes {dimension_semantics = [], scalar_prefetch = 0 : i64, scratch_operands = 1 : i64, tpu.core_type = #tpu.core_type<tc>} {
    %c0 = arith.constant 0 : index
    %c0_0 = arith.constant 0 : index
    %0 = vector.load %arg0[%c0, %c0_0] : memref<320x840xbf16, #tpu.memory_space<vmem>>, vector<320x840xbf16>
    %c0_1 = arith.constant 0 : index
    %c0_2 = arith.constant 0 : index
    %1 = vector.load %arg1[%c0_1, %c0_2] : memref<840x256xbf16, #tpu.memory_space<vmem>>, vector<840x256xbf16>
    %cst = arith.constant dense<0.000000e+00> : vector<320x256xf32>
    %2 = tpu.matmul %0, %1, %cst {dimension_numbers = #tpu.dot_dimension_numbers<[1], [0], [0], [1], [0, 0, 1, 1], [], []>} : vector<320x840xbf16>, vector<840x256xbf16>, vector<320x256xf32> -> vector<320x256xf32>
    %3 = vector.shape_cast %2 : vector<320x256xf32> to vector<40x8x256xf32>
    %4 = vector.extract_strided_slice %3 {offsets = [0, 0, 0], sizes = [39, 8, 128], strides = [1, 1, 1]} : vector<40x8x256xf32> to vector<39x8x128xf32>
    %5 = vector.extract_strided_slice %3 {offsets = [1, 0, 128], sizes = [39, 8, 128], strides = [1, 1, 1]} : vector<40x8x256xf32> to vector<39x8x128xf32>
    %6 = arith.addf %4, %5 : vector<39x8x128xf32>
    %c0_3 = arith.constant 0 : index
    %c0_4 = arith.constant 0 : index
    %c0_5 = arith.constant 0 : index
    %7 = vector.load %arg2[%c0_3, %c0_4, %c0_5] : memref<1x1x128xf32, #tpu.memory_space<vmem>>, vector<1x1x128xf32>
    %8 = vector.broadcast %7 : vector<1x1x128xf32> to vector<39x8x128xf32>
    %9 = arith.addf %6, %8 : vector<39x8x128xf32>
    %c0_6 = arith.constant 0 : index
    %c0_7 = arith.constant 0 : index
    %c0_8 = arith.constant 0 : index
    %10 = vector.load %arg9[%c0_6, %c0_7, %c0_8] : memref<39x8x128xf32, #tpu.memory_space<vmem>>, vector<39x8x128xf32>
    tpu.vector_store %arg9[%c0_6, %c0_7, %c0_8], %9 {strides = array<i32>} : memref<39x8x128xf32, #tpu.memory_space<vmem>>, vector<39x8x128xf32>,
    %c0_9 = arith.constant 0 : index
    %c0_10 = arith.constant 0 : index
    %11 = vector.load %arg3[%c0_9, %c0_10] : memref<32x128xbf16, #tpu.memory_space<vmem>>, vector<32x128xbf16>
    %cst_11 = arith.constant 0.000000e+00 : f32
    %12 = vector.broadcast %cst_11 : f32 to vector<8x32xf32>
    %cst_12 = arith.constant 0.000000e+00 : f32
    %13 = vector.broadcast %cst_12 : f32 to vector<8x32xf32>
    %c0_13 = arith.constant 0 : index
    %c0_14 = arith.constant 0 : index
    %c0_15 = arith.constant 0 : index
    %14 = vector.load %arg9[%c0_13, %c0_14, %c0_15] : memref<39x8x128xf32, #tpu.memory_space<vmem>>, vector<1x8x128xf32>
    %15 = vector.shape_cast %14 : vector<1x8x128xf32> to vector<8x128xf32>
    %16 = arith.truncf %12 : vector<8x32xf32> to vector<8x32xbf16>
    %cst_16 = arith.constant dense<0.000000e+00> : vector<8x128xf32>
    %17 = tpu.matmul %16, %11, %cst_16 {dimension_numbers = #tpu.dot_dimension_numbers<[1], [0], [0], [1], [0, 0, 1, 1], [], []>} : vector<8x32xbf16>, vector<32x128xbf16>, vector<8x128xf32> -> vector<8x128xf32>
    %18 = arith.addf %15, %17 : vector<8x128xf32>
    %19 = arith.negf %18 : vector<8x128xf32>
    %20 = math.exp %19 : vector<8x128xf32>
    %cst_17 = arith.constant 1.000000e+00 : f32
    %21 = vector.broadcast %cst_17 : f32 to vector<8x128xf32>
    %22 = arith.addf %21, %20 : vector<8x128xf32>
    %23 = arith.divf %21, %22 : vector<8x128xf32>
    %24 = math.tanh %18 : vector<8x128xf32>
    %25 = vector.extract_strided_slice %23 {offsets = [0, 0], sizes = [8, 32], strides = [1, 1]} : vector<8x128xf32> to vector<8x32xf32>
    %26 = vector.extract_strided_slice %23 {offsets = [0, 32], sizes = [8, 32], strides = [1, 1]} : vector<8x128xf32> to vector<8x32xf32>
    %27 = vector.extract_strided_slice %24 {offsets = [0, 64], sizes = [8, 32], strides = [1, 1]} : vector<8x128xf32> to vector<8x32xf32>
    %28 = vector.extract_strided_slice %23 {offsets = [0, 96], sizes = [8, 32], strides = [1, 1]} : vector<8x128xf32> to vector<8x32xf32>
    %29 = arith.mulf %26, %13 : vector<8x32xf32>
    %30 = arith.mulf %25, %27 : vector<8x32xf32>
    %31 = arith.addf %29, %30 : vector<8x32xf32>
    %32 = math.tanh %31 : vector<8x32xf32>
    %33 = arith.mulf %28, %32 : vector<8x32xf32>
    %c1 = arith.constant 1 : index
    %c0_18 = arith.constant 0 : index
    %c0_19 = arith.constant 0 : index
    %34 = vector.load %arg9[%c1, %c0_18, %c0_19] : memref<39x8x128xf32, #tpu.memory_space<vmem>>, vector<1x8x128xf32>
    %35 = vector.shape_cast %34 : vector<1x8x128xf32> to vector<8x128xf32>
    %36 = arith.truncf %33 : vector<8x32xf32> to vector<8x32xbf16>
    %cst_20 = arith.constant dense<0.000000e+00> : vector<8x128xf32>
    %37 = tpu.matmul %36, %11, %cst_20 {dimension_numbers = #tpu.dot_dimension_numbers<[1], [0], [0], [1], [0, 0, 1, 1], [], []>} : vector<8x32xbf16>, vector<32x128xbf16>, vector<8x128xf32> -> vector<8x128xf32>
    %38 = arith.addf %35, %37 : vector<8x128xf32>
    %39 = arith.negf %38 : vector<8x128xf32>
    %40 = math.exp %39 : vector<8x128xf32>
    %cst_21 = arith.constant 1.000000e+00 : f32
    %41 = vector.broadcast %cst_21 : f32 to vector<8x128xf32>
    %42 = arith.addf %41, %40 : vector<8x128xf32>
    %43 = arith.divf %41, %42 : vector<8x128xf32>
    %44 = math.tanh %38 : vector<8x128xf32>
    %45 = vector.extract_strided_slice %43 {offsets = [0, 0], sizes = [8, 32], strides = [1, 1]} : vector<8x128xf32> to vector<8x32xf32>
    %46 = vector.extract_strided_slice %43 {offsets = [0, 32], sizes = [8, 32], strides = [1, 1]} : vector<8x128xf32> to vector<8x32xf32>
    %47 = vector.extract_strided_slice %44 {offsets = [0, 64], sizes = [8, 32], strides = [1, 1]} : vector<8x128xf32> to vector<8x32xf32>
    %48 = vector.extract_strided_slice %43 {offsets = [0, 96], sizes = [8, 32], strides = [1, 1]} : vector<8x128xf32> to vector<8x32xf32>
    %49 = arith.mulf %46, %31 : vector<8x32xf32>
    %50 = arith.mulf %45, %47 : vector<8x32xf32>
    %51 = arith.addf %49, %50 : vector<8x32xf32>
    %52 = math.tanh %51 : vector<8x32xf32>
    %53 = arith.mulf %48, %52 : vector<8x32xf32>
    %c2 = arith.constant 2 : index
    %c0_22 = arith.constant 0 : index
    %c0_23 = arith.constant 0 : index
    %54 = vector.load %arg9[%c2, %c0_22, %c0_23] : memref<39x8x128xf32, #tpu.memory_space<vmem>>, vector<1x8x128xf32>
    %55 = vector.shape_cast %54 : vector<1x8x128xf32> to vector<8x128xf32>
    %56 = arith.truncf %53 : vector<8x32xf32> to vector<8x32xbf16>
    %cst_24 = arith.constant dense<0.000000e+00> : vector<8x128xf32>
    %57 = tpu.matmul %56, %11, %cst_24 {dimension_numbers = #tpu.dot_dimension_numbers<[1], [0], [0], [1], [0, 0, 1, 1], [], []>} : vector<8x32xbf16>, vector<32x128xbf16>, vector<8x128xf32> -> vector<8x128xf32>
    %58 = arith.addf %55, %57 : vector<8x128xf32>
    %59 = arith.negf %58 : vector<8x128xf32>
    %60 = math.exp %59 : vector<8x128xf32>
    %cst_25 = arith.constant 1.000000e+00 : f32
    %61 = vector.broadcast %cst_25 : f32 to vector<8x128xf32>
    %62 = arith.addf %61, %60 : vector<8x128xf32>
    %63 = arith.divf %61, %62 : vector<8x128xf32>
    %64 = math.tanh %58 : vector<8x128xf32>
    %65 = vector.extract_strided_slice %63 {offsets = [0, 0], sizes = [8, 32], strides = [1, 1]} : vector<8x128xf32> to vector<8x32xf32>
    %66 = vector.extract_strided_slice %63 {offsets = [0, 32], sizes = [8, 32], strides = [1, 1]} : vector<8x128xf32> to vector<8x32xf32>
    %67 = vector.extract_strided_slice %64 {offsets = [0, 64], sizes = [8, 32], strides = [1, 1]} : vector<8x128xf32> to vector<8x32xf32>
    %68 = vector.extract_strided_slice %63 {offsets = [0, 96], sizes = [8, 32], strides = [1, 1]} : vector<8x128xf32> to vector<8x32xf32>
    %69 = arith.mulf %66, %51 : vector<8x32xf32>
    %70 = arith.mulf %65, %67 : vector<8x32xf32>
    %71 = arith.addf %69, %70 : vector<8x32xf32>
    %72 = math.tanh %71 : vector<8x32xf32>
    %73 = arith.mulf %68, %72 : vector<8x32xf32>
    %c3 = arith.constant 3 : index
    %c0_26 = arith.constant 0 : index
    %c0_27 = arith.constant 0 : index
    %74 = vector.load %arg9[%c3, %c0_26, %c0_27] : memref<39x8x128xf32, #tpu.memory_space<vmem>>, vector<1x8x128xf32>
    %75 = vector.shape_cast %74 : vector<1x8x128xf32> to vector<8x128xf32>
    %76 = arith.truncf %73 : vector<8x32xf32> to vector<8x32xbf16>
    %cst_28 = arith.constant dense<0.000000e+00> : vector<8x128xf32>
    %77 = tpu.matmul %76, %11, %cst_28 {dimension_numbers = #tpu.dot_dimension_numbers<[1], [0], [0], [1], [0, 0, 1, 1], [], []>} : vector<8x32xbf16>, vector<32x128xbf16>, vector<8x128xf32> -> vector<8x128xf32>
    %78 = arith.addf %75, %77 : vector<8x128xf32>
    %79 = arith.negf %78 : vector<8x128xf32>
    %80 = math.exp %79 : vector<8x128xf32>
    %cst_29 = arith.constant 1.000000e+00 : f32
    %81 = vector.broadcast %cst_29 : f32 to vector<8x128xf32>
    %82 = arith.addf %81, %80 : vector<8x128xf32>
    %83 = arith.divf %81, %82 : vector<8x128xf32>
    %84 = math.tanh %78 : vector<8x128xf32>
    %85 = vector.extract_strided_slice %83 {offsets = [0, 0], sizes = [8, 32], strides = [1, 1]} : vector<8x128xf32> to vector<8x32xf32>
    %86 = vector.extract_strided_slice %83 {offsets = [0, 32], sizes = [8, 32], strides = [1, 1]} : vector<8x128xf32> to vector<8x32xf32>
    %87 = vector.extract_strided_slice %84 {offsets = [0, 64], sizes = [8, 32], strides = [1, 1]} : vector<8x128xf32> to vector<8x32xf32>
    %88 = vector.extract_strided_slice %83 {offsets = [0, 96], sizes = [8, 32], strides = [1, 1]} : vector<8x128xf32> to vector<8x32xf32>
    %89 = arith.mulf %86, %71 : vector<8x32xf32>
    %90 = arith.mulf %85, %87 : vector<8x32xf32>
    %91 = arith.addf %89, %90 : vector<8x32xf32>
    %92 = math.tanh %91 : vector<8x32xf32>
    %93 = arith.mulf %88, %92 : vector<8x32xf32>
    %c4 = arith.constant 4 : index
    %c0_30 = arith.constant 0 : index
    %c0_31 = arith.constant 0 : index
    %94 = vector.load %arg9[%c4, %c0_30, %c0_31] : memref<39x8x128xf32, #tpu.memory_space<vmem>>, vector<1x8x128xf32>
    %95 = vector.shape_cast %94 : vector<1x8x128xf32> to vector<8x128xf32>
    %96 = arith.truncf %93 : vector<8x32xf32> to vector<8x32xbf16>
    %cst_32 = arith.constant dense<0.000000e+00> : vector<8x128xf32>
    %97 = tpu.matmul %96, %11, %cst_32 {dimension_numbers = #tpu.dot_dimension_numbers<[1], [0], [0], [1], [0, 0, 1, 1], [], []>} : vector<8x32xbf16>, vector<32x128xbf16>, vector<8x128xf32> -> vector<8x128xf32>
    %98 = arith.addf %95, %97 : vector<8x128xf32>
    %99 = arith.negf %98 : vector<8x128xf32>
    %100 = math.exp %99 : vector<8x128xf32>
    %cst_33 = arith.constant 1.000000e+00 : f32
    %101 = vector.broadcast %cst_33 : f32 to vector<8x128xf32>
    %102 = arith.addf %101, %100 : vector<8x128xf32>
    %103 = arith.divf %101, %102 : vector<8x128xf32>
    %104 = math.tanh %98 : vector<8x128xf32>
    %105 = vector.extract_strided_slice %103 {offsets = [0, 0], sizes = [8, 32], strides = [1, 1]} : vector<8x128xf32> to vector<8x32xf32>
    %106 = vector.extract_strided_slice %103 {offsets = [0, 32], sizes = [8, 32], strides = [1, 1]} : vector<8x128xf32> to vector<8x32xf32>
    %107 = vector.extract_strided_slice %104 {offsets = [0, 64], sizes = [8, 32], strides = [1, 1]} : vector<8x128xf32> to vector<8x32xf32>
    %108 = vector.extract_strided_slice %103 {offsets = [0, 96], sizes = [8, 32], strides = [1, 1]} : vector<8x128xf32> to vector<8x32xf32>
    %109 = arith.mulf %106, %91 : vector<8x32xf32>
    %110 = arith.mulf %105, %107 : vector<8x32xf32>
    %111 = arith.addf %109, %110 : vector<8x32xf32>
    %112 = math.tanh %111 : vector<8x32xf32>
    %113 = arith.mulf %108, %112 : vector<8x32xf32>
    %c5 = arith.constant 5 : index
    %c0_34 = arith.constant 0 : index
    %c0_35 = arith.constant 0 : index
    %114 = vector.load %arg9[%c5, %c0_34, %c0_35] : memref<39x8x128xf32, #tpu.memory_space<vmem>>, vector<1x8x128xf32>
    %115 = vector.shape_cast %114 : vector<1x8x128xf32> to vector<8x128xf32>
    %116 = arith.truncf %113 : vector<8x32xf32> to vector<8x32xbf16>
    %cst_36 = arith.constant dense<0.000000e+00> : vector<8x128xf32>
    %117 = tpu.matmul %116, %11, %cst_36 {dimension_numbers = #tpu.dot_dimension_numbers<[1], [0], [0], [1], [0, 0, 1, 1], [], []>} : vector<8x32xbf16>, vector<32x128xbf16>, vector<8x128xf32> -> vector<8x128xf32>
    %118 = arith.addf %115, %117 : vector<8x128xf32>
    %119 = arith.negf %118 : vector<8x128xf32>
    %120 = math.exp %119 : vector<8x128xf32>
    %cst_37 = arith.constant 1.000000e+00 : f32
    %121 = vector.broadcast %cst_37 : f32 to vector<8x128xf32>
    %122 = arith.addf %121, %120 : vector<8x128xf32>
    %123 = arith.divf %121, %122 : vector<8x128xf32>
    %124 = math.tanh %118 : vector<8x128xf32>
    %125 = vector.extract_strided_slice %123 {offsets = [0, 0], sizes = [8, 32], strides = [1, 1]} : vector<8x128xf32> to vector<8x32xf32>
    %126 = vector.extract_strided_slice %123 {offsets = [0, 32], sizes = [8, 32], strides = [1, 1]} : vector<8x128xf32> to vector<8x32xf32>
    %127 = vector.extract_strided_slice %124 {offsets = [0, 64], sizes = [8, 32], strides = [1, 1]} : vector<8x128xf32> to vector<8x32xf32>
    %128 = vector.extract_strided_slice %123 {offsets = [0, 96], sizes = [8, 32], strides = [1, 1]} : vector<8x128xf32> to vector<8x32xf32>
    %129 = arith.mulf %126, %111 : vector<8x32xf32>
    %130 = arith.mulf %125, %127 : vector<8x32xf32>
    %131 = arith.addf %129, %130 : vector<8x32xf32>
    %132 = math.tanh %131 : vector<8x32xf32>
    %133 = arith.mulf %128, %132 : vector<8x32xf32>
    %c6 = arith.constant 6 : index
    %c0_38 = arith.constant 0 : index
    %c0_39 = arith.constant 0 : index
    %134 = vector.load %arg9[%c6, %c0_38, %c0_39] : memref<39x8x128xf32, #tpu.memory_space<vmem>>, vector<1x8x128xf32>
    %135 = vector.shape_cast %134 : vector<1x8x128xf32> to vector<8x128xf32>
    %136 = arith.truncf %133 : vector<8x32xf32> to vector<8x32xbf16>
    %cst_40 = arith.constant dense<0.000000e+00> : vector<8x128xf32>
    %137 = tpu.matmul %136, %11, %cst_40 {dimension_numbers = #tpu.dot_dimension_numbers<[1], [0], [0], [1], [0, 0, 1, 1], [], []>} : vector<8x32xbf16>, vector<32x128xbf16>, vector<8x128xf32> -> vector<8x128xf32>
    %138 = arith.addf %135, %137 : vector<8x128xf32>
    %139 = arith.negf %138 : vector<8x128xf32>
    %140 = math.exp %139 : vector<8x128xf32>
    %cst_41 = arith.constant 1.000000e+00 : f32
    %141 = vector.broadcast %cst_41 : f32 to vector<8x128xf32>
    %142 = arith.addf %141, %140 : vector<8x128xf32>
    %143 = arith.divf %141, %142 : vector<8x128xf32>
    %144 = math.tanh %138 : vector<8x128xf32>
    %145 = vector.extract_strided_slice %143 {offsets = [0, 0], sizes = [8, 32], strides = [1, 1]} : vector<8x128xf32> to vector<8x32xf32>
    %146 = vector.extract_strided_slice %143 {offsets = [0, 32], sizes = [8, 32], strides = [1, 1]} : vector<8x128xf32> to vector<8x32xf32>
    %147 = vector.extract_strided_slice %144 {offsets = [0, 64], sizes = [8, 32], strides = [1, 1]} : vector<8x128xf32> to vector<8x32xf32>
    %148 = vector.extract_strided_slice %143 {offsets = [0, 96], sizes = [8, 32], strides = [1, 1]} : vector<8x128xf32> to vector<8x32xf32>
    %149 = arith.mulf %146, %131 : vector<8x32xf32>
    %150 = arith.mulf %145, %147 : vector<8x32xf32>
    %151 = arith.addf %149, %150 : vector<8x32xf32>
    %152 = math.tanh %151 : vector<8x32xf32>
    %153 = arith.mulf %148, %152 : vector<8x32xf32>
    %c7 = arith.constant 7 : index
    %c0_42 = arith.constant 0 : index
    %c0_43 = arith.constant 0 : index
    %154 = vector.load %arg9[%c7, %c0_42, %c0_43] : memref<39x8x128xf32, #tpu.memory_space<vmem>>, vector<1x8x128xf32>
    %155 = vector.shape_cast %154 : vector<1x8x128xf32> to vector<8x128xf32>
    %156 = arith.truncf %153 : vector<8x32xf32> to vector<8x32xbf16>
    %cst_44 = arith.constant dense<0.000000e+00> : vector<8x128xf32>
    %157 = tpu.matmul %156, %11, %cst_44 {dimension_numbers = #tpu.dot_dimension_numbers<[1], [0], [0], [1], [0, 0, 1, 1], [], []>} : vector<8x32xbf16>, vector<32x128xbf16>, vector<8x128xf32> -> vector<8x128xf32>
    %158 = arith.addf %155, %157 : vector<8x128xf32>
    %159 = arith.negf %158 : vector<8x128xf32>
    %160 = math.exp %159 : vector<8x128xf32>
    %cst_45 = arith.constant 1.000000e+00 : f32
    %161 = vector.broadcast %cst_45 : f32 to vector<8x128xf32>
    %162 = arith.addf %161, %160 : vector<8x128xf32>
    %163 = arith.divf %161, %162 : vector<8x128xf32>
    %164 = math.tanh %158 : vector<8x128xf32>
    %165 = vector.extract_strided_slice %163 {offsets = [0, 0], sizes = [8, 32], strides = [1, 1]} : vector<8x128xf32> to vector<8x32xf32>
    %166 = vector.extract_strided_slice %163 {offsets = [0, 32], sizes = [8, 32], strides = [1, 1]} : vector<8x128xf32> to vector<8x32xf32>
    %167 = vector.extract_strided_slice %164 {offsets = [0, 64], sizes = [8, 32], strides = [1, 1]} : vector<8x128xf32> to vector<8x32xf32>
    %168 = vector.extract_strided_slice %163 {offsets = [0, 96], sizes = [8, 32], strides = [1, 1]} : vector<8x128xf32> to vector<8x32xf32>
    %169 = arith.mulf %166, %151 : vector<8x32xf32>
    %170 = arith.mulf %165, %167 : vector<8x32xf32>
    %171 = arith.addf %169, %170 : vector<8x32xf32>
    %172 = math.tanh %171 : vector<8x32xf32>
    %173 = arith.mulf %168, %172 : vector<8x32xf32>
    %c8 = arith.constant 8 : index
    %c0_46 = arith.constant 0 : index
    %c0_47 = arith.constant 0 : index
    %174 = vector.load %arg9[%c8, %c0_46, %c0_47] : memref<39x8x128xf32, #tpu.memory_space<vmem>>, vector<1x8x128xf32>
    %175 = vector.shape_cast %174 : vector<1x8x128xf32> to vector<8x128xf32>
    %176 = arith.truncf %173 : vector<8x32xf32> to vector<8x32xbf16>
    %cst_48 = arith.constant dense<0.000000e+00> : vector<8x128xf32>
    %177 = tpu.matmul %176, %11, %cst_48 {dimension_numbers = #tpu.dot_dimension_numbers<[1], [0], [0], [1], [0, 0, 1, 1], [], []>} : vector<8x32xbf16>, vector<32x128xbf16>, vector<8x128xf32> -> vector<8x128xf32>
    %178 = arith.addf %175, %177 : vector<8x128xf32>
    %179 = arith.negf %178 : vector<8x128xf32>
    %180 = math.exp %179 : vector<8x128xf32>
    %cst_49 = arith.constant 1.000000e+00 : f32
    %181 = vector.broadcast %cst_49 : f32 to vector<8x128xf32>
    %182 = arith.addf %181, %180 : vector<8x128xf32>
    %183 = arith.divf %181, %182 : vector<8x128xf32>
    %184 = math.tanh %178 : vector<8x128xf32>
    %185 = vector.extract_strided_slice %183 {offsets = [0, 0], sizes = [8, 32], strides = [1, 1]} : vector<8x128xf32> to vector<8x32xf32>
    %186 = vector.extract_strided_slice %183 {offsets = [0, 32], sizes = [8, 32], strides = [1, 1]} : vector<8x128xf32> to vector<8x32xf32>
    %187 = vector.extract_strided_slice %184 {offsets = [0, 64], sizes = [8, 32], strides = [1, 1]} : vector<8x128xf32> to vector<8x32xf32>
    %188 = vector.extract_strided_slice %183 {offsets = [0, 96], sizes = [8, 32], strides = [1, 1]} : vector<8x128xf32> to vector<8x32xf32>
    %189 = arith.mulf %186, %171 : vector<8x32xf32>
    %190 = arith.mulf %185, %187 : vector<8x32xf32>
    %191 = arith.addf %189, %190 : vector<8x32xf32>
    %192 = math.tanh %191 : vector<8x32xf32>
    %193 = arith.mulf %188, %192 : vector<8x32xf32>
    %c9 = arith.constant 9 : index
    %c0_50 = arith.constant 0 : index
    %c0_51 = arith.constant 0 : index
    %194 = vector.load %arg9[%c9, %c0_50, %c0_51] : memref<39x8x128xf32, #tpu.memory_space<vmem>>, vector<1x8x128xf32>
    %195 = vector.shape_cast %194 : vector<1x8x128xf32> to vector<8x128xf32>
    %196 = arith.truncf %193 : vector<8x32xf32> to vector<8x32xbf16>
    %cst_52 = arith.constant dense<0.000000e+00> : vector<8x128xf32>
    %197 = tpu.matmul %196, %11, %cst_52 {dimension_numbers = #tpu.dot_dimension_numbers<[1], [0], [0], [1], [0, 0, 1, 1], [], []>} : vector<8x32xbf16>, vector<32x128xbf16>, vector<8x128xf32> -> vector<8x128xf32>
    %198 = arith.addf %195, %197 : vector<8x128xf32>
    %199 = arith.negf %198 : vector<8x128xf32>
    %200 = math.exp %199 : vector<8x128xf32>
    %cst_53 = arith.constant 1.000000e+00 : f32
    %201 = vector.broadcast %cst_53 : f32 to vector<8x128xf32>
    %202 = arith.addf %201, %200 : vector<8x128xf32>
    %203 = arith.divf %201, %202 : vector<8x128xf32>
    %204 = math.tanh %198 : vector<8x128xf32>
    %205 = vector.extract_strided_slice %203 {offsets = [0, 0], sizes = [8, 32], strides = [1, 1]} : vector<8x128xf32> to vector<8x32xf32>
    %206 = vector.extract_strided_slice %203 {offsets = [0, 32], sizes = [8, 32], strides = [1, 1]} : vector<8x128xf32> to vector<8x32xf32>
    %207 = vector.extract_strided_slice %204 {offsets = [0, 64], sizes = [8, 32], strides = [1, 1]} : vector<8x128xf32> to vector<8x32xf32>
    %208 = vector.extract_strided_slice %203 {offsets = [0, 96], sizes = [8, 32], strides = [1, 1]} : vector<8x128xf32> to vector<8x32xf32>
    %209 = arith.mulf %206, %191 : vector<8x32xf32>
    %210 = arith.mulf %205, %207 : vector<8x32xf32>
    %211 = arith.addf %209, %210 : vector<8x32xf32>
    %212 = math.tanh %211 : vector<8x32xf32>
    %213 = arith.mulf %208, %212 : vector<8x32xf32>
    %c10 = arith.constant 10 : index
    %c0_54 = arith.constant 0 : index
    %c0_55 = arith.constant 0 : index
    %214 = vector.load %arg9[%c10, %c0_54, %c0_55] : memref<39x8x128xf32, #tpu.memory_space<vmem>>, vector<1x8x128xf32>
    %215 = vector.shape_cast %214 : vector<1x8x128xf32> to vector<8x128xf32>
    %216 = arith.truncf %213 : vector<8x32xf32> to vector<8x32xbf16>
    %cst_56 = arith.constant dense<0.000000e+00> : vector<8x128xf32>
    %217 = tpu.matmul %216, %11, %cst_56 {dimension_numbers = #tpu.dot_dimension_numbers<[1], [0], [0], [1], [0, 0, 1, 1], [], []>} : vector<8x32xbf16>, vector<32x128xbf16>, vector<8x128xf32> -> vector<8x128xf32>
    %218 = arith.addf %215, %217 : vector<8x128xf32>
    %219 = arith.negf %218 : vector<8x128xf32>
    %220 = math.exp %219 : vector<8x128xf32>
    %cst_57 = arith.constant 1.000000e+00 : f32
    %221 = vector.broadcast %cst_57 : f32 to vector<8x128xf32>
    %222 = arith.addf %221, %220 : vector<8x128xf32>
    %223 = arith.divf %221, %222 : vector<8x128xf32>
    %224 = math.tanh %218 : vector<8x128xf32>
    %225 = vector.extract_strided_slice %223 {offsets = [0, 0], sizes = [8, 32], strides = [1, 1]} : vector<8x128xf32> to vector<8x32xf32>
    %226 = vector.extract_strided_slice %223 {offsets = [0, 32], sizes = [8, 32], strides = [1, 1]} : vector<8x128xf32> to vector<8x32xf32>
    %227 = vector.extract_strided_slice %224 {offsets = [0, 64], sizes = [8, 32], strides = [1, 1]} : vector<8x128xf32> to vector<8x32xf32>
    %228 = vector.extract_strided_slice %223 {offsets = [0, 96], sizes = [8, 32], strides = [1, 1]} : vector<8x128xf32> to vector<8x32xf32>
    %229 = arith.mulf %226, %211 : vector<8x32xf32>
    %230 = arith.mulf %225, %227 : vector<8x32xf32>
    %231 = arith.addf %229, %230 : vector<8x32xf32>
    %232 = math.tanh %231 : vector<8x32xf32>
    %233 = arith.mulf %228, %232 : vector<8x32xf32>
    %c11 = arith.constant 11 : index
    %c0_58 = arith.constant 0 : index
    %c0_59 = arith.constant 0 : index
    %234 = vector.load %arg9[%c11, %c0_58, %c0_59] : memref<39x8x128xf32, #tpu.memory_space<vmem>>, vector<1x8x128xf32>
    %235 = vector.shape_cast %234 : vector<1x8x128xf32> to vector<8x128xf32>
    %236 = arith.truncf %233 : vector<8x32xf32> to vector<8x32xbf16>
    %cst_60 = arith.constant dense<0.000000e+00> : vector<8x128xf32>
    %237 = tpu.matmul %236, %11, %cst_60 {dimension_numbers = #tpu.dot_dimension_numbers<[1], [0], [0], [1], [0, 0, 1, 1], [], []>} : vector<8x32xbf16>, vector<32x128xbf16>, vector<8x128xf32> -> vector<8x128xf32>
    %238 = arith.addf %235, %237 : vector<8x128xf32>
    %239 = arith.negf %238 : vector<8x128xf32>
    %240 = math.exp %239 : vector<8x128xf32>
    %cst_61 = arith.constant 1.000000e+00 : f32
    %241 = vector.broadcast %cst_61 : f32 to vector<8x128xf32>
    %242 = arith.addf %241, %240 : vector<8x128xf32>
    %243 = arith.divf %241, %242 : vector<8x128xf32>
    %244 = math.tanh %238 : vector<8x128xf32>
    %245 = vector.extract_strided_slice %243 {offsets = [0, 0], sizes = [8, 32], strides = [1, 1]} : vector<8x128xf32> to vector<8x32xf32>
    %246 = vector.extract_strided_slice %243 {offsets = [0, 32], sizes = [8, 32], strides = [1, 1]} : vector<8x128xf32> to vector<8x32xf32>
    %247 = vector.extract_strided_slice %244 {offsets = [0, 64], sizes = [8, 32], strides = [1, 1]} : vector<8x128xf32> to vector<8x32xf32>
    %248 = vector.extract_strided_slice %243 {offsets = [0, 96], sizes = [8, 32], strides = [1, 1]} : vector<8x128xf32> to vector<8x32xf32>
    %249 = arith.mulf %246, %231 : vector<8x32xf32>
    %250 = arith.mulf %245, %247 : vector<8x32xf32>
    %251 = arith.addf %249, %250 : vector<8x32xf32>
    %252 = math.tanh %251 : vector<8x32xf32>
    %253 = arith.mulf %248, %252 : vector<8x32xf32>
    %c12 = arith.constant 12 : index
    %c0_62 = arith.constant 0 : index
    %c0_63 = arith.constant 0 : index
    %254 = vector.load %arg9[%c12, %c0_62, %c0_63] : memref<39x8x128xf32, #tpu.memory_space<vmem>>, vector<1x8x128xf32>
    %255 = vector.shape_cast %254 : vector<1x8x128xf32> to vector<8x128xf32>
    %256 = arith.truncf %253 : vector<8x32xf32> to vector<8x32xbf16>
    %cst_64 = arith.constant dense<0.000000e+00> : vector<8x128xf32>
    %257 = tpu.matmul %256, %11, %cst_64 {dimension_numbers = #tpu.dot_dimension_numbers<[1], [0], [0], [1], [0, 0, 1, 1], [], []>} : vector<8x32xbf16>, vector<32x128xbf16>, vector<8x128xf32> -> vector<8x128xf32>
    %258 = arith.addf %255, %257 : vector<8x128xf32>
    %259 = arith.negf %258 : vector<8x128xf32>
    %260 = math.exp %259 : vector<8x128xf32>
    %cst_65 = arith.constant 1.000000e+00 : f32
    %261 = vector.broadcast %cst_65 : f32 to vector<8x128xf32>
    %262 = arith.addf %261, %260 : vector<8x128xf32>
    %263 = arith.divf %261, %262 : vector<8x128xf32>
    %264 = math.tanh %258 : vector<8x128xf32>
    %265 = vector.extract_strided_slice %263 {offsets = [0, 0], sizes = [8, 32], strides = [1, 1]} : vector<8x128xf32> to vector<8x32xf32>
    %266 = vector.extract_strided_slice %263 {offsets = [0, 32], sizes = [8, 32], strides = [1, 1]} : vector<8x128xf32> to vector<8x32xf32>
    %267 = vector.extract_strided_slice %264 {offsets = [0, 64], sizes = [8, 32], strides = [1, 1]} : vector<8x128xf32> to vector<8x32xf32>
    %268 = vector.extract_strided_slice %263 {offsets = [0, 96], sizes = [8, 32], strides = [1, 1]} : vector<8x128xf32> to vector<8x32xf32>
    %269 = arith.mulf %266, %251 : vector<8x32xf32>
    %270 = arith.mulf %265, %267 : vector<8x32xf32>
    %271 = arith.addf %269, %270 : vector<8x32xf32>
    %272 = math.tanh %271 : vector<8x32xf32>
    %273 = arith.mulf %268, %272 : vector<8x32xf32>
    %c13 = arith.constant 13 : index
    %c0_66 = arith.constant 0 : index
    %c0_67 = arith.constant 0 : index
    %274 = vector.load %arg9[%c13, %c0_66, %c0_67] : memref<39x8x128xf32, #tpu.memory_space<vmem>>, vector<1x8x128xf32>
    %275 = vector.shape_cast %274 : vector<1x8x128xf32> to vector<8x128xf32>
    %276 = arith.truncf %273 : vector<8x32xf32> to vector<8x32xbf16>
    %cst_68 = arith.constant dense<0.000000e+00> : vector<8x128xf32>
    %277 = tpu.matmul %276, %11, %cst_68 {dimension_numbers = #tpu.dot_dimension_numbers<[1], [0], [0], [1], [0, 0, 1, 1], [], []>} : vector<8x32xbf16>, vector<32x128xbf16>, vector<8x128xf32> -> vector<8x128xf32>
    %278 = arith.addf %275, %277 : vector<8x128xf32>
    %279 = arith.negf %278 : vector<8x128xf32>
    %280 = math.exp %279 : vector<8x128xf32>
    %cst_69 = arith.constant 1.000000e+00 : f32
    %281 = vector.broadcast %cst_69 : f32 to vector<8x128xf32>
    %282 = arith.addf %281, %280 : vector<8x128xf32>
    %283 = arith.divf %281, %282 : vector<8x128xf32>
    %284 = math.tanh %278 : vector<8x128xf32>
    %285 = vector.extract_strided_slice %283 {offsets = [0, 0], sizes = [8, 32], strides = [1, 1]} : vector<8x128xf32> to vector<8x32xf32>
    %286 = vector.extract_strided_slice %283 {offsets = [0, 32], sizes = [8, 32], strides = [1, 1]} : vector<8x128xf32> to vector<8x32xf32>
    %287 = vector.extract_strided_slice %284 {offsets = [0, 64], sizes = [8, 32], strides = [1, 1]} : vector<8x128xf32> to vector<8x32xf32>
    %288 = vector.extract_strided_slice %283 {offsets = [0, 96], sizes = [8, 32], strides = [1, 1]} : vector<8x128xf32> to vector<8x32xf32>
    %289 = arith.mulf %286, %271 : vector<8x32xf32>
    %290 = arith.mulf %285, %287 : vector<8x32xf32>
    %291 = arith.addf %289, %290 : vector<8x32xf32>
    %292 = math.tanh %291 : vector<8x32xf32>
    %293 = arith.mulf %288, %292 : vector<8x32xf32>
    %c14 = arith.constant 14 : index
    %c0_70 = arith.constant 0 : index
    %c0_71 = arith.constant 0 : index
    %294 = vector.load %arg9[%c14, %c0_70, %c0_71] : memref<39x8x128xf32, #tpu.memory_space<vmem>>, vector<1x8x128xf32>
    %295 = vector.shape_cast %294 : vector<1x8x128xf32> to vector<8x128xf32>
    %296 = arith.truncf %293 : vector<8x32xf32> to vector<8x32xbf16>
    %cst_72 = arith.constant dense<0.000000e+00> : vector<8x128xf32>
    %297 = tpu.matmul %296, %11, %cst_72 {dimension_numbers = #tpu.dot_dimension_numbers<[1], [0], [0], [1], [0, 0, 1, 1], [], []>} : vector<8x32xbf16>, vector<32x128xbf16>, vector<8x128xf32> -> vector<8x128xf32>
    %298 = arith.addf %295, %297 : vector<8x128xf32>
    %299 = arith.negf %298 : vector<8x128xf32>
    %300 = math.exp %299 : vector<8x128xf32>
    %cst_73 = arith.constant 1.000000e+00 : f32
    %301 = vector.broadcast %cst_73 : f32 to vector<8x128xf32>
    %302 = arith.addf %301, %300 : vector<8x128xf32>
    %303 = arith.divf %301, %302 : vector<8x128xf32>
    %304 = math.tanh %298 : vector<8x128xf32>
    %305 = vector.extract_strided_slice %303 {offsets = [0, 0], sizes = [8, 32], strides = [1, 1]} : vector<8x128xf32> to vector<8x32xf32>
    %306 = vector.extract_strided_slice %303 {offsets = [0, 32], sizes = [8, 32], strides = [1, 1]} : vector<8x128xf32> to vector<8x32xf32>
    %307 = vector.extract_strided_slice %304 {offsets = [0, 64], sizes = [8, 32], strides = [1, 1]} : vector<8x128xf32> to vector<8x32xf32>
    %308 = vector.extract_strided_slice %303 {offsets = [0, 96], sizes = [8, 32], strides = [1, 1]} : vector<8x128xf32> to vector<8x32xf32>
    %309 = arith.mulf %306, %291 : vector<8x32xf32>
    %310 = arith.mulf %305, %307 : vector<8x32xf32>
    %311 = arith.addf %309, %310 : vector<8x32xf32>
    %312 = math.tanh %311 : vector<8x32xf32>
    %313 = arith.mulf %308, %312 : vector<8x32xf32>
    %c15 = arith.constant 15 : index
    %c0_74 = arith.constant 0 : index
    %c0_75 = arith.constant 0 : index
    %314 = vector.load %arg9[%c15, %c0_74, %c0_75] : memref<39x8x128xf32, #tpu.memory_space<vmem>>, vector<1x8x128xf32>
    %315 = vector.shape_cast %314 : vector<1x8x128xf32> to vector<8x128xf32>
    %316 = arith.truncf %313 : vector<8x32xf32> to vector<8x32xbf16>
    %cst_76 = arith.constant dense<0.000000e+00> : vector<8x128xf32>
    %317 = tpu.matmul %316, %11, %cst_76 {dimension_numbers = #tpu.dot_dimension_numbers<[1], [0], [0], [1], [0, 0, 1, 1], [], []>} : vector<8x32xbf16>, vector<32x128xbf16>, vector<8x128xf32> -> vector<8x128xf32>
    %318 = arith.addf %315, %317 : vector<8x128xf32>
    %319 = arith.negf %318 : vector<8x128xf32>
    %320 = math.exp %319 : vector<8x128xf32>
    %cst_77 = arith.constant 1.000000e+00 : f32
    %321 = vector.broadcast %cst_77 : f32 to vector<8x128xf32>
    %322 = arith.addf %321, %320 : vector<8x128xf32>
    %323 = arith.divf %321, %322 : vector<8x128xf32>
    %324 = math.tanh %318 : vector<8x128xf32>
    %325 = vector.extract_strided_slice %323 {offsets = [0, 0], sizes = [8, 32], strides = [1, 1]} : vector<8x128xf32> to vector<8x32xf32>
    %326 = vector.extract_strided_slice %323 {offsets = [0, 32], sizes = [8, 32], strides = [1, 1]} : vector<8x128xf32> to vector<8x32xf32>
    %327 = vector.extract_strided_slice %324 {offsets = [0, 64], sizes = [8, 32], strides = [1, 1]} : vector<8x128xf32> to vector<8x32xf32>
    %328 = vector.extract_strided_slice %323 {offsets = [0, 96], sizes = [8, 32], strides = [1, 1]} : vector<8x128xf32> to vector<8x32xf32>
    %329 = arith.mulf %326, %311 : vector<8x32xf32>
    %330 = arith.mulf %325, %327 : vector<8x32xf32>
    %331 = arith.addf %329, %330 : vector<8x32xf32>
    %332 = math.tanh %331 : vector<8x32xf32>
    %333 = arith.mulf %328, %332 : vector<8x32xf32>
    %c16 = arith.constant 16 : index
    %c0_78 = arith.constant 0 : index
    %c0_79 = arith.constant 0 : index
    %334 = vector.load %arg9[%c16, %c0_78, %c0_79] : memref<39x8x128xf32, #tpu.memory_space<vmem>>, vector<1x8x128xf32>
    %335 = vector.shape_cast %334 : vector<1x8x128xf32> to vector<8x128xf32>
    %336 = arith.truncf %333 : vector<8x32xf32> to vector<8x32xbf16>
    %cst_80 = arith.constant dense<0.000000e+00> : vector<8x128xf32>
    %337 = tpu.matmul %336, %11, %cst_80 {dimension_numbers = #tpu.dot_dimension_numbers<[1], [0], [0], [1], [0, 0, 1, 1], [], []>} : vector<8x32xbf16>, vector<32x128xbf16>, vector<8x128xf32> -> vector<8x128xf32>
    %338 = arith.addf %335, %337 : vector<8x128xf32>
    %339 = arith.negf %338 : vector<8x128xf32>
    %340 = math.exp %339 : vector<8x128xf32>
    %cst_81 = arith.constant 1.000000e+00 : f32
    %341 = vector.broadcast %cst_81 : f32 to vector<8x128xf32>
    %342 = arith.addf %341, %340 : vector<8x128xf32>
    %343 = arith.divf %341, %342 : vector<8x128xf32>
    %344 = math.tanh %338 : vector<8x128xf32>
    %345 = vector.extract_strided_slice %343 {offsets = [0, 0], sizes = [8, 32], strides = [1, 1]} : vector<8x128xf32> to vector<8x32xf32>
    %346 = vector.extract_strided_slice %343 {offsets = [0, 32], sizes = [8, 32], strides = [1, 1]} : vector<8x128xf32> to vector<8x32xf32>
    %347 = vector.extract_strided_slice %344 {offsets = [0, 64], sizes = [8, 32], strides = [1, 1]} : vector<8x128xf32> to vector<8x32xf32>
    %348 = vector.extract_strided_slice %343 {offsets = [0, 96], sizes = [8, 32], strides = [1, 1]} : vector<8x128xf32> to vector<8x32xf32>
    %349 = arith.mulf %346, %331 : vector<8x32xf32>
    %350 = arith.mulf %345, %347 : vector<8x32xf32>
    %351 = arith.addf %349, %350 : vector<8x32xf32>
    %352 = math.tanh %351 : vector<8x32xf32>
    %353 = arith.mulf %348, %352 : vector<8x32xf32>
    %c17 = arith.constant 17 : index
    %c0_82 = arith.constant 0 : index
    %c0_83 = arith.constant 0 : index
    %354 = vector.load %arg9[%c17, %c0_82, %c0_83] : memref<39x8x128xf32, #tpu.memory_space<vmem>>, vector<1x8x128xf32>
    %355 = vector.shape_cast %354 : vector<1x8x128xf32> to vector<8x128xf32>
    %356 = arith.truncf %353 : vector<8x32xf32> to vector<8x32xbf16>
    %cst_84 = arith.constant dense<0.000000e+00> : vector<8x128xf32>
    %357 = tpu.matmul %356, %11, %cst_84 {dimension_numbers = #tpu.dot_dimension_numbers<[1], [0], [0], [1], [0, 0, 1, 1], [], []>} : vector<8x32xbf16>, vector<32x128xbf16>, vector<8x128xf32> -> vector<8x128xf32>
    %358 = arith.addf %355, %357 : vector<8x128xf32>
    %359 = arith.negf %358 : vector<8x128xf32>
    %360 = math.exp %359 : vector<8x128xf32>
    %cst_85 = arith.constant 1.000000e+00 : f32
    %361 = vector.broadcast %cst_85 : f32 to vector<8x128xf32>
    %362 = arith.addf %361, %360 : vector<8x128xf32>
    %363 = arith.divf %361, %362 : vector<8x128xf32>
    %364 = math.tanh %358 : vector<8x128xf32>
    %365 = vector.extract_strided_slice %363 {offsets = [0, 0], sizes = [8, 32], strides = [1, 1]} : vector<8x128xf32> to vector<8x32xf32>
    %366 = vector.extract_strided_slice %363 {offsets = [0, 32], sizes = [8, 32], strides = [1, 1]} : vector<8x128xf32> to vector<8x32xf32>
    %367 = vector.extract_strided_slice %364 {offsets = [0, 64], sizes = [8, 32], strides = [1, 1]} : vector<8x128xf32> to vector<8x32xf32>
    %368 = vector.extract_strided_slice %363 {offsets = [0, 96], sizes = [8, 32], strides = [1, 1]} : vector<8x128xf32> to vector<8x32xf32>
    %369 = arith.mulf %366, %351 : vector<8x32xf32>
    %370 = arith.mulf %365, %367 : vector<8x32xf32>
    %371 = arith.addf %369, %370 : vector<8x32xf32>
    %372 = math.tanh %371 : vector<8x32xf32>
    %373 = arith.mulf %368, %372 : vector<8x32xf32>
    %c18 = arith.constant 18 : index
    %c0_86 = arith.constant 0 : index
    %c0_87 = arith.constant 0 : index
    %374 = vector.load %arg9[%c18, %c0_86, %c0_87] : memref<39x8x128xf32, #tpu.memory_space<vmem>>, vector<1x8x128xf32>
    %375 = vector.shape_cast %374 : vector<1x8x128xf32> to vector<8x128xf32>
    %376 = arith.truncf %373 : vector<8x32xf32> to vector<8x32xbf16>
    %cst_88 = arith.constant dense<0.000000e+00> : vector<8x128xf32>
    %377 = tpu.matmul %376, %11, %cst_88 {dimension_numbers = #tpu.dot_dimension_numbers<[1], [0], [0], [1], [0, 0, 1, 1], [], []>} : vector<8x32xbf16>, vector<32x128xbf16>, vector<8x128xf32> -> vector<8x128xf32>
    %378 = arith.addf %375, %377 : vector<8x128xf32>
    %379 = arith.negf %378 : vector<8x128xf32>
    %380 = math.exp %379 : vector<8x128xf32>
    %cst_89 = arith.constant 1.000000e+00 : f32
    %381 = vector.broadcast %cst_89 : f32 to vector<8x128xf32>
    %382 = arith.addf %381, %380 : vector<8x128xf32>
    %383 = arith.divf %381, %382 : vector<8x128xf32>
    %384 = math.tanh %378 : vector<8x128xf32>
    %385 = vector.extract_strided_slice %383 {offsets = [0, 0], sizes = [8, 32], strides = [1, 1]} : vector<8x128xf32> to vector<8x32xf32>
    %386 = vector.extract_strided_slice %383 {offsets = [0, 32], sizes = [8, 32], strides = [1, 1]} : vector<8x128xf32> to vector<8x32xf32>
    %387 = vector.extract_strided_slice %384 {offsets = [0, 64], sizes = [8, 32], strides = [1, 1]} : vector<8x128xf32> to vector<8x32xf32>
    %388 = vector.extract_strided_slice %383 {offsets = [0, 96], sizes = [8, 32], strides = [1, 1]} : vector<8x128xf32> to vector<8x32xf32>
    %389 = arith.mulf %386, %371 : vector<8x32xf32>
    %390 = arith.mulf %385, %387 : vector<8x32xf32>
    %391 = arith.addf %389, %390 : vector<8x32xf32>
    %392 = math.tanh %391 : vector<8x32xf32>
    %393 = arith.mulf %388, %392 : vector<8x32xf32>
    %c19 = arith.constant 19 : index
    %c0_90 = arith.constant 0 : index
    %c0_91 = arith.constant 0 : index
    %394 = vector.load %arg9[%c19, %c0_90, %c0_91] : memref<39x8x128xf32, #tpu.memory_space<vmem>>, vector<1x8x128xf32>
    %395 = vector.shape_cast %394 : vector<1x8x128xf32> to vector<8x128xf32>
    %396 = arith.truncf %393 : vector<8x32xf32> to vector<8x32xbf16>
    %cst_92 = arith.constant dense<0.000000e+00> : vector<8x128xf32>
    %397 = tpu.matmul %396, %11, %cst_92 {dimension_numbers = #tpu.dot_dimension_numbers<[1], [0], [0], [1], [0, 0, 1, 1], [], []>} : vector<8x32xbf16>, vector<32x128xbf16>, vector<8x128xf32> -> vector<8x128xf32>
    %398 = arith.addf %395, %397 : vector<8x128xf32>
    %399 = arith.negf %398 : vector<8x128xf32>
    %400 = math.exp %399 : vector<8x128xf32>
    %cst_93 = arith.constant 1.000000e+00 : f32
    %401 = vector.broadcast %cst_93 : f32 to vector<8x128xf32>
    %402 = arith.addf %401, %400 : vector<8x128xf32>
    %403 = arith.divf %401, %402 : vector<8x128xf32>
    %404 = math.tanh %398 : vector<8x128xf32>
    %405 = vector.extract_strided_slice %403 {offsets = [0, 0], sizes = [8, 32], strides = [1, 1]} : vector<8x128xf32> to vector<8x32xf32>
    %406 = vector.extract_strided_slice %403 {offsets = [0, 32], sizes = [8, 32], strides = [1, 1]} : vector<8x128xf32> to vector<8x32xf32>
    %407 = vector.extract_strided_slice %404 {offsets = [0, 64], sizes = [8, 32], strides = [1, 1]} : vector<8x128xf32> to vector<8x32xf32>
    %408 = vector.extract_strided_slice %403 {offsets = [0, 96], sizes = [8, 32], strides = [1, 1]} : vector<8x128xf32> to vector<8x32xf32>
    %409 = arith.mulf %406, %391 : vector<8x32xf32>
    %410 = arith.mulf %405, %407 : vector<8x32xf32>
    %411 = arith.addf %409, %410 : vector<8x32xf32>
    %412 = math.tanh %411 : vector<8x32xf32>
    %413 = arith.mulf %408, %412 : vector<8x32xf32>
    %c20 = arith.constant 20 : index
    %c0_94 = arith.constant 0 : index
    %c0_95 = arith.constant 0 : index
    %414 = vector.load %arg9[%c20, %c0_94, %c0_95] : memref<39x8x128xf32, #tpu.memory_space<vmem>>, vector<1x8x128xf32>
    %415 = vector.shape_cast %414 : vector<1x8x128xf32> to vector<8x128xf32>
    %416 = arith.truncf %413 : vector<8x32xf32> to vector<8x32xbf16>
    %cst_96 = arith.constant dense<0.000000e+00> : vector<8x128xf32>
    %417 = tpu.matmul %416, %11, %cst_96 {dimension_numbers = #tpu.dot_dimension_numbers<[1], [0], [0], [1], [0, 0, 1, 1], [], []>} : vector<8x32xbf16>, vector<32x128xbf16>, vector<8x128xf32> -> vector<8x128xf32>
    %418 = arith.addf %415, %417 : vector<8x128xf32>
    %419 = arith.negf %418 : vector<8x128xf32>
    %420 = math.exp %419 : vector<8x128xf32>
    %cst_97 = arith.constant 1.000000e+00 : f32
    %421 = vector.broadcast %cst_97 : f32 to vector<8x128xf32>
    %422 = arith.addf %421, %420 : vector<8x128xf32>
    %423 = arith.divf %421, %422 : vector<8x128xf32>
    %424 = math.tanh %418 : vector<8x128xf32>
    %425 = vector.extract_strided_slice %423 {offsets = [0, 0], sizes = [8, 32], strides = [1, 1]} : vector<8x128xf32> to vector<8x32xf32>
    %426 = vector.extract_strided_slice %423 {offsets = [0, 32], sizes = [8, 32], strides = [1, 1]} : vector<8x128xf32> to vector<8x32xf32>
    %427 = vector.extract_strided_slice %424 {offsets = [0, 64], sizes = [8, 32], strides = [1, 1]} : vector<8x128xf32> to vector<8x32xf32>
    %428 = vector.extract_strided_slice %423 {offsets = [0, 96], sizes = [8, 32], strides = [1, 1]} : vector<8x128xf32> to vector<8x32xf32>
    %429 = arith.mulf %426, %411 : vector<8x32xf32>
    %430 = arith.mulf %425, %427 : vector<8x32xf32>
    %431 = arith.addf %429, %430 : vector<8x32xf32>
    %432 = math.tanh %431 : vector<8x32xf32>
    %433 = arith.mulf %428, %432 : vector<8x32xf32>
    %c21 = arith.constant 21 : index
    %c0_98 = arith.constant 0 : index
    %c0_99 = arith.constant 0 : index
    %434 = vector.load %arg9[%c21, %c0_98, %c0_99] : memref<39x8x128xf32, #tpu.memory_space<vmem>>, vector<1x8x128xf32>
    %435 = vector.shape_cast %434 : vector<1x8x128xf32> to vector<8x128xf32>
    %436 = arith.truncf %433 : vector<8x32xf32> to vector<8x32xbf16>
    %cst_100 = arith.constant dense<0.000000e+00> : vector<8x128xf32>
    %437 = tpu.matmul %436, %11, %cst_100 {dimension_numbers = #tpu.dot_dimension_numbers<[1], [0], [0], [1], [0, 0, 1, 1], [], []>} : vector<8x32xbf16>, vector<32x128xbf16>, vector<8x128xf32> -> vector<8x128xf32>
    %438 = arith.addf %435, %437 : vector<8x128xf32>
    %439 = arith.negf %438 : vector<8x128xf32>
    %440 = math.exp %439 : vector<8x128xf32>
    %cst_101 = arith.constant 1.000000e+00 : f32
    %441 = vector.broadcast %cst_101 : f32 to vector<8x128xf32>
    %442 = arith.addf %441, %440 : vector<8x128xf32>
    %443 = arith.divf %441, %442 : vector<8x128xf32>
    %444 = math.tanh %438 : vector<8x128xf32>
    %445 = vector.extract_strided_slice %443 {offsets = [0, 0], sizes = [8, 32], strides = [1, 1]} : vector<8x128xf32> to vector<8x32xf32>
    %446 = vector.extract_strided_slice %443 {offsets = [0, 32], sizes = [8, 32], strides = [1, 1]} : vector<8x128xf32> to vector<8x32xf32>
    %447 = vector.extract_strided_slice %444 {offsets = [0, 64], sizes = [8, 32], strides = [1, 1]} : vector<8x128xf32> to vector<8x32xf32>
    %448 = vector.extract_strided_slice %443 {offsets = [0, 96], sizes = [8, 32], strides = [1, 1]} : vector<8x128xf32> to vector<8x32xf32>
    %449 = arith.mulf %446, %431 : vector<8x32xf32>
    %450 = arith.mulf %445, %447 : vector<8x32xf32>
    %451 = arith.addf %449, %450 : vector<8x32xf32>
    %452 = math.tanh %451 : vector<8x32xf32>
    %453 = arith.mulf %448, %452 : vector<8x32xf32>
    %c22 = arith.constant 22 : index
    %c0_102 = arith.constant 0 : index
    %c0_103 = arith.constant 0 : index
    %454 = vector.load %arg9[%c22, %c0_102, %c0_103] : memref<39x8x128xf32, #tpu.memory_space<vmem>>, vector<1x8x128xf32>
    %455 = vector.shape_cast %454 : vector<1x8x128xf32> to vector<8x128xf32>
    %456 = arith.truncf %453 : vector<8x32xf32> to vector<8x32xbf16>
    %cst_104 = arith.constant dense<0.000000e+00> : vector<8x128xf32>
    %457 = tpu.matmul %456, %11, %cst_104 {dimension_numbers = #tpu.dot_dimension_numbers<[1], [0], [0], [1], [0, 0, 1, 1], [], []>} : vector<8x32xbf16>, vector<32x128xbf16>, vector<8x128xf32> -> vector<8x128xf32>
    %458 = arith.addf %455, %457 : vector<8x128xf32>
    %459 = arith.negf %458 : vector<8x128xf32>
    %460 = math.exp %459 : vector<8x128xf32>
    %cst_105 = arith.constant 1.000000e+00 : f32
    %461 = vector.broadcast %cst_105 : f32 to vector<8x128xf32>
    %462 = arith.addf %461, %460 : vector<8x128xf32>
    %463 = arith.divf %461, %462 : vector<8x128xf32>
    %464 = math.tanh %458 : vector<8x128xf32>
    %465 = vector.extract_strided_slice %463 {offsets = [0, 0], sizes = [8, 32], strides = [1, 1]} : vector<8x128xf32> to vector<8x32xf32>
    %466 = vector.extract_strided_slice %463 {offsets = [0, 32], sizes = [8, 32], strides = [1, 1]} : vector<8x128xf32> to vector<8x32xf32>
    %467 = vector.extract_strided_slice %464 {offsets = [0, 64], sizes = [8, 32], strides = [1, 1]} : vector<8x128xf32> to vector<8x32xf32>
    %468 = vector.extract_strided_slice %463 {offsets = [0, 96], sizes = [8, 32], strides = [1, 1]} : vector<8x128xf32> to vector<8x32xf32>
    %469 = arith.mulf %466, %451 : vector<8x32xf32>
    %470 = arith.mulf %465, %467 : vector<8x32xf32>
    %471 = arith.addf %469, %470 : vector<8x32xf32>
    %472 = math.tanh %471 : vector<8x32xf32>
    %473 = arith.mulf %468, %472 : vector<8x32xf32>
    %c23 = arith.constant 23 : index
    %c0_106 = arith.constant 0 : index
    %c0_107 = arith.constant 0 : index
    %474 = vector.load %arg9[%c23, %c0_106, %c0_107] : memref<39x8x128xf32, #tpu.memory_space<vmem>>, vector<1x8x128xf32>
    %475 = vector.shape_cast %474 : vector<1x8x128xf32> to vector<8x128xf32>
    %476 = arith.truncf %473 : vector<8x32xf32> to vector<8x32xbf16>
    %cst_108 = arith.constant dense<0.000000e+00> : vector<8x128xf32>
    %477 = tpu.matmul %476, %11, %cst_108 {dimension_numbers = #tpu.dot_dimension_numbers<[1], [0], [0], [1], [0, 0, 1, 1], [], []>} : vector<8x32xbf16>, vector<32x128xbf16>, vector<8x128xf32> -> vector<8x128xf32>
    %478 = arith.addf %475, %477 : vector<8x128xf32>
    %479 = arith.negf %478 : vector<8x128xf32>
    %480 = math.exp %479 : vector<8x128xf32>
    %cst_109 = arith.constant 1.000000e+00 : f32
    %481 = vector.broadcast %cst_109 : f32 to vector<8x128xf32>
    %482 = arith.addf %481, %480 : vector<8x128xf32>
    %483 = arith.divf %481, %482 : vector<8x128xf32>
    %484 = math.tanh %478 : vector<8x128xf32>
    %485 = vector.extract_strided_slice %483 {offsets = [0, 0], sizes = [8, 32], strides = [1, 1]} : vector<8x128xf32> to vector<8x32xf32>
    %486 = vector.extract_strided_slice %483 {offsets = [0, 32], sizes = [8, 32], strides = [1, 1]} : vector<8x128xf32> to vector<8x32xf32>
    %487 = vector.extract_strided_slice %484 {offsets = [0, 64], sizes = [8, 32], strides = [1, 1]} : vector<8x128xf32> to vector<8x32xf32>
    %488 = vector.extract_strided_slice %483 {offsets = [0, 96], sizes = [8, 32], strides = [1, 1]} : vector<8x128xf32> to vector<8x32xf32>
    %489 = arith.mulf %486, %471 : vector<8x32xf32>
    %490 = arith.mulf %485, %487 : vector<8x32xf32>
    %491 = arith.addf %489, %490 : vector<8x32xf32>
    %492 = math.tanh %491 : vector<8x32xf32>
    %493 = arith.mulf %488, %492 : vector<8x32xf32>
    %c24 = arith.constant 24 : index
    %c0_110 = arith.constant 0 : index
    %c0_111 = arith.constant 0 : index
    %494 = vector.load %arg9[%c24, %c0_110, %c0_111] : memref<39x8x128xf32, #tpu.memory_space<vmem>>, vector<1x8x128xf32>
    %495 = vector.shape_cast %494 : vector<1x8x128xf32> to vector<8x128xf32>
    %496 = arith.truncf %493 : vector<8x32xf32> to vector<8x32xbf16>
    %cst_112 = arith.constant dense<0.000000e+00> : vector<8x128xf32>
    %497 = tpu.matmul %496, %11, %cst_112 {dimension_numbers = #tpu.dot_dimension_numbers<[1], [0], [0], [1], [0, 0, 1, 1], [], []>} : vector<8x32xbf16>, vector<32x128xbf16>, vector<8x128xf32> -> vector<8x128xf32>
    %498 = arith.addf %495, %497 : vector<8x128xf32>
    %499 = arith.negf %498 : vector<8x128xf32>
    %500 = math.exp %499 : vector<8x128xf32>
    %cst_113 = arith.constant 1.000000e+00 : f32
    %501 = vector.broadcast %cst_113 : f32 to vector<8x128xf32>
    %502 = arith.addf %501, %500 : vector<8x128xf32>
    %503 = arith.divf %501, %502 : vector<8x128xf32>
    %504 = math.tanh %498 : vector<8x128xf32>
    %505 = vector.extract_strided_slice %503 {offsets = [0, 0], sizes = [8, 32], strides = [1, 1]} : vector<8x128xf32> to vector<8x32xf32>
    %506 = vector.extract_strided_slice %503 {offsets = [0, 32], sizes = [8, 32], strides = [1, 1]} : vector<8x128xf32> to vector<8x32xf32>
    %507 = vector.extract_strided_slice %504 {offsets = [0, 64], sizes = [8, 32], strides = [1, 1]} : vector<8x128xf32> to vector<8x32xf32>
    %508 = vector.extract_strided_slice %503 {offsets = [0, 96], sizes = [8, 32], strides = [1, 1]} : vector<8x128xf32> to vector<8x32xf32>
    %509 = arith.mulf %506, %491 : vector<8x32xf32>
    %510 = arith.mulf %505, %507 : vector<8x32xf32>
    %511 = arith.addf %509, %510 : vector<8x32xf32>
    %512 = math.tanh %511 : vector<8x32xf32>
    %513 = arith.mulf %508, %512 : vector<8x32xf32>
    %c25 = arith.constant 25 : index
    %c0_114 = arith.constant 0 : index
    %c0_115 = arith.constant 0 : index
    %514 = vector.load %arg9[%c25, %c0_114, %c0_115] : memref<39x8x128xf32, #tpu.memory_space<vmem>>, vector<1x8x128xf32>
    %515 = vector.shape_cast %514 : vector<1x8x128xf32> to vector<8x128xf32>
    %516 = arith.truncf %513 : vector<8x32xf32> to vector<8x32xbf16>
    %cst_116 = arith.constant dense<0.000000e+00> : vector<8x128xf32>
    %517 = tpu.matmul %516, %11, %cst_116 {dimension_numbers = #tpu.dot_dimension_numbers<[1], [0], [0], [1], [0, 0, 1, 1], [], []>} : vector<8x32xbf16>, vector<32x128xbf16>, vector<8x128xf32> -> vector<8x128xf32>
    %518 = arith.addf %515, %517 : vector<8x128xf32>
    %519 = arith.negf %518 : vector<8x128xf32>
    %520 = math.exp %519 : vector<8x128xf32>
    %cst_117 = arith.constant 1.000000e+00 : f32
    %521 = vector.broadcast %cst_117 : f32 to vector<8x128xf32>
    %522 = arith.addf %521, %520 : vector<8x128xf32>
    %523 = arith.divf %521, %522 : vector<8x128xf32>
    %524 = math.tanh %518 : vector<8x128xf32>
    %525 = vector.extract_strided_slice %523 {offsets = [0, 0], sizes = [8, 32], strides = [1, 1]} : vector<8x128xf32> to vector<8x32xf32>
    %526 = vector.extract_strided_slice %523 {offsets = [0, 32], sizes = [8, 32], strides = [1, 1]} : vector<8x128xf32> to vector<8x32xf32>
    %527 = vector.extract_strided_slice %524 {offsets = [0, 64], sizes = [8, 32], strides = [1, 1]} : vector<8x128xf32> to vector<8x32xf32>
    %528 = vector.extract_strided_slice %523 {offsets = [0, 96], sizes = [8, 32], strides = [1, 1]} : vector<8x128xf32> to vector<8x32xf32>
    %529 = arith.mulf %526, %511 : vector<8x32xf32>
    %530 = arith.mulf %525, %527 : vector<8x32xf32>
    %531 = arith.addf %529, %530 : vector<8x32xf32>
    %532 = math.tanh %531 : vector<8x32xf32>
    %533 = arith.mulf %528, %532 : vector<8x32xf32>
    %c26 = arith.constant 26 : index
    %c0_118 = arith.constant 0 : index
    %c0_119 = arith.constant 0 : index
    %534 = vector.load %arg9[%c26, %c0_118, %c0_119] : memref<39x8x128xf32, #tpu.memory_space<vmem>>, vector<1x8x128xf32>
    %535 = vector.shape_cast %534 : vector<1x8x128xf32> to vector<8x128xf32>
    %536 = arith.truncf %533 : vector<8x32xf32> to vector<8x32xbf16>
    %cst_120 = arith.constant dense<0.000000e+00> : vector<8x128xf32>
    %537 = tpu.matmul %536, %11, %cst_120 {dimension_numbers = #tpu.dot_dimension_numbers<[1], [0], [0], [1], [0, 0, 1, 1], [], []>} : vector<8x32xbf16>, vector<32x128xbf16>, vector<8x128xf32> -> vector<8x128xf32>
    %538 = arith.addf %535, %537 : vector<8x128xf32>
    %539 = arith.negf %538 : vector<8x128xf32>
    %540 = math.exp %539 : vector<8x128xf32>
    %cst_121 = arith.constant 1.000000e+00 : f32
    %541 = vector.broadcast %cst_121 : f32 to vector<8x128xf32>
    %542 = arith.addf %541, %540 : vector<8x128xf32>
    %543 = arith.divf %541, %542 : vector<8x128xf32>
    %544 = math.tanh %538 : vector<8x128xf32>
    %545 = vector.extract_strided_slice %543 {offsets = [0, 0], sizes = [8, 32], strides = [1, 1]} : vector<8x128xf32> to vector<8x32xf32>
    %546 = vector.extract_strided_slice %543 {offsets = [0, 32], sizes = [8, 32], strides = [1, 1]} : vector<8x128xf32> to vector<8x32xf32>
    %547 = vector.extract_strided_slice %544 {offsets = [0, 64], sizes = [8, 32], strides = [1, 1]} : vector<8x128xf32> to vector<8x32xf32>
    %548 = vector.extract_strided_slice %543 {offsets = [0, 96], sizes = [8, 32], strides = [1, 1]} : vector<8x128xf32> to vector<8x32xf32>
    %549 = arith.mulf %546, %531 : vector<8x32xf32>
    %550 = arith.mulf %545, %547 : vector<8x32xf32>
    %551 = arith.addf %549, %550 : vector<8x32xf32>
    %552 = math.tanh %551 : vector<8x32xf32>
    %553 = arith.mulf %548, %552 : vector<8x32xf32>
    %c27 = arith.constant 27 : index
    %c0_122 = arith.constant 0 : index
    %c0_123 = arith.constant 0 : index
    %554 = vector.load %arg9[%c27, %c0_122, %c0_123] : memref<39x8x128xf32, #tpu.memory_space<vmem>>, vector<1x8x128xf32>
    %555 = vector.shape_cast %554 : vector<1x8x128xf32> to vector<8x128xf32>
    %556 = arith.truncf %553 : vector<8x32xf32> to vector<8x32xbf16>
    %cst_124 = arith.constant dense<0.000000e+00> : vector<8x128xf32>
    %557 = tpu.matmul %556, %11, %cst_124 {dimension_numbers = #tpu.dot_dimension_numbers<[1], [0], [0], [1], [0, 0, 1, 1], [], []>} : vector<8x32xbf16>, vector<32x128xbf16>, vector<8x128xf32> -> vector<8x128xf32>
    %558 = arith.addf %555, %557 : vector<8x128xf32>
    %559 = arith.negf %558 : vector<8x128xf32>
    %560 = math.exp %559 : vector<8x128xf32>
    %cst_125 = arith.constant 1.000000e+00 : f32
    %561 = vector.broadcast %cst_125 : f32 to vector<8x128xf32>
    %562 = arith.addf %561, %560 : vector<8x128xf32>
    %563 = arith.divf %561, %562 : vector<8x128xf32>
    %564 = math.tanh %558 : vector<8x128xf32>
    %565 = vector.extract_strided_slice %563 {offsets = [0, 0], sizes = [8, 32], strides = [1, 1]} : vector<8x128xf32> to vector<8x32xf32>
    %566 = vector.extract_strided_slice %563 {offsets = [0, 32], sizes = [8, 32], strides = [1, 1]} : vector<8x128xf32> to vector<8x32xf32>
    %567 = vector.extract_strided_slice %564 {offsets = [0, 64], sizes = [8, 32], strides = [1, 1]} : vector<8x128xf32> to vector<8x32xf32>
    %568 = vector.extract_strided_slice %563 {offsets = [0, 96], sizes = [8, 32], strides = [1, 1]} : vector<8x128xf32> to vector<8x32xf32>
    %569 = arith.mulf %566, %551 : vector<8x32xf32>
    %570 = arith.mulf %565, %567 : vector<8x32xf32>
    %571 = arith.addf %569, %570 : vector<8x32xf32>
    %572 = math.tanh %571 : vector<8x32xf32>
    %573 = arith.mulf %568, %572 : vector<8x32xf32>
    %c28 = arith.constant 28 : index
    %c0_126 = arith.constant 0 : index
    %c0_127 = arith.constant 0 : index
    %574 = vector.load %arg9[%c28, %c0_126, %c0_127] : memref<39x8x128xf32, #tpu.memory_space<vmem>>, vector<1x8x128xf32>
    %575 = vector.shape_cast %574 : vector<1x8x128xf32> to vector<8x128xf32>
    %576 = arith.truncf %573 : vector<8x32xf32> to vector<8x32xbf16>
    %cst_128 = arith.constant dense<0.000000e+00> : vector<8x128xf32>
    %577 = tpu.matmul %576, %11, %cst_128 {dimension_numbers = #tpu.dot_dimension_numbers<[1], [0], [0], [1], [0, 0, 1, 1], [], []>} : vector<8x32xbf16>, vector<32x128xbf16>, vector<8x128xf32> -> vector<8x128xf32>
    %578 = arith.addf %575, %577 : vector<8x128xf32>
    %579 = arith.negf %578 : vector<8x128xf32>
    %580 = math.exp %579 : vector<8x128xf32>
    %cst_129 = arith.constant 1.000000e+00 : f32
    %581 = vector.broadcast %cst_129 : f32 to vector<8x128xf32>
    %582 = arith.addf %581, %580 : vector<8x128xf32>
    %583 = arith.divf %581, %582 : vector<8x128xf32>
    %584 = math.tanh %578 : vector<8x128xf32>
    %585 = vector.extract_strided_slice %583 {offsets = [0, 0], sizes = [8, 32], strides = [1, 1]} : vector<8x128xf32> to vector<8x32xf32>
    %586 = vector.extract_strided_slice %583 {offsets = [0, 32], sizes = [8, 32], strides = [1, 1]} : vector<8x128xf32> to vector<8x32xf32>
    %587 = vector.extract_strided_slice %584 {offsets = [0, 64], sizes = [8, 32], strides = [1, 1]} : vector<8x128xf32> to vector<8x32xf32>
    %588 = vector.extract_strided_slice %583 {offsets = [0, 96], sizes = [8, 32], strides = [1, 1]} : vector<8x128xf32> to vector<8x32xf32>
    %589 = arith.mulf %586, %571 : vector<8x32xf32>
    %590 = arith.mulf %585, %587 : vector<8x32xf32>
    %591 = arith.addf %589, %590 : vector<8x32xf32>
    %592 = math.tanh %591 : vector<8x32xf32>
    %593 = arith.mulf %588, %592 : vector<8x32xf32>
    %c29 = arith.constant 29 : index
    %c0_130 = arith.constant 0 : index
    %c0_131 = arith.constant 0 : index
    %594 = vector.load %arg9[%c29, %c0_130, %c0_131] : memref<39x8x128xf32, #tpu.memory_space<vmem>>, vector<1x8x128xf32>
    %595 = vector.shape_cast %594 : vector<1x8x128xf32> to vector<8x128xf32>
    %596 = arith.truncf %593 : vector<8x32xf32> to vector<8x32xbf16>
    %cst_132 = arith.constant dense<0.000000e+00> : vector<8x128xf32>
    %597 = tpu.matmul %596, %11, %cst_132 {dimension_numbers = #tpu.dot_dimension_numbers<[1], [0], [0], [1], [0, 0, 1, 1], [], []>} : vector<8x32xbf16>, vector<32x128xbf16>, vector<8x128xf32> -> vector<8x128xf32>
    %598 = arith.addf %595, %597 : vector<8x128xf32>
    %599 = arith.negf %598 : vector<8x128xf32>
    %600 = math.exp %599 : vector<8x128xf32>
    %cst_133 = arith.constant 1.000000e+00 : f32
    %601 = vector.broadcast %cst_133 : f32 to vector<8x128xf32>
    %602 = arith.addf %601, %600 : vector<8x128xf32>
    %603 = arith.divf %601, %602 : vector<8x128xf32>
    %604 = math.tanh %598 : vector<8x128xf32>
    %605 = vector.extract_strided_slice %603 {offsets = [0, 0], sizes = [8, 32], strides = [1, 1]} : vector<8x128xf32> to vector<8x32xf32>
    %606 = vector.extract_strided_slice %603 {offsets = [0, 32], sizes = [8, 32], strides = [1, 1]} : vector<8x128xf32> to vector<8x32xf32>
    %607 = vector.extract_strided_slice %604 {offsets = [0, 64], sizes = [8, 32], strides = [1, 1]} : vector<8x128xf32> to vector<8x32xf32>
    %608 = vector.extract_strided_slice %603 {offsets = [0, 96], sizes = [8, 32], strides = [1, 1]} : vector<8x128xf32> to vector<8x32xf32>
    %609 = arith.mulf %606, %591 : vector<8x32xf32>
    %610 = arith.mulf %605, %607 : vector<8x32xf32>
    %611 = arith.addf %609, %610 : vector<8x32xf32>
    %612 = math.tanh %611 : vector<8x32xf32>
    %613 = arith.mulf %608, %612 : vector<8x32xf32>
    %c30 = arith.constant 30 : index
    %c0_134 = arith.constant 0 : index
    %c0_135 = arith.constant 0 : index
    %614 = vector.load %arg9[%c30, %c0_134, %c0_135] : memref<39x8x128xf32, #tpu.memory_space<vmem>>, vector<1x8x128xf32>
    %615 = vector.shape_cast %614 : vector<1x8x128xf32> to vector<8x128xf32>
    %616 = arith.truncf %613 : vector<8x32xf32> to vector<8x32xbf16>
    %cst_136 = arith.constant dense<0.000000e+00> : vector<8x128xf32>
    %617 = tpu.matmul %616, %11, %cst_136 {dimension_numbers = #tpu.dot_dimension_numbers<[1], [0], [0], [1], [0, 0, 1, 1], [], []>} : vector<8x32xbf16>, vector<32x128xbf16>, vector<8x128xf32> -> vector<8x128xf32>
    %618 = arith.addf %615, %617 : vector<8x128xf32>
    %619 = arith.negf %618 : vector<8x128xf32>
    %620 = math.exp %619 : vector<8x128xf32>
    %cst_137 = arith.constant 1.000000e+00 : f32
    %621 = vector.broadcast %cst_137 : f32 to vector<8x128xf32>
    %622 = arith.addf %621, %620 : vector<8x128xf32>
    %623 = arith.divf %621, %622 : vector<8x128xf32>
    %624 = math.tanh %618 : vector<8x128xf32>
    %625 = vector.extract_strided_slice %623 {offsets = [0, 0], sizes = [8, 32], strides = [1, 1]} : vector<8x128xf32> to vector<8x32xf32>
    %626 = vector.extract_strided_slice %623 {offsets = [0, 32], sizes = [8, 32], strides = [1, 1]} : vector<8x128xf32> to vector<8x32xf32>
    %627 = vector.extract_strided_slice %624 {offsets = [0, 64], sizes = [8, 32], strides = [1, 1]} : vector<8x128xf32> to vector<8x32xf32>
    %628 = vector.extract_strided_slice %623 {offsets = [0, 96], sizes = [8, 32], strides = [1, 1]} : vector<8x128xf32> to vector<8x32xf32>
    %629 = arith.mulf %626, %611 : vector<8x32xf32>
    %630 = arith.mulf %625, %627 : vector<8x32xf32>
    %631 = arith.addf %629, %630 : vector<8x32xf32>
    %632 = math.tanh %631 : vector<8x32xf32>
    %633 = arith.mulf %628, %632 : vector<8x32xf32>
    %c31 = arith.constant 31 : index
    %c0_138 = arith.constant 0 : index
    %c0_139 = arith.constant 0 : index
    %634 = vector.load %arg9[%c31, %c0_138, %c0_139] : memref<39x8x128xf32, #tpu.memory_space<vmem>>, vector<1x8x128xf32>
    %635 = vector.shape_cast %634 : vector<1x8x128xf32> to vector<8x128xf32>
    %636 = arith.truncf %633 : vector<8x32xf32> to vector<8x32xbf16>
    %cst_140 = arith.constant dense<0.000000e+00> : vector<8x128xf32>
    %637 = tpu.matmul %636, %11, %cst_140 {dimension_numbers = #tpu.dot_dimension_numbers<[1], [0], [0], [1], [0, 0, 1, 1], [], []>} : vector<8x32xbf16>, vector<32x128xbf16>, vector<8x128xf32> -> vector<8x128xf32>
    %638 = arith.addf %635, %637 : vector<8x128xf32>
    %639 = arith.negf %638 : vector<8x128xf32>
    %640 = math.exp %639 : vector<8x128xf32>
    %cst_141 = arith.constant 1.000000e+00 : f32
    %641 = vector.broadcast %cst_141 : f32 to vector<8x128xf32>
    %642 = arith.addf %641, %640 : vector<8x128xf32>
    %643 = arith.divf %641, %642 : vector<8x128xf32>
    %644 = math.tanh %638 : vector<8x128xf32>
    %645 = vector.extract_strided_slice %643 {offsets = [0, 0], sizes = [8, 32], strides = [1, 1]} : vector<8x128xf32> to vector<8x32xf32>
    %646 = vector.extract_strided_slice %643 {offsets = [0, 32], sizes = [8, 32], strides = [1, 1]} : vector<8x128xf32> to vector<8x32xf32>
    %647 = vector.extract_strided_slice %644 {offsets = [0, 64], sizes = [8, 32], strides = [1, 1]} : vector<8x128xf32> to vector<8x32xf32>
    %648 = vector.extract_strided_slice %643 {offsets = [0, 96], sizes = [8, 32], strides = [1, 1]} : vector<8x128xf32> to vector<8x32xf32>
    %649 = arith.mulf %646, %631 : vector<8x32xf32>
    %650 = arith.mulf %645, %647 : vector<8x32xf32>
    %651 = arith.addf %649, %650 : vector<8x32xf32>
    %652 = math.tanh %651 : vector<8x32xf32>
    %653 = arith.mulf %648, %652 : vector<8x32xf32>
    %c32 = arith.constant 32 : index
    %c0_142 = arith.constant 0 : index
    %c0_143 = arith.constant 0 : index
    %654 = vector.load %arg9[%c32, %c0_142, %c0_143] : memref<39x8x128xf32, #tpu.memory_space<vmem>>, vector<1x8x128xf32>
    %655 = vector.shape_cast %654 : vector<1x8x128xf32> to vector<8x128xf32>
    %656 = arith.truncf %653 : vector<8x32xf32> to vector<8x32xbf16>
    %cst_144 = arith.constant dense<0.000000e+00> : vector<8x128xf32>
    %657 = tpu.matmul %656, %11, %cst_144 {dimension_numbers = #tpu.dot_dimension_numbers<[1], [0], [0], [1], [0, 0, 1, 1], [], []>} : vector<8x32xbf16>, vector<32x128xbf16>, vector<8x128xf32> -> vector<8x128xf32>
    %658 = arith.addf %655, %657 : vector<8x128xf32>
    %659 = arith.negf %658 : vector<8x128xf32>
    %660 = math.exp %659 : vector<8x128xf32>
    %cst_145 = arith.constant 1.000000e+00 : f32
    %661 = vector.broadcast %cst_145 : f32 to vector<8x128xf32>
    %662 = arith.addf %661, %660 : vector<8x128xf32>
    %663 = arith.divf %661, %662 : vector<8x128xf32>
    %664 = math.tanh %658 : vector<8x128xf32>
    %665 = vector.extract_strided_slice %663 {offsets = [0, 0], sizes = [8, 32], strides = [1, 1]} : vector<8x128xf32> to vector<8x32xf32>
    %666 = vector.extract_strided_slice %663 {offsets = [0, 32], sizes = [8, 32], strides = [1, 1]} : vector<8x128xf32> to vector<8x32xf32>
    %667 = vector.extract_strided_slice %664 {offsets = [0, 64], sizes = [8, 32], strides = [1, 1]} : vector<8x128xf32> to vector<8x32xf32>
    %668 = vector.extract_strided_slice %663 {offsets = [0, 96], sizes = [8, 32], strides = [1, 1]} : vector<8x128xf32> to vector<8x32xf32>
    %669 = arith.mulf %666, %651 : vector<8x32xf32>
    %670 = arith.mulf %665, %667 : vector<8x32xf32>
    %671 = arith.addf %669, %670 : vector<8x32xf32>
    %672 = math.tanh %671 : vector<8x32xf32>
    %673 = arith.mulf %668, %672 : vector<8x32xf32>
    %c33 = arith.constant 33 : index
    %c0_146 = arith.constant 0 : index
    %c0_147 = arith.constant 0 : index
    %674 = vector.load %arg9[%c33, %c0_146, %c0_147] : memref<39x8x128xf32, #tpu.memory_space<vmem>>, vector<1x8x128xf32>
    %675 = vector.shape_cast %674 : vector<1x8x128xf32> to vector<8x128xf32>
    %676 = arith.truncf %673 : vector<8x32xf32> to vector<8x32xbf16>
    %cst_148 = arith.constant dense<0.000000e+00> : vector<8x128xf32>
    %677 = tpu.matmul %676, %11, %cst_148 {dimension_numbers = #tpu.dot_dimension_numbers<[1], [0], [0], [1], [0, 0, 1, 1], [], []>} : vector<8x32xbf16>, vector<32x128xbf16>, vector<8x128xf32> -> vector<8x128xf32>
    %678 = arith.addf %675, %677 : vector<8x128xf32>
    %679 = arith.negf %678 : vector<8x128xf32>
    %680 = math.exp %679 : vector<8x128xf32>
    %cst_149 = arith.constant 1.000000e+00 : f32
    %681 = vector.broadcast %cst_149 : f32 to vector<8x128xf32>
    %682 = arith.addf %681, %680 : vector<8x128xf32>
    %683 = arith.divf %681, %682 : vector<8x128xf32>
    %684 = math.tanh %678 : vector<8x128xf32>
    %685 = vector.extract_strided_slice %683 {offsets = [0, 0], sizes = [8, 32], strides = [1, 1]} : vector<8x128xf32> to vector<8x32xf32>
    %686 = vector.extract_strided_slice %683 {offsets = [0, 32], sizes = [8, 32], strides = [1, 1]} : vector<8x128xf32> to vector<8x32xf32>
    %687 = vector.extract_strided_slice %684 {offsets = [0, 64], sizes = [8, 32], strides = [1, 1]} : vector<8x128xf32> to vector<8x32xf32>
    %688 = vector.extract_strided_slice %683 {offsets = [0, 96], sizes = [8, 32], strides = [1, 1]} : vector<8x128xf32> to vector<8x32xf32>
    %689 = arith.mulf %686, %671 : vector<8x32xf32>
    %690 = arith.mulf %685, %687 : vector<8x32xf32>
    %691 = arith.addf %689, %690 : vector<8x32xf32>
    %692 = math.tanh %691 : vector<8x32xf32>
    %693 = arith.mulf %688, %692 : vector<8x32xf32>
    %c34 = arith.constant 34 : index
    %c0_150 = arith.constant 0 : index
    %c0_151 = arith.constant 0 : index
    %694 = vector.load %arg9[%c34, %c0_150, %c0_151] : memref<39x8x128xf32, #tpu.memory_space<vmem>>, vector<1x8x128xf32>
    %695 = vector.shape_cast %694 : vector<1x8x128xf32> to vector<8x128xf32>
    %696 = arith.truncf %693 : vector<8x32xf32> to vector<8x32xbf16>
    %cst_152 = arith.constant dense<0.000000e+00> : vector<8x128xf32>
    %697 = tpu.matmul %696, %11, %cst_152 {dimension_numbers = #tpu.dot_dimension_numbers<[1], [0], [0], [1], [0, 0, 1, 1], [], []>} : vector<8x32xbf16>, vector<32x128xbf16>, vector<8x128xf32> -> vector<8x128xf32>
    %698 = arith.addf %695, %697 : vector<8x128xf32>
    %699 = arith.negf %698 : vector<8x128xf32>
    %700 = math.exp %699 : vector<8x128xf32>
    %cst_153 = arith.constant 1.000000e+00 : f32
    %701 = vector.broadcast %cst_153 : f32 to vector<8x128xf32>
    %702 = arith.addf %701, %700 : vector<8x128xf32>
    %703 = arith.divf %701, %702 : vector<8x128xf32>
    %704 = math.tanh %698 : vector<8x128xf32>
    %705 = vector.extract_strided_slice %703 {offsets = [0, 0], sizes = [8, 32], strides = [1, 1]} : vector<8x128xf32> to vector<8x32xf32>
    %706 = vector.extract_strided_slice %703 {offsets = [0, 32], sizes = [8, 32], strides = [1, 1]} : vector<8x128xf32> to vector<8x32xf32>
    %707 = vector.extract_strided_slice %704 {offsets = [0, 64], sizes = [8, 32], strides = [1, 1]} : vector<8x128xf32> to vector<8x32xf32>
    %708 = vector.extract_strided_slice %703 {offsets = [0, 96], sizes = [8, 32], strides = [1, 1]} : vector<8x128xf32> to vector<8x32xf32>
    %709 = arith.mulf %706, %691 : vector<8x32xf32>
    %710 = arith.mulf %705, %707 : vector<8x32xf32>
    %711 = arith.addf %709, %710 : vector<8x32xf32>
    %712 = math.tanh %711 : vector<8x32xf32>
    %713 = arith.mulf %708, %712 : vector<8x32xf32>
    %c35 = arith.constant 35 : index
    %c0_154 = arith.constant 0 : index
    %c0_155 = arith.constant 0 : index
    %714 = vector.load %arg9[%c35, %c0_154, %c0_155] : memref<39x8x128xf32, #tpu.memory_space<vmem>>, vector<1x8x128xf32>
    %715 = vector.shape_cast %714 : vector<1x8x128xf32> to vector<8x128xf32>
    %716 = arith.truncf %713 : vector<8x32xf32> to vector<8x32xbf16>
    %cst_156 = arith.constant dense<0.000000e+00> : vector<8x128xf32>
    %717 = tpu.matmul %716, %11, %cst_156 {dimension_numbers = #tpu.dot_dimension_numbers<[1], [0], [0], [1], [0, 0, 1, 1], [], []>} : vector<8x32xbf16>, vector<32x128xbf16>, vector<8x128xf32> -> vector<8x128xf32>
    %718 = arith.addf %715, %717 : vector<8x128xf32>
    %719 = arith.negf %718 : vector<8x128xf32>
    %720 = math.exp %719 : vector<8x128xf32>
    %cst_157 = arith.constant 1.000000e+00 : f32
    %721 = vector.broadcast %cst_157 : f32 to vector<8x128xf32>
    %722 = arith.addf %721, %720 : vector<8x128xf32>
    %723 = arith.divf %721, %722 : vector<8x128xf32>
    %724 = math.tanh %718 : vector<8x128xf32>
    %725 = vector.extract_strided_slice %723 {offsets = [0, 0], sizes = [8, 32], strides = [1, 1]} : vector<8x128xf32> to vector<8x32xf32>
    %726 = vector.extract_strided_slice %723 {offsets = [0, 32], sizes = [8, 32], strides = [1, 1]} : vector<8x128xf32> to vector<8x32xf32>
    %727 = vector.extract_strided_slice %724 {offsets = [0, 64], sizes = [8, 32], strides = [1, 1]} : vector<8x128xf32> to vector<8x32xf32>
    %728 = vector.extract_strided_slice %723 {offsets = [0, 96], sizes = [8, 32], strides = [1, 1]} : vector<8x128xf32> to vector<8x32xf32>
    %729 = arith.mulf %726, %711 : vector<8x32xf32>
    %730 = arith.mulf %725, %727 : vector<8x32xf32>
    %731 = arith.addf %729, %730 : vector<8x32xf32>
    %732 = math.tanh %731 : vector<8x32xf32>
    %733 = arith.mulf %728, %732 : vector<8x32xf32>
    %c36 = arith.constant 36 : index
    %c0_158 = arith.constant 0 : index
    %c0_159 = arith.constant 0 : index
    %734 = vector.load %arg9[%c36, %c0_158, %c0_159] : memref<39x8x128xf32, #tpu.memory_space<vmem>>, vector<1x8x128xf32>
    %735 = vector.shape_cast %734 : vector<1x8x128xf32> to vector<8x128xf32>
    %736 = arith.truncf %733 : vector<8x32xf32> to vector<8x32xbf16>
    %cst_160 = arith.constant dense<0.000000e+00> : vector<8x128xf32>
    %737 = tpu.matmul %736, %11, %cst_160 {dimension_numbers = #tpu.dot_dimension_numbers<[1], [0], [0], [1], [0, 0, 1, 1], [], []>} : vector<8x32xbf16>, vector<32x128xbf16>, vector<8x128xf32> -> vector<8x128xf32>
    %738 = arith.addf %735, %737 : vector<8x128xf32>
    %739 = arith.negf %738 : vector<8x128xf32>
    %740 = math.exp %739 : vector<8x128xf32>
    %cst_161 = arith.constant 1.000000e+00 : f32
    %741 = vector.broadcast %cst_161 : f32 to vector<8x128xf32>
    %742 = arith.addf %741, %740 : vector<8x128xf32>
    %743 = arith.divf %741, %742 : vector<8x128xf32>
    %744 = math.tanh %738 : vector<8x128xf32>
    %745 = vector.extract_strided_slice %743 {offsets = [0, 0], sizes = [8, 32], strides = [1, 1]} : vector<8x128xf32> to vector<8x32xf32>
    %746 = vector.extract_strided_slice %743 {offsets = [0, 32], sizes = [8, 32], strides = [1, 1]} : vector<8x128xf32> to vector<8x32xf32>
    %747 = vector.extract_strided_slice %744 {offsets = [0, 64], sizes = [8, 32], strides = [1, 1]} : vector<8x128xf32> to vector<8x32xf32>
    %748 = vector.extract_strided_slice %743 {offsets = [0, 96], sizes = [8, 32], strides = [1, 1]} : vector<8x128xf32> to vector<8x32xf32>
    %749 = arith.mulf %746, %731 : vector<8x32xf32>
    %750 = arith.mulf %745, %747 : vector<8x32xf32>
    %751 = arith.addf %749, %750 : vector<8x32xf32>
    %752 = math.tanh %751 : vector<8x32xf32>
    %753 = arith.mulf %748, %752 : vector<8x32xf32>
    %c37 = arith.constant 37 : index
    %c0_162 = arith.constant 0 : index
    %c0_163 = arith.constant 0 : index
    %754 = vector.load %arg9[%c37, %c0_162, %c0_163] : memref<39x8x128xf32, #tpu.memory_space<vmem>>, vector<1x8x128xf32>
    %755 = vector.shape_cast %754 : vector<1x8x128xf32> to vector<8x128xf32>
    %756 = arith.truncf %753 : vector<8x32xf32> to vector<8x32xbf16>
    %cst_164 = arith.constant dense<0.000000e+00> : vector<8x128xf32>
    %757 = tpu.matmul %756, %11, %cst_164 {dimension_numbers = #tpu.dot_dimension_numbers<[1], [0], [0], [1], [0, 0, 1, 1], [], []>} : vector<8x32xbf16>, vector<32x128xbf16>, vector<8x128xf32> -> vector<8x128xf32>
    %758 = arith.addf %755, %757 : vector<8x128xf32>
    %759 = arith.negf %758 : vector<8x128xf32>
    %760 = math.exp %759 : vector<8x128xf32>
    %cst_165 = arith.constant 1.000000e+00 : f32
    %761 = vector.broadcast %cst_165 : f32 to vector<8x128xf32>
    %762 = arith.addf %761, %760 : vector<8x128xf32>
    %763 = arith.divf %761, %762 : vector<8x128xf32>
    %764 = math.tanh %758 : vector<8x128xf32>
    %765 = vector.extract_strided_slice %763 {offsets = [0, 0], sizes = [8, 32], strides = [1, 1]} : vector<8x128xf32> to vector<8x32xf32>
    %766 = vector.extract_strided_slice %763 {offsets = [0, 32], sizes = [8, 32], strides = [1, 1]} : vector<8x128xf32> to vector<8x32xf32>
    %767 = vector.extract_strided_slice %764 {offsets = [0, 64], sizes = [8, 32], strides = [1, 1]} : vector<8x128xf32> to vector<8x32xf32>
    %768 = vector.extract_strided_slice %763 {offsets = [0, 96], sizes = [8, 32], strides = [1, 1]} : vector<8x128xf32> to vector<8x32xf32>
    %769 = arith.mulf %766, %751 : vector<8x32xf32>
    %770 = arith.mulf %765, %767 : vector<8x32xf32>
    %771 = arith.addf %769, %770 : vector<8x32xf32>
    %772 = math.tanh %771 : vector<8x32xf32>
    %773 = arith.mulf %768, %772 : vector<8x32xf32>
    %c38 = arith.constant 38 : index
    %c0_166 = arith.constant 0 : index
    %c0_167 = arith.constant 0 : index
    %774 = vector.load %arg9[%c38, %c0_166, %c0_167] : memref<39x8x128xf32, #tpu.memory_space<vmem>>, vector<1x8x128xf32>
    %775 = vector.shape_cast %774 : vector<1x8x128xf32> to vector<8x128xf32>
    %776 = arith.truncf %773 : vector<8x32xf32> to vector<8x32xbf16>
    %cst_168 = arith.constant dense<0.000000e+00> : vector<8x128xf32>
    %777 = tpu.matmul %776, %11, %cst_168 {dimension_numbers = #tpu.dot_dimension_numbers<[1], [0], [0], [1], [0, 0, 1, 1], [], []>} : vector<8x32xbf16>, vector<32x128xbf16>, vector<8x128xf32> -> vector<8x128xf32>
    %778 = arith.addf %775, %777 : vector<8x128xf32>
    %779 = arith.negf %778 : vector<8x128xf32>
    %780 = math.exp %779 : vector<8x128xf32>
    %cst_169 = arith.constant 1.000000e+00 : f32
    %781 = vector.broadcast %cst_169 : f32 to vector<8x128xf32>
    %782 = arith.addf %781, %780 : vector<8x128xf32>
    %783 = arith.divf %781, %782 : vector<8x128xf32>
    %784 = math.tanh %778 : vector<8x128xf32>
    %785 = vector.extract_strided_slice %783 {offsets = [0, 0], sizes = [8, 32], strides = [1, 1]} : vector<8x128xf32> to vector<8x32xf32>
    %786 = vector.extract_strided_slice %783 {offsets = [0, 32], sizes = [8, 32], strides = [1, 1]} : vector<8x128xf32> to vector<8x32xf32>
    %787 = vector.extract_strided_slice %784 {offsets = [0, 64], sizes = [8, 32], strides = [1, 1]} : vector<8x128xf32> to vector<8x32xf32>
    %788 = vector.extract_strided_slice %783 {offsets = [0, 96], sizes = [8, 32], strides = [1, 1]} : vector<8x128xf32> to vector<8x32xf32>
    %789 = arith.mulf %786, %771 : vector<8x32xf32>
    %790 = arith.mulf %785, %787 : vector<8x32xf32>
    %791 = arith.addf %789, %790 : vector<8x32xf32>
    %792 = math.tanh %791 : vector<8x32xf32>
    %793 = arith.mulf %788, %792 : vector<8x32xf32>
    %c0_170 = arith.constant 0 : index
    %c0_171 = arith.constant 0 : index
    %794 = vector.load %arg4[%c0_170, %c0_171] : memref<1x32xf32, #tpu.memory_space<vmem>>, vector<1x32xf32>
    %795 = vector.broadcast %794 : vector<1x32xf32> to vector<8x32xf32>
    %796 = arith.mulf %793, %795 : vector<8x32xf32>
    %cst_172 = arith.constant dense<0.000000e+00> : vector<8xf32>
    %797 = vector.multi_reduction <add>, %796, %cst_172 [1] : vector<8x32xf32> to vector<8xf32>
    %798 = vector.shape_cast %797 : vector<8xf32> to vector<8x1xf32>
    %c0_173 = arith.constant 0 : index
    %c0_174 = arith.constant 0 : index
    %799 = vector.load %arg5[%c0_173, %c0_174] : memref<1x1xf32, #tpu.memory_space<vmem>>, vector<1x1xf32>
    %800 = vector.broadcast %799 : vector<1x1xf32> to vector<8x1xf32>
    %801 = arith.addf %798, %800 : vector<8x1xf32>
    %802 = vector.extract_strided_slice %801 {offsets = [0, 0], sizes = [2, 1], strides = [1, 1]} : vector<8x1xf32> to vector<2x1xf32>
    %c0_175 = arith.constant 0 : index
    %c0_176 = arith.constant 0 : index
    %803 = vector.load %arg6[%c0_175, %c0_176] : memref<2x1xf32, #tpu.memory_space<vmem>>, vector<2x1xf32>
    %cst_177 = arith.constant 0.000000e+00 : f32
    %804 = vector.broadcast %cst_177 : f32 to vector<2x1xf32>
    %805 = arith.maximumf %802, %804 : vector<2x1xf32>
    %806 = arith.mulf %802, %803 : vector<2x1xf32>
    %807 = arith.subf %805, %806 : vector<2x1xf32>
    %808 = math.absf %802 : vector<2x1xf32>
    %cst_178 = arith.constant 0.000000e+00 : f32
    %809 = vector.broadcast %cst_178 : f32 to vector<2x1xf32>
    %810 = arith.subf %809, %808 : vector<2x1xf32>
    %811 = math.exp %810 : vector<2x1xf32>
    %812 = math.log1p %811 : vector<2x1xf32>
    %813 = arith.addf %807, %812 : vector<2x1xf32>
    %814 = vector.shape_cast %813 : vector<2x1xf32> to vector<1x2x1xf32>
    %cst_179 = arith.constant dense<0.000000e+00> : vector<1xf32>
    %815 = vector.multi_reduction <add>, %814, %cst_179 [1, 2] : vector<1x2x1xf32> to vector<1xf32>
    %816 = vector.shape_cast %815 : vector<1xf32> to vector<1x1x1xf32>
    %817 = vector.extract %816[0, 0, 0] : f32 from vector<1x1x1xf32>
    %818 = vector.broadcast %817 : f32 to vector<1x1xf32>
    %cst_180 = arith.constant 2.000000e+00 : f32
    %819 = vector.broadcast %cst_180 : f32 to vector<1x1xf32>
    %820 = arith.divf %818, %819 : vector<1x1xf32>
    %c0_181 = arith.constant 0 : index
    %c0_182 = arith.constant 0 : index
    %821 = vector.load %arg7[%c0_181, %c0_182] : memref<1x1xf32, #tpu.memory_space<vmem>>, vector<1x1xf32>
    tpu.vector_store %arg7[%c0_181, %c0_182], %820 {strides = array<i32>} : memref<1x1xf32, #tpu.memory_space<vmem>>, vector<1x1xf32>,
    %822 = arith.negf %802 : vector<2x1xf32>
    %823 = math.exp %822 : vector<2x1xf32>
    %cst_183 = arith.constant 1.000000e+00 : f32
    %824 = vector.broadcast %cst_183 : f32 to vector<2x1xf32>
    %825 = arith.addf %824, %823 : vector<2x1xf32>
    %826 = arith.divf %824, %825 : vector<2x1xf32>
    %c0_184 = arith.constant 0 : index
    %c0_185 = arith.constant 0 : index
    %827 = vector.load %arg8[%c0_184, %c0_185] : memref<2x1xf32, #tpu.memory_space<vmem>>, vector<2x1xf32>
    tpu.vector_store %arg8[%c0_184, %c0_185], %826 {strides = array<i32>} : memref<2x1xf32, #tpu.memory_space<vmem>>, vector<2x1xf32>,
    return
  }
}

</mosaic_0001>

<bundles_post_ra>
// kernel: _lambda_.1
= control target key start
LH: loop header
LB: loop body
LE: loop exit
PB: predicated region body
PF: predicated region fallthrough
CT: control target
= control target key end

     0   :  { %s8859_s0 = inlined_call_operand.vmem [shape: bf16[320,840], index: 0, kind: input, shape index: {}]   ;;  %s8860_s1 = inlined_call_operand.vmem [shape: bf16[840,256], index: 1, kind: input, shape index: {}]   ;;  %s8861_s2 = inlined_call_operand.vmem [shape: f32[1,1,128], index: 2, kind: input, shape index: {}]   ;;  %s8862_s3 = inlined_call_operand.vmem [shape: bf16[32,128], index: 3, kind: input, shape index: {}]   ;;  %s8863_s4 = inlined_call_operand.vmem [shape: f32[1,32], index: 4, kind: input, shape index: {}]   ;;  %s8864_s5 = inlined_call_operand.<no memory space> [shape: f32[1,1], index: 5, kind: input, shape index: {}]   ;;  %s8865_s6 = inlined_call_operand.vmem [shape: f32[2,1], index: 6, kind: input, shape index: {}]   ;;  %s8866_s7 = inlined_call_operand.hbm [shape: f32[1,1], index: 7, kind: output, shape index: {0}]   ;;  %s8867_s8 = inlined_call_operand.vmem [shape: f32[2,1], index: 8, kind: output, shape index: {1}]  }
   0x1   :  { %v14_v0 = vstv %s8864_s5 }
   0x2   :  { %15 = vst [vmem:[#allocation3] sm:$0x1] %v14_v0 }
   0x3   :  { %v6408_v1 = vld [vmem:[%s8860_s1 + $0x74] ss:$8 sps:$4 sm:$0xff]   ;;  %v6412_v3 = vld [vmem:[%s8860_s1 + $0x70] ss:$8 sps:$4 sm:$0xff]   ;;  %v6414_v5 = vld [vmem:[%s8860_s1 + $0x64] ss:$8 sps:$4 sm:$0xff]  }
   0x4   :  { %v6410_v2 = vld [vmem:[%s8860_s1 + $0x174] ss:$8 sps:$4 sm:$0xff]   ;;  %1590 = vmatprep.subr.bf16.mxu0 %v6408_v1  ;;  %v6413_v4 = vld [vmem:[%s8860_s1 + $0x170] ss:$8 sps:$4 sm:$0xff]   ;;  %v6416_v6 = vld [vmem:[%s8860_s1 + $0x164] ss:$8 sps:$4 sm:$0xff]  }
   0x5   :  { %1821 = vmatprep.subr.bf16.mxu1 %v6410_v2  ;;  %1591 = vmatpush1.bf16.msra.mxu0 %v6412_v3  ;;  %v6418_v7 = vld [vmem:[%s8860_s1 + $0x60] ss:$8 sps:$4 sm:$0xff]   ;;  %v6420_v9 = vld [vmem:[%s8860_s1 + $0x54] ss:$8 sps:$4 sm:$0xff]   ;;  %v6424_v11 = vld [vmem:[%s8860_s1 + $0x50] ss:$8 sps:$4 sm:$0xff]  }
   0x6   :  { %1822 = vmatpush1.bf16.msra.mxu1 %v6413_v4  ;;  %1592 = vmatprep.subr.bf16.mxu0 %v6414_v5  ;;  %v6419_v8 = vld [vmem:[%s8860_s1 + $0x160] ss:$8 sps:$4 sm:$0xff]   ;;  %v6422_v10 = vld [vmem:[%s8860_s1 + $0x154] ss:$8 sps:$4 sm:$0xff]   ;;  %v6425_v12 = vld [vmem:[%s8860_s1 + $0x150] ss:$8 sps:$4 sm:$0xff]  }
   0x7   :  { %1823 = vmatprep.subr.bf16.mxu1 %v6416_v6  ;;  %v6426_v13 = vld [vmem:[%s8860_s1 + $0x44] ss:$8 sps:$4 sm:$0xff]   ;;  %v6430_v15 = vld [vmem:[%s8860_s1 + $0x40] ss:$8 sps:$4 sm:$0xff]   ;;  %v6432_v17 = vld [vmem:[%s8860_s1 + $0x34] ss:$8 sps:$4 sm:$0xff]  }
   0x8   :  { %v6428_v14 = vld [vmem:[%s8860_s1 + $0x144] ss:$8 sps:$4 sm:$0xff]   ;;  %v6431_v16 = vld [vmem:[%s8860_s1 + $0x140] ss:$8 sps:$4 sm:$0xff]   ;;  %v6434_v18 = vld [vmem:[%s8860_s1 + $0x134] ss:$8 sps:$4 sm:$0xff]  }
   0x9   :  { %1593 = vmatpush1.bf16.msra.mxu0 %v6418_v7  ;;  %v6436_v19 = vld [vmem:[%s8860_s1 + $0x30] ss:$8 sps:$4 sm:$0xff]   ;;  %v6438_v21 = vld [vmem:[%s8860_s1 + $0x24] ss:$8 sps:$4 sm:$0xff]   ;;  %v6442_v23 = vld [vmem:[%s8860_s1 + $0x20] ss:$8 sps:$4 sm:$0xff]  }
   0xa   :  { %1824 = vmatpush1.bf16.msra.mxu1 %v6419_v8  ;;  %1594 = vmatprep.subr.bf16.mxu0 %v6420_v9  ;;  %v6437_v20 = vld [vmem:[%s8860_s1 + $0x130] ss:$8 sps:$4 sm:$0xff]   ;;  %v6440_v22 = vld [vmem:[%s8860_s1 + $0x124] ss:$8 sps:$4 sm:$0xff]   ;;  %v6443_v24 = vld [vmem:[%s8860_s1 + $0x120] ss:$8 sps:$4 sm:$0xff]  }
   0xb   :  { %1825 = vmatprep.subr.bf16.mxu1 %v6422_v10  ;;  %v6444_v25 = vld [vmem:[%s8860_s1 + $0x14] ss:$8 sps:$4 sm:$0xff]   ;;  %v6448_v27 = vld [vmem:[%s8860_s1 + $0x10] ss:$8 sps:$4 sm:$0xff]   ;;  %v6450_v29 = vld [vmem:[%s8860_s1 + $0x4] ss:$8 sps:$4 sm:$0xff]  }
   0xc   :  { %v6446_v26 = vld [vmem:[%s8860_s1 + $0x114] ss:$8 sps:$4 sm:$0xff]   ;;  %v6449_v28 = vld [vmem:[%s8860_s1 + $0x110] ss:$8 sps:$4 sm:$0xff]   ;;  %v6452_v30 = vld [vmem:[%s8860_s1 + $0x104] ss:$8 sps:$4 sm:$0xff]  }
   0xd   :  { %1595 = vmatpush1.bf16.msra.mxu0 %v6424_v11  ;;  %v6454_v31 = vld [vmem:[%s8860_s1] ss:$8 sps:$4 sm:$0xff]   ;;  %v6456_v33 = vld [vmem:[%s8860_s1 + $0xf4] ss:$8 sps:$4 sm:$0xff]   ;;  %v6460_v35 = vld [vmem:[%s8860_s1 + $0xf0] ss:$8 sps:$4 sm:$0xff]  }
   0xe   :  { %1826 = vmatpush1.bf16.msra.mxu1 %v6425_v12  ;;  %1596 = vmatprep.subr.bf16.mxu0 %v6426_v13  ;;  %v6455_v32 = vld [vmem:[%s8860_s1 + $0x100] ss:$8 sps:$4 sm:$0xff]   ;;  %v6458_v34 = vld [vmem:[%s8860_s1 + $0x1f4] ss:$8 sps:$4 sm:$0xff]   ;;  %v6461_v36 = vld [vmem:[%s8860_s1 + $0x1f0] ss:$8 sps:$4 sm:$0xff]  }
   0xf   :  { %1827 = vmatprep.subr.bf16.mxu1 %v6428_v14  ;;  %v6462_v37 = vld [vmem:[%s8860_s1 + $0xe4] ss:$8 sps:$4 sm:$0xff]   ;;  %v6466_v39 = vld [vmem:[%s8860_s1 + $0xe0] ss:$8 sps:$4 sm:$0xff]   ;;  %v6468_v41 = vld [vmem:[%s8860_s1 + $0xd4] ss:$8 sps:$4 sm:$0xff]  }
  0x10   :  { %v6464_v38 = vld [vmem:[%s8860_s1 + $0x1e4] ss:$8 sps:$4 sm:$0xff]   ;;  %v6467_v40 = vld [vmem:[%s8860_s1 + $0x1e0] ss:$8 sps:$4 sm:$0xff]   ;;  %v6470_v42 = vld [vmem:[%s8860_s1 + $0x1d4] ss:$8 sps:$4 sm:$0xff]  }
  0x11   :  { %1597 = vmatpush1.bf16.msra.mxu0 %v6430_v15  ;;  %v6472_v43 = vld [vmem:[%s8860_s1 + $0xd0] ss:$8 sps:$4 sm:$0xff]   ;;  %v6474_v45 = vld [vmem:[%s8860_s1 + $0xc4] ss:$8 sps:$4 sm:$0xff]   ;;  %v6478_v47 = vld [vmem:[%s8860_s1 + $0xc0] ss:$8 sps:$4 sm:$0xff]  }
  0x12   :  { %1828 = vmatpush1.bf16.msra.mxu1 %v6431_v16  ;;  %1598 = vmatprep.subr.bf16.mxu0 %v6432_v17  ;;  %v6473_v44 = vld [vmem:[%s8860_s1 + $0x1d0] ss:$8 sps:$4 sm:$0xff]   ;;  %v6476_v46 = vld [vmem:[%s8860_s1 + $0x1c4] ss:$8 sps:$4 sm:$0xff]   ;;  %v6479_v48 = vld [vmem:[%s8860_s1 + $0x1c0] ss:$8 sps:$4 sm:$0xff]  }
  0x13   :  { %1829 = vmatprep.subr.bf16.mxu1 %v6434_v18  ;;  %v6480_v49 = vld [vmem:[%s8860_s1 + $0xb4] ss:$8 sps:$4 sm:$0xff]   ;;  %v6506_v50 = vld [vmem:[%s8859_s0 + $0x4] ss:$28 sps:$4 sm:$0xff]   ;;  %v6509_v52 = vld [vmem:[%s8859_s0 + $0xc] ss:$28 sps:$4 sm:$0xff]  }
  0x14   :  { %v6482_v51 = vld [vmem:[%s8860_s1 + $0x1b4] ss:$8 sps:$4 sm:$0xff]   ;;  %1622 = vmatprep.mubr.bf16.mxu0 %v6506_v50  ;;  %v6484_v53 = vld [vmem:[%s8860_s1 + $0xb0] ss:$8 sps:$4 sm:$0xff]   ;;  %1853 = vmatprep.mubr.bf16.mxu1 %v6509_v52  ;;  %v6486_v55 = vld [vmem:[%s8860_s1 + $0xa4] ss:$8 sps:$4 sm:$0xff]  }
  0x15   :  { %1599 = vmatpush1.bf16.msra.mxu0 %v6436_v19  ;;  %v6485_v54 = vld [vmem:[%s8860_s1 + $0x1b0] ss:$8 sps:$4 sm:$0xff]   ;;  %v6488_v56 = vld [vmem:[%s8860_s1 + $0x1a4] ss:$8 sps:$4 sm:$0xff]   ;;  %v6490_v57 = vld [vmem:[%s8860_s1 + $0xa0] ss:$8 sps:$4 sm:$0xff]  }
  0x16   :  { %1830 = vmatpush1.bf16.msra.mxu1 %v6437_v20  ;;  %1600 = vmatprep.subr.bf16.mxu0 %v6438_v21  ;;  %v6491_v58 = vld [vmem:[%s8860_s1 + $0x1a0] ss:$8 sps:$4 sm:$0xff]   ;;  %v6492_v59 = vld [vmem:[%s8860_s1 + $0x94] ss:$8 sps:$4 sm:$0xff]   ;;  %v6496_v61 = vld [vmem:[%s8860_s1 + $0x90] ss:$8 sps:$4 sm:$0xff]  }
  0x17   :  { %1831 = vmatprep.subr.bf16.mxu1 %v6440_v22  ;;  %v6494_v60 = vld [vmem:[%s8860_s1 + $0x194] ss:$8 sps:$4 sm:$0xff]   ;;  %v6497_v62 = vld [vmem:[%s8860_s1 + $0x190] ss:$8 sps:$4 sm:$0xff]   ;;  %v6498_v63 = vld [vmem:[%s8860_s1 + $0x84] ss:$8 sps:$4 sm:$0xff]  }
  0x18   :  { %v6500_v0 = vld [vmem:[%s8860_s1 + $0x184] ss:$8 sps:$4 sm:$0xff]   ;;  %v6502_v1 = vld [vmem:[%s8860_s1 + $0x80] ss:$8 sps:$4 sm:$0xff]   ;;  %v6512_v3 = vld [vmem:[%s8860_s1 + $0x274] ss:$8 sps:$4 sm:$0xff]  }
  0x19   :  { %1601 = vmatpush1.bf16.msra.mxu0 %v6442_v23  ;;  %v6503_v2 = vld [vmem:[%s8860_s1 + $0x180] ss:$8 sps:$4 sm:$0xff]   ;;  %v6510_v6 = vld [vmem:[%s8860_s1 + $0x270] ss:$8 sps:$4 sm:$0xff]   ;;  %v6521_v9 = vld [vmem:[%s8860_s1 + $0x264] ss:$8 sps:$4 sm:$0xff]  }
  0x1a   :  { %1832 = vmatpush1.bf16.msra.mxu1 %v6443_v24  ;;  %1602 = vmatprep.subr.bf16.mxu0 %v6444_v25  ;;  %v6504_v4 = vld [vmem:[%s8859_s0] ss:$28 sps:$4 sm:$0xff]   ;;  %v6507_v5 = vld [vmem:[%s8859_s0 + $0x8] ss:$28 sps:$4 sm:$0xff]   ;;  %v6517_v12 = vld [vmem:[%s8859_s0 + $0x38] ss:$28 sps:$4 sm:$0xff]  }
  0x1b   :  { %1833 = vmatprep.subr.bf16.mxu1 %v6446_v26  ;;  %v6513_v7 = vld [vmem:[%s8859_s0 + $0x3c] ss:$28 sps:$4 sm:$0xff]   ;;  %v6515_v8 = vld [vmem:[%s8859_s0 + $0x44] ss:$28 sps:$4 sm:$0xff]   ;;  %v6522_v14 = vld [vmem:[%s8859_s0 + $0x74] ss:$28 sps:$4 sm:$0xff]  }
  0x1c   :  { %v6519_v10 = vld [vmem:[%s8860_s1 + $0x260] ss:$8 sps:$4 sm:$0xff]   ;;  %v6530_v11 = vld [vmem:[%s8860_s1 + $0x254] ss:$8 sps:$4 sm:$0xff]   ;;  %v6528_v16 = vld [vmem:[%s8860_s1 + $0x250] ss:$8 sps:$4 sm:$0xff]  }
  0x1d   :  { %1603 = vmatpush1.bf16.msra.mxu0 %v6448_v27  ;;  %v6518_v13 = vld [vmem:[%s8859_s0 + $0x40] ss:$28 sps:$4 sm:$0xff]   ;;  %v6539_v17 = vld [vmem:[%s8860_s1 + $0x244] ss:$8 sps:$4 sm:$0xff]   ;;  %v6527_v21 = vld [vmem:[%s8859_s0 + $0x78] ss:$28 sps:$4 sm:$0xff]  }
  0x1e   :  { %1834 = vmatpush1.bf16.msra.mxu1 %v6449_v28  ;;  %1604 = vmatprep.subr.bf16.mxu0 %v6450_v29  ;;  %v6524_v15 = vld [vmem:[%s8859_s0 + $0x7c] ss:$28 sps:$4 sm:$0xff]   ;;  %v6537_v18 = vld [vmem:[%s8860_s1 + $0x240] ss:$8 sps:$4 sm:$0xff]   ;;  %v6526_v20 = vld [vmem:[%s8859_s0 + $0x70] ss:$28 sps:$4 sm:$0xff]  }
  0x1f   :  { %1835 = vmatprep.subr.bf16.mxu1 %v6452_v30  ;;  %v6554_v19 = vld [vmem:[%s8860_s1 + $0x234] ss:$8 sps:$4 sm:$0xff]   ;;  %v6531_v22 = vld [vmem:[%s8859_s0 + $0xac] ss:$28 sps:$4 sm:$0xff]   ;;  %v6552_v24 = vld [vmem:[%s8860_s1 + $0x230] ss:$8 sps:$4 sm:$0xff]  }
  0x20   :  { %v6533_v23 = vld [vmem:[%s8859_s0 + $0xb4] ss:$28 sps:$4 sm:$0xff]   ;;  %v6563_v25 = vld [vmem:[%s8860_s1 + $0x224] ss:$8 sps:$4 sm:$0xff]   ;;  %v6561_v26 = vld [vmem:[%s8860_s1 + $0x220] ss:$8 sps:$4 sm:$0xff]  }
  0x21   :  { %1605 = vmatpush1.bf16.msra.mxu0 %v6454_v31  ;;  %v6535_v27 = vld [vmem:[%s8859_s0 + $0xa8] ss:$28 sps:$4 sm:$0xff]   ;;  %v6572_v28 = vld [vmem:[%s8860_s1 + $0x214] ss:$8 sps:$4 sm:$0xff]   ;;  %v6536_v29 = vld [vmem:[%s8859_s0 + $0xb0] ss:$28 sps:$4 sm:$0xff]  }
  0x22   :  { %1836 = vmatpush1.bf16.msra.mxu1 %v6455_v32  ;;  %1606 = vmatprep.subr.bf16.mxu0 %v6456_v33  ;;  %v6540_v30 = vld [vmem:[%s8859_s0 + $0xe4] ss:$28 sps:$4 sm:$0xff]   ;;  %v6542_v31 = vld [vmem:[%s8859_s0 + $0xec] ss:$28 sps:$4 sm:$0xff]   ;;  %v6570_v32 = vld [vmem:[%s8860_s1 + $0x210] ss:$8 sps:$4 sm:$0xff]  }
  0x23   :  { %1837 = vmatprep.subr.bf16.mxu1 %v6458_v34  ;;  %v6581_v33 = vld [vmem:[%s8860_s1 + $0x204] ss:$8 sps:$4 sm:$0xff]   ;;  %v6579_v34 = vld [vmem:[%s8860_s1 + $0x200] ss:$8 sps:$4 sm:$0xff]   ;;  %v6560_v52 = vld [vmem:[%s8859_s0 + $0x158] ss:$28 sps:$4 sm:$0xff]  }
  0x24   :  { %v6559_v50 = vld [vmem:[%s8859_s0 + $0x150] ss:$28 sps:$4 sm:$0xff]   ;;  %vm1583_vm0 = vcmask 1043456  }
  0x25   :  { %1607 = vmatpush2.bf16.msra.mxu0 %v6460_v35  ;;  %v6544_v35 = vld [vmem:[%s8859_s0 + $0xe0] ss:$28 sps:$4 sm:$0xff]  }
  0x26   :  { %1838 = vmatpush2.bf16.msra.mxu1 %v6461_v36  ;;  %1608 = vmatprep.subr.bf16.mxu0 %v6462_v37  ;;  %v6596_v36 = vld [vmem:[%s8860_s1 + $0x2f4] ss:$8 sps:$4 sm:$0xff]   ;;  %v6545_v37 = vld [vmem:[%s8859_s0 + $0xe8] ss:$28 sps:$4 sm:$0xff]  }
  0x27   :  { %1839 = vmatprep.subr.bf16.mxu1 %v6464_v38  ;;  %v6546_v38 = vld [vmem:[%s8859_s0 + $0x11c] ss:$28 sps:$4 sm:$0xff]  }
  0x29   :  { %1609 = vmatpush2.bf16.msra.mxu0 %v6466_v39  ;;  %v6548_v39 = vld [vmem:[%s8859_s0 + $0x124] ss:$28 sps:$4 sm:$0xff]  }
  0x2a   :  { %1840 = vmatpush2.bf16.msra.mxu1 %v6467_v40  ;;  %1610 = vmatprep.subr.bf16.mxu0 %v6468_v41  ;;  %v6594_v40 = vld [vmem:[%s8860_s1 + $0x2f0] ss:$8 sps:$4 sm:$0xff]   ;;  %v6605_v41 = vld [vmem:[%s8860_s1 + $0x2e4] ss:$8 sps:$4 sm:$0xff]  }
  0x2b   :  { %1841 = vmatprep.subr.bf16.mxu1 %v6470_v42  ;;  %v6603_v42 = vld [vmem:[%s8860_s1 + $0x2e0] ss:$8 sps:$4 sm:$0xff]  }
  0x2d   :  { %1611 = vmatpush2.bf16.msra.mxu0 %v6472_v43  ;;  %v6550_v43 = vld [vmem:[%s8859_s0 + $0x118] ss:$28 sps:$4 sm:$0xff]  }
  0x2e   :  { %1842 = vmatpush2.bf16.msra.mxu1 %v6473_v44  ;;  %1612 = vmatprep.subr.bf16.mxu0 %v6474_v45  ;;  %v6614_v44 = vld [vmem:[%s8860_s1 + $0x2d4] ss:$8 sps:$4 sm:$0xff]  }
  0x2f   :  { %1843 = vmatprep.subr.bf16.mxu1 %v6476_v46  ;;  %v6551_v45 = vld [vmem:[%s8859_s0 + $0x120] ss:$28 sps:$4 sm:$0xff]   ;;  %v6555_v46 = vld [vmem:[%s8859_s0 + $0x154] ss:$28 sps:$4 sm:$0xff]  }
  0x31   :  { %1613 = vmatpush2.bf16.msra.mxu0 %v6478_v47  ;;  %v6557_v47 = vld [vmem:[%s8859_s0 + $0x15c] ss:$28 sps:$4 sm:$0xff]  }
  0x32   :  { %1844 = vmatpush2.bf16.msra.mxu1 %v6479_v48  ;;  %1614 = vmatprep.subr.bf16.mxu0 %v6480_v49  ;;  %v6612_v48 = vld [vmem:[%s8860_s1 + $0x2d0] ss:$8 sps:$4 sm:$0xff]   ;;  %v6623_v49 = vld [vmem:[%s8860_s1 + $0x2c4] ss:$8 sps:$4 sm:$0xff]  }
  0x33   :  { %1845 = vmatprep.subr.bf16.mxu1 %v6482_v51  ;;  %v6621_v51 = vld [vmem:[%s8860_s1 + $0x2c0] ss:$8 sps:$4 sm:$0xff]  }
  0x35   :  { %1615 = vmatpush2.bf16.msra.mxu0 %v6484_v53  ;;  %v6638_v53 = vld [vmem:[%s8860_s1 + $0x2b4] ss:$8 sps:$4 sm:$0xff]  }
  0x36   :  { %1846 = vmatpush2.bf16.msra.mxu1 %v6485_v54  ;;  %1616 = vmatprep.subr.bf16.mxu0 %v6486_v55  ;;  %v296_v54 = vld [vmem:[%s8860_s1 + $0x340] sm:$0xff]  ;;  %v6564_v55 = vld [vmem:[%s8859_s0 + $0x18c] ss:$28 sps:$4 sm:$0xff]  }
  0x37   :  { %1847 = vmatprep.subr.bf16.mxu1 %v6488_v56  ;;  %v5865_v56 = vcombine.high %v296_v54, %v296_v54 }
  0x39   :  { %1617 = vmatpush2.bf16.msra.mxu0 %v6490_v57  ;;  %v5864_v57 = vcombine.low %v296_v54, %v296_v54 }
  0x3a   :  { %1848 = vmatpush2.bf16.msra.mxu1 %v6491_v58  ;;  %1618 = vmatprep.subr.bf16.mxu0 %v6492_v59  ;;  %v6566_v58 = vld [vmem:[%s8859_s0 + $0x194] ss:$28 sps:$4 sm:$0xff]  }
  0x3b   :  { %1849 = vmatprep.subr.bf16.mxu1 %v6494_v60  ;;  %v6636_v59 = vld [vmem:[%s8860_s1 + $0x2b0] ss:$8 sps:$4 sm:$0xff]   ;;  %v6647_v60 = vld [vmem:[%s8860_s1 + $0x2a4] ss:$8 sps:$4 sm:$0xff]  }
  0x3d   :  { %1619 = vmatpush2.bf16.msra.mxu0 %v6496_v61  ;;  %v1585_v61 = vsel %vm1583_vm0, %v5864_v57, 0 }
  0x3e   :  { %1850 = vmatpush2.bf16.msra.mxu1 %v6497_v62  ;;  %1620 = vmatprep.subr.bf16.mxu0 %v6498_v63  ;;  %v6665_v62 = vld [vmem:[%s8860_s1 + $0x330] ss:$8 sps:$4 sm:$0xff]   ;;  %v6667_v63 = vld [vmem:[%s8860_s1 + $0x334] ss:$8 sps:$4 sm:$0xff]  }
  0x3f   :  { %1851 = vmatprep.subr.bf16.mxu1 %v6500_v0  ;;  %v6645_v0 = vld [vmem:[%s8860_s1 + $0x2a0] ss:$8 sps:$4 sm:$0xff]  }
  0x41   :  { %1621 = vmatpush2.bf16.msra.mxu0 %v6502_v1  ;;  %v6568_v1 = vld [vmem:[%s8859_s0 + $0x188] ss:$28 sps:$4 sm:$0xff]  }
  0x42   :  { %1852 = vmatpush2.bf16.msra.mxu1 %v6503_v2  ;;  %2052 = vmatprep.subr.bf16.mxu0 %v6512_v3  ;;  %v6656_v2 = vld [vmem:[%s8860_s1 + $0x294] ss:$8 sps:$4 sm:$0xff]   ;;  %v6673_v3 = vld [vmem:[%s8860_s1 + $0x324] ss:$8 sps:$4 sm:$0xff]  }
  0x43   :  { %5866 = vmatprep.subr.msk.bf16.mxu1 %vm1583_vm0, %v5865_v56 }
  0x44   :  { %1623 = vmatmul.mubr.bf16.vlgmr.msra.gmra.mxu0 %v6504_v4  ;;  %v6671_v4 = vld [vmem:[%s8860_s1 + $0x320] ss:$8 sps:$4 sm:$0xff]  }
  0x45   :  { %1854 = vmatmul.mubr.bf16.vlgmr.msra.gmra.mxu1 %v6507_v5  ;;  %2053 = vmatpush1.bf16.msra.mxu0 %v6510_v6  ;;  %v6569_v5 = vld [vmem:[%s8859_s0 + $0x190] ss:$28 sps:$4 sm:$0xff]   ;;  %v6573_v6 = vld [vmem:[%s8859_s0 + $0x1c4] ss:$28 sps:$4 sm:$0xff]  }
  0x46   :  { %1631 = vmatprep.mubr.bf16.mxu0 %v6513_v7  ;;  %1862 = vmatprep.mubr.bf16.mxu1 %v6515_v8  ;;  %v6575_v7 = vld [vmem:[%s8859_s0 + $0x1cc] ss:$28 sps:$4 sm:$0xff]   ;;  %v6654_v8 = vld [vmem:[%s8860_s1 + $0x290] ss:$8 sps:$4 sm:$0xff]  }
  0x47   :  { %2054 = vmatprep.subr.bf16.mxu0 %v6521_v9  ;;  %2290 = vmatpush1.bf16.msra.mxu1 %v1585_v61  ;;  %v6682_v9 = vld [vmem:[%s8860_s1 + $0x314] ss:$8 sps:$4 sm:$0xff]  }
  0x48   :  { %2291 = vmatprep.subr.bf16.mxu1 %v6667_v63 }
  0x49   :  { %2055 = vmatpush1.bf16.msra.mxu0 %v6519_v10  ;;  %v6670_v10 = vld [vmem:[%s8860_s1 + $0x284] ss:$8 sps:$4 sm:$0xff]  }
  0x4a   :  { %2056 = vmatprep.subr.bf16.mxu0 %v6530_v11  ;;  %v6680_v11 = vld [vmem:[%s8860_s1 + $0x310] ss:$8 sps:$4 sm:$0xff]  }
  0x4b   :  { %2292 = vmatpush1.bf16.msra.mxu1 %v6665_v62 }
  0x4c   :  { %1632 = vmatmul.mubr.bf16.gmra.mxu0 %v6517_v12  ;;  %2293 = vmatprep.subr.bf16.mxu1 %v6673_v3  ;;  %v6685_v12 = vld [vmem:[%s8860_s1 + $0x304] ss:$8 sps:$4 sm:$0xff]  }
  0x4d   :  { %1863 = vmatmul.mubr.bf16.gmra.mxu1 %v6518_v13  ;;  %1641 = vmatprep.mubr.bf16.mxu0 %v6522_v14  ;;  %v6577_v13 = vld [vmem:[%s8859_s0 + $0x1c0] ss:$28 sps:$4 sm:$0xff]   ;;  %v6578_v14 = vld [vmem:[%s8859_s0 + $0x1c8] ss:$28 sps:$4 sm:$0xff]  }
  0x4e   :  { %1872 = vmatprep.mubr.bf16.mxu1 %v6524_v15  ;;  %2057 = vmatpush1.bf16.msra.mxu0 %v6528_v16  ;;  %v6668_v15 = vld [vmem:[%s8860_s1 + $0x280] ss:$8 sps:$4 sm:$0xff]  }
  0x4f   :  { %2058 = vmatprep.subr.bf16.mxu0 %v6539_v17  ;;  %2294 = vmatpush1.bf16.msra.mxu1 %v6671_v4  ;;  %v6683_v16 = vld [vmem:[%s8860_s1 + $0x300] ss:$8 sps:$4 sm:$0xff]   ;;  %v6582_v17 = vld [vmem:[%s8859_s0 + $0x1fc] ss:$28 sps:$4 sm:$0xff]  }
  0x50   :  { %2295 = vmatprep.subr.bf16.mxu1 %v6682_v9 }
  0x52   :  { %2059 = vmatpush1.bf16.msra.mxu0 %v6537_v18  ;;  %v6584_v18 = vld [vmem:[%s8859_s0 + $0x204] ss:$28 sps:$4 sm:$0xff]  }
  0x53   :  { %2060 = vmatprep.subr.bf16.mxu0 %v6554_v19  ;;  %2296 = vmatpush1.bf16.msra.mxu1 %v6680_v11  ;;  %v8868_v19 = vmov 0.0  }
  0x54   :  { %1642 = vmatmul.mubr.bf16.gmra.mxu0 %v6526_v20  ;;  %2297 = vmatprep.subr.bf16.mxu1 %v6685_v12  ;;  %v6586_v20 = vld [vmem:[%s8859_s0 + $0x1f8] ss:$28 sps:$4 sm:$0xff]  }
  0x55   :  { %1873 = vmatmul.mubr.bf16.gmra.mxu1 %v6527_v21  ;;  %1651 = vmatprep.mubr.bf16.mxu0 %v6531_v22  ;;  %v6587_v21 = vld [vmem:[%s8859_s0 + $0x200] ss:$28 sps:$4 sm:$0xff]   ;;  %v6588_v22 = vld [vmem:[%s8859_s0 + $0x234] ss:$28 sps:$4 sm:$0xff]  }
  0x56   :  { %1882 = vmatprep.mubr.bf16.mxu1 %v6533_v23  ;;  %2061 = vmatpush1.bf16.msra.mxu0 %v6552_v24  ;;  %v6590_v23 = vld [vmem:[%s8859_s0 + $0x23c] ss:$28 sps:$4 sm:$0xff]   ;;  %v6592_v24 = vld [vmem:[%s8859_s0 + $0x230] ss:$28 sps:$4 sm:$0xff]  }
  0x57   :  { %2062 = vmatprep.subr.bf16.mxu0 %v6563_v25  ;;  %2298 = vmatpush1.bf16.msra.mxu1 %v6683_v16  ;;  %v6593_v25 = vld [vmem:[%s8859_s0 + $0x238] ss:$28 sps:$4 sm:$0xff]  }
  0x58   :  { %6095 = vmatprep.subr.bf16.mxu1 %v8868_v19 }
  0x5a   :  { %2063 = vmatpush1.bf16.msra.mxu0 %v6561_v26  ;;  %v6597_v26 = vld [vmem:[%s8859_s0 + $0x26c] ss:$28 sps:$4 sm:$0xff]  }
  0x5b   :  { %2064 = vmatprep.subr.bf16.mxu0 %v6572_v28  ;;  %v6601_v28 = vld [vmem:[%s8859_s0 + $0x268] ss:$28 sps:$4 sm:$0xff]  }
  0x5c   :  { %1652 = vmatmul.mubr.bf16.gmra.mxu0 %v6535_v27  ;;  %v6599_v27 = vld [vmem:[%s8859_s0 + $0x274] ss:$28 sps:$4 sm:$0xff]  }
  0x5d   :  { %1883 = vmatmul.mubr.bf16.gmra.mxu1 %v6536_v29  ;;  %1661 = vmatprep.mubr.bf16.mxu0 %v6540_v30  ;;  %v6602_v29 = vld [vmem:[%s8859_s0 + $0x270] ss:$28 sps:$4 sm:$0xff]   ;;  %v6606_v30 = vld [vmem:[%s8859_s0 + $0x2a4] ss:$28 sps:$4 sm:$0xff]  }
  0x5e   :  { %1892 = vmatprep.mubr.bf16.mxu1 %v6542_v31  ;;  %2065 = vmatpush1.bf16.msra.mxu0 %v6570_v32  ;;  %v6608_v31 = vld [vmem:[%s8859_s0 + $0x2ac] ss:$28 sps:$4 sm:$0xff]   ;;  %v6610_v32 = vld [vmem:[%s8859_s0 + $0x2a0] ss:$28 sps:$4 sm:$0xff]  }
  0x5f   :  { %2066 = vmatprep.subr.bf16.mxu0 %v6581_v33  ;;  %v6611_v33 = vld [vmem:[%s8859_s0 + $0x2a8] ss:$28 sps:$4 sm:$0xff]  }
  0x62   :  { %2067 = vmatpush1.bf16.msra.mxu0 %v6579_v34 }
  0x63   :  { %2068 = vmatprep.subr.bf16.mxu0 %v6596_v36 }
  0x64   :  { %1662 = vmatmul.mubr.bf16.gmra.mxu0 %v6544_v35 }
  0x65   :  { %1893 = vmatmul.mubr.bf16.gmra.mxu1 %v6545_v37  ;;  %1671 = vmatprep.mubr.bf16.mxu0 %v6546_v38 }
  0x66   :  { %1902 = vmatprep.mubr.bf16.mxu1 %v6548_v39  ;;  %2069 = vmatpush2.bf16.msra.mxu0 %v6594_v40 }
  0x67   :  { %2070 = vmatprep.subr.bf16.mxu0 %v6605_v41 }
  0x6a   :  { %2071 = vmatpush2.bf16.msra.mxu0 %v6603_v42 }
  0x6b   :  { %2072 = vmatprep.subr.bf16.mxu0 %v6614_v44 }
  0x6c   :  { %1672 = vmatmul.mubr.bf16.gmra.mxu0 %v6550_v43 }
  0x6d   :  { %1903 = vmatmul.mubr.bf16.gmra.mxu1 %v6551_v45  ;;  %1681 = vmatprep.mubr.bf16.mxu0 %v6555_v46 }
  0x6e   :  { %1912 = vmatprep.mubr.bf16.mxu1 %v6557_v47  ;;  %2073 = vmatpush2.bf16.msra.mxu0 %v6612_v48 }
  0x6f   :  { %2074 = vmatprep.subr.bf16.mxu0 %v6623_v49 }
  0x72   :  { %2075 = vmatpush2.bf16.msra.mxu0 %v6621_v51 }
  0x73   :  { %2076 = vmatprep.subr.bf16.mxu0 %v6638_v53 }
  0x74   :  { %1682 = vmatmul.mubr.bf16.gmra.mxu0 %v6559_v50 }
  0x75   :  { %1913 = vmatmul.mubr.bf16.gmra.mxu1 %v6560_v52  ;;  %1691 = vmatprep.mubr.bf16.mxu0 %v6564_v55 }
  0x76   :  { %1922 = vmatprep.mubr.bf16.mxu1 %v6566_v58  ;;  %2077 = vmatpush2.bf16.msra.mxu0 %v6636_v59 }
  0x77   :  { %2078 = vmatprep.subr.bf16.mxu0 %v6647_v60 }
  0x7a   :  { %2079 = vmatpush2.bf16.msra.mxu0 %v6645_v0 }
  0x7b   :  { %2080 = vmatprep.subr.bf16.mxu0 %v6656_v2 }
  0x7c   :  { %1692 = vmatmul.mubr.bf16.gmra.mxu0 %v6568_v1 }
  0x7d   :  { %1923 = vmatmul.mubr.bf16.gmra.mxu1 %v6569_v5  ;;  %1701 = vmatprep.mubr.bf16.mxu0 %v6573_v6 }
  0x7e   :  { %1932 = vmatprep.mubr.bf16.mxu1 %v6575_v7  ;;  %2081 = vmatpush2.bf16.msra.mxu0 %v6654_v8 }
  0x7f   :  { %2082 = vmatprep.subr.bf16.mxu0 %v6670_v10 }
  0x82   :  { %2083 = vmatpush2.bf16.msra.mxu0 %v6668_v15 }
  0x83   :  { %6087 = vmatprep.subr.bf16.mxu0 %v8868_v19 }
  0x84   :  { %1702 = vmatmul.mubr.bf16.gmra.mxu0 %v6577_v13 }
  0x85   :  { %1933 = vmatmul.mubr.bf16.gmra.mxu1 %v6578_v14  ;;  %1711 = vmatprep.mubr.bf16.mxu0 %v6582_v17 }
  0x86   :  { %1942 = vmatprep.mubr.bf16.mxu1 %v6584_v18 }
  0x8c   :  { %1712 = vmatmul.mubr.bf16.gmra.mxu0 %v6586_v20 }
  0x8d   :  { %1943 = vmatmul.mubr.bf16.gmra.mxu1 %v6587_v21  ;;  %1721 = vmatprep.mubr.bf16.mxu0 %v6588_v22 }
  0x8e   :  { %1952 = vmatprep.mubr.bf16.mxu1 %v6590_v23 }
  0x94   :  { %1722 = vmatmul.mubr.bf16.gmra.mxu0 %v6592_v24 }
  0x95   :  { %1953 = vmatmul.mubr.bf16.gmra.mxu1 %v6593_v25  ;;  %1731 = vmatprep.mubr.bf16.mxu0 %v6597_v26 }
  0x96   :  { %1962 = vmatprep.mubr.bf16.mxu1 %v6599_v27 }
  0x9c   :  { %1732 = vmatmul.mubr.bf16.gmra.mxu0 %v6601_v28 }
  0x9d   :  { %1963 = vmatmul.mubr.bf16.gmra.mxu1 %v6602_v29  ;;  %1741 = vmatprep.mubr.bf16.mxu0 %v6606_v30 }
  0x9e   :  { %1972 = vmatprep.mubr.bf16.mxu1 %v6608_v31 }
  0x9f   :  { %16 = vsyncpa [#allocation5], 0  ;;  %v6615_v34 = vld [vmem:[%s8859_s0 + $0x2dc] ss:$28 sps:$4 sm:$0xff]   ;;  %v6617_v35 = vld [vmem:[%s8859_s0 + $0x2e4] ss:$28 sps:$4 sm:$0xff]  }
  0xa0   :  { %v6619_v36 = vld [vmem:[%s8859_s0 + $0x2d8] ss:$28 sps:$4 sm:$0xff]   ;;  %v6620_v37 = vld [vmem:[%s8859_s0 + $0x2e0] ss:$28 sps:$4 sm:$0xff]   ;;  %v6628_v40 = vld [vmem:[%s8859_s0 + $0x310] ss:$28 sps:$4 sm:$0xff]  }
  0xa1   :  { %v6624_v38 = vld [vmem:[%s8859_s0 + $0x314] ss:$28 sps:$4 sm:$0xff]   ;;  %v6626_v39 = vld [vmem:[%s8859_s0 + $0x31c] ss:$28 sps:$4 sm:$0xff]   ;;  %v6630_v42 = vld [vmem:[%s8859_s0 + $0x34c] ss:$28 sps:$4 sm:$0xff]  }
  0xa2   :  { %v6629_v41 = vld [vmem:[%s8859_s0 + $0x318] ss:$28 sps:$4 sm:$0xff]   ;;  %v6634_v44 = vld [vmem:[%s8859_s0 + $0x348] ss:$28 sps:$4 sm:$0xff]   ;;  %v6635_v45 = vld [vmem:[%s8859_s0 + $0x350] ss:$28 sps:$4 sm:$0xff]  }
  0xa3   :  { %v6632_v43 = vld [vmem:[%s8859_s0 + $0x354] ss:$28 sps:$4 sm:$0xff]   ;;  %v6639_v46 = vld [vmem:[%s8859_s0 + $0x384] ss:$28 sps:$4 sm:$0xff]   ;;  %v6641_v47 = vld [vmem:[%s8859_s0 + $0x38c] ss:$28 sps:$4 sm:$0xff]  }
  0xa4   :  { %1742 = vmatmul.mubr.bf16.gmra.mxu0 %v6610_v32  ;;  %v6643_v48 = vld [vmem:[%s8859_s0 + $0x380] ss:$28 sps:$4 sm:$0xff]   ;;  %v6644_v49 = vld [vmem:[%s8859_s0 + $0x388] ss:$28 sps:$4 sm:$0xff]   ;;  %v6652_v52 = vld [vmem:[%s8859_s0 + $0x3b8] ss:$28 sps:$4 sm:$0xff]  }
  0xa5   :  { %1973 = vmatmul.mubr.bf16.gmra.mxu1 %v6611_v33  ;;  %1751 = vmatprep.mubr.bf16.mxu0 %v6615_v34  ;;  %v6648_v50 = vld [vmem:[%s8859_s0 + $0x3bc] ss:$28 sps:$4 sm:$0xff]   ;;  %v6650_v51 = vld [vmem:[%s8859_s0 + $0x3c4] ss:$28 sps:$4 sm:$0xff]   ;;  %v6658_v54 = vld [vmem:[%s8859_s0 + $0x3f4] ss:$28 sps:$4 sm:$0xff]  }
  0xa6   :  { %1982 = vmatprep.mubr.bf16.mxu1 %v6617_v35  ;;  %v6653_v53 = vld [vmem:[%s8859_s0 + $0x3c0] ss:$28 sps:$4 sm:$0xff]   ;;  %v6663_v56 = vld [vmem:[%s8859_s0 + $0x3f0] ss:$28 sps:$4 sm:$0xff]   ;;  %v6664_v57 = vld [vmem:[%s8859_s0 + $0x3f8] ss:$28 sps:$4 sm:$0xff]  }
  0xa7   :  { %v6660_v55 = vld [vmem:[%s8859_s0 + $0x3fc] ss:$28 sps:$4 sm:$0xff]   ;;  %v6674_v58 = vld [vmem:[%s8859_s0 + $0x42c] ss:$28 sps:$4 sm:$0xff]   ;;  %v6676_v59 = vld [vmem:[%s8859_s0 + $0x434] ss:$28 sps:$4 sm:$0xff]  }
  0xa8   :  { %v6678_v60 = vld [vmem:[%s8859_s0 + $0x428] ss:$28 sps:$4 sm:$0xff]   ;;  %v6679_v61 = vld [vmem:[%s8859_s0 + $0x430] ss:$28 sps:$4 sm:$0xff]   ;;  %v8870_v63 = vmov 0   ;;  %vm1522_vm1 = vcmask 588800  }
  0xa9   :  { %v6688_v62 = vld [vmem:[%s8859_s0 + $0x14] ss:$28 sps:$4 sm:$0xff]   ;;  %v7743_v2 = vld [vmem:[%s8862_s3 + $0x8] sm:$0xff]   ;;  %v7753_v4 = vld [vmem:[%s8862_s3] sm:$0xff]   ;;  %vm7120_vm2 = vmmov 0   ;;  %s7121_s10 = smov 64  }
  0xaa   :  { %v6686_v0 = vld [vmem:[%s8859_s0 + $0x10] ss:$28 sps:$4 sm:$0xff]   ;;  %v6690_v1 = vld [vmem:[%s8859_s0 + $0x18] ss:$28 sps:$4 sm:$0xff]   ;;  %v6693_v5 = vld [vmem:[%s8859_s0 + $0x48] ss:$28 sps:$4 sm:$0xff]  }
  0xab   :  { %v6691_v3 = vld [vmem:[%s8859_s0 + $0x4c] ss:$28 sps:$4 sm:$0xff]   ;;  %v6695_v7 = vld [vmem:[%s8859_s0 + $0x84] ss:$28 sps:$4 sm:$0xff]   ;;  %v6699_v10 = vld [vmem:[%s8859_s0 + $0xbc] ss:$28 sps:$4 sm:$0xff]  }
  0xac   :  { %1752 = vmatmul.mubr.bf16.gmra.mxu0 %v6619_v36  ;;  %v6694_v6 = vld [vmem:[%s8859_s0 + $0x50] ss:$28 sps:$4 sm:$0xff]   ;;  %v6697_v8 = vld [vmem:[%s8859_s0 + $0x80] ss:$28 sps:$4 sm:$0xff]   ;;  %v6698_v9 = vld [vmem:[%s8859_s0 + $0x88] ss:$28 sps:$4 sm:$0xff]  }
  0xad   :  { %1983 = vmatmul.mubr.bf16.gmra.mxu1 %v6620_v37  ;;  %1761 = vmatprep.mubr.bf16.mxu0 %v6624_v38  ;;  %v6701_v11 = vld [vmem:[%s8859_s0 + $0xb8] ss:$28 sps:$4 sm:$0xff]   ;;  %v6702_v12 = vld [vmem:[%s8859_s0 + $0xc0] ss:$28 sps:$4 sm:$0xff]   ;;  %v6705_v14 = vld [vmem:[%s8859_s0 + $0xf0] ss:$28 sps:$4 sm:$0xff]  }
  0xae   :  { %1992 = vmatprep.mubr.bf16.mxu1 %v6626_v39  ;;  %v6703_v13 = vld [vmem:[%s8859_s0 + $0xf4] ss:$28 sps:$4 sm:$0xff]   ;;  %v6707_v16 = vld [vmem:[%s8859_s0 + $0x12c] ss:$28 sps:$4 sm:$0xff]   ;;  %v6711_v28 = vld [vmem:[%s8859_s0 + $0x164] ss:$28 sps:$4 sm:$0xff]  }
  0xaf   :  { %v6706_v15 = vld [vmem:[%s8859_s0 + $0xf8] ss:$28 sps:$4 sm:$0xff]   ;;  %v6709_v25 = vld [vmem:[%s8859_s0 + $0x128] ss:$28 sps:$4 sm:$0xff]   ;;  %v6710_v26 = vld [vmem:[%s8859_s0 + $0x130] ss:$28 sps:$4 sm:$0xff]  }
  0xb0   :  { %s7122_s11 = smov 32   ;;  %vm2655_vm3 = vcmask 261120   ;;  %s7123_s26 = smov 96   ;;  %vm5579_vm4 = vcmask 1024   ;;  %vm5593_vm6 = vcmask 0  }
  0xb4   :  { %1762 = vmatmul.mubr.bf16.gmra.mxu0 %v6628_v40  ;;  %v6713_v40 = vld [vmem:[%s8859_s0 + $0x160] ss:$28 sps:$4 sm:$0xff]  }
  0xb5   :  { %1993 = vmatmul.mubr.bf16.gmra.mxu1 %v6629_v41  ;;  %1771 = vmatprep.mubr.bf16.mxu0 %v6630_v42  ;;  %v6714_v41 = vld [vmem:[%s8859_s0 + $0x168] ss:$28 sps:$4 sm:$0xff]  }
  0xb6   :  { %2002 = vmatprep.mubr.bf16.mxu1 %v6632_v43  ;;  %v6715_v43 = vld [vmem:[%s8859_s0 + $0x19c] ss:$28 sps:$4 sm:$0xff]  }
  0xbc   :  { %1772 = vmatmul.mubr.bf16.gmra.mxu0 %v6634_v44 }
  0xbd   :  { %2003 = vmatmul.mubr.bf16.gmra.mxu1 %v6635_v45  ;;  %1781 = vmatprep.mubr.bf16.mxu0 %v6639_v46 }
  0xbe   :  { %2012 = vmatprep.mubr.bf16.mxu1 %v6641_v47 }
  0xc4   :  { %1782 = vmatmul.mubr.bf16.gmra.mxu0 %v6643_v48 }
  0xc5   :  { %2013 = vmatmul.mubr.bf16.gmra.mxu1 %v6644_v49  ;;  %1791 = vmatprep.mubr.bf16.mxu0 %v6648_v50 }
  0xc6   :  { %2022 = vmatprep.mubr.bf16.mxu1 %v6650_v51 }
  0xcc   :  { %1792 = vmatmul.mubr.bf16.gmra.mxu0 %v6652_v52 }
  0xcd   :  { %2023 = vmatmul.mubr.bf16.gmra.mxu1 %v6653_v53  ;;  %1801 = vmatprep.mubr.bf16.mxu0 %v6658_v54 }
  0xce   :  { %2032 = vmatprep.mubr.bf16.mxu1 %v6660_v55  ;;  %v6717_v55 = vld [vmem:[%s8859_s0 + $0x198] ss:$28 sps:$4 sm:$0xff]  }
  0xd4   :  { %1802 = vmatmul.mubr.bf16.gmra.mxu0 %v6663_v56  ;;  %v6718_v56 = vld [vmem:[%s8859_s0 + $0x1a0] ss:$28 sps:$4 sm:$0xff]  }
  0xd5   :  { %2033 = vmatmul.mubr.bf16.gmra.mxu1 %v6664_v57  ;;  %1811 = vmatprep.mubr.bf16.mxu0 %v6674_v58  ;;  %v6721_v58 = vld [vmem:[%s8859_s0 + $0x1d4] ss:$28 sps:$4 sm:$0xff]  }
  0xd6   :  { %2042 = vmatprep.mubr.bf16.mxu1 %v6676_v59 }
  0xdc   :  { %1812 = vmatmul.mubr.bf16.gmra.mxu0 %v6678_v60 }
  0xdd   :  { %2043 = vmatmul.mubr.bf16.gmra.mxu1 %v6679_v61  ;;  %2084 = vmatprep.mubr.bf16.mxu0 %v6688_v62 }
  0xde   :  { %2315 = vmatprep.mubr.bf16.mxu1 %v8870_v63 }
  0xe4   :  { %2085 = vmatmul.mubr.bf16.vlgmr.msra.gmra.mxu0 %v6686_v0 }
  0xe5   :  { %5867 = vmatmul.mubr.msk.bf16.vlgmr.msra.gmra.mxu1 %vm1522_vm1, %v6690_v1  ;;  %6088 = vmatpush3.bf16.msra.mxu0 %v7743_v2 }
  0xe6   :  { %2093 = vmatprep.mubr.bf16.mxu0 %v6691_v3  ;;  %2324 = vmatprep.mubr.bf16.mxu1 %v8870_v63 }
  0xe7   :  { %6089 = vmatprep.subr.bf16.mxu0 %v8868_v19  ;;  %6096 = vmatpush3.bf16.msra.mxu1 %v7743_v2 }
  0xe8   :  { %6097 = vmatprep.subr.bf16.mxu1 %v8868_v19 }
  0xe9   :  { %6090 = vmatpush3.bf16.msra.mxu0 %v7753_v4 }
  0xea   :  { %6103 = vmatprep.subr.bf16.mxu0 %v8868_v19 }
  0xeb   :  { %6098 = vmatpush3.bf16.msra.mxu1 %v7753_v4 }
  0xec   :  { %2094 = vmatmul.mubr.bf16.gmra.mxu0 %v6693_v5  ;;  %6111 = vmatprep.subr.bf16.mxu1 %v8868_v19 }
  0xed   :  { %5868 = vmatmul.mubr.msk.bf16.gmra.mxu1 %vm1522_vm1, %v6694_v6  ;;  %2103 = vmatprep.mubr.bf16.mxu0 %v6695_v7 }
  0xee   :  { %2334 = vmatprep.mubr.bf16.mxu1 %v8870_v63 }
  0xf4   :  { %2104 = vmatmul.mubr.bf16.gmra.mxu0 %v6697_v8 }
  0xf5   :  { %5869 = vmatmul.mubr.msk.bf16.gmra.mxu1 %vm1522_vm1, %v6698_v9  ;;  %2113 = vmatprep.mubr.bf16.mxu0 %v6699_v10  ;;  %v6719_v9 = vld [vmem:[%s8859_s0 + $0x1d0] ss:$28 sps:$4 sm:$0xff]   ;;  %v6722_v10 = vld [vmem:[%s8859_s0 + $0x1d8] ss:$28 sps:$4 sm:$0xff]  }
  0xf6   :  { %2344 = vmatprep.mubr.bf16.mxu1 %v8870_v63 }
  0xfc   :  { %2114 = vmatmul.mubr.bf16.gmra.mxu0 %v6701_v11 }
  0xfd   :  { %5870 = vmatmul.mubr.msk.bf16.gmra.mxu1 %vm1522_vm1, %v6702_v12  ;;  %2123 = vmatprep.mubr.bf16.mxu0 %v6703_v13  ;;  %v6725_v12 = vld [vmem:[%s8859_s0 + $0x20c] ss:$28 sps:$4 sm:$0xff]  }
  0xfe   :  { %2354 = vmatprep.mubr.bf16.mxu1 %v8870_v63 }
 0x104   :  { %v1624_v17 = vpop.f32.mrf.mxu0  ;;  %2124 = vmatmul.mubr.bf16.gmra.mxu0 %v6705_v14 }
 0x105   :  { %v1855_v18 = vpop.f32.mrf.mxu1  ;;  %5871 = vmatmul.mubr.msk.bf16.gmra.mxu1 %vm1522_vm1, %v6706_v15  ;;  %2133 = vmatprep.mubr.bf16.mxu0 %v6707_v16 }
 0x106   :  { %v7806_v20 = vadd.f32 %v1855_v18, %v1624_v17  ;;  %2364 = vmatprep.mubr.bf16.mxu1 %v8870_v63  ;;  %v1626_v21 = vpop.f32.mrf.mxu0 }
 0x107   :  { %v1857_v22 = vpop.f32.mrf.mxu1 }
 0x108   :  { %v1627_v23 = vpop.f32.mrf.mxu0 }
 0x109   :  { %v1858_v24 = vpop.f32.mrf.mxu1 }
 0x10a   :  { %v7815_v27 = vadd.f32 %v1858_v24, %v1627_v23  ;;  %v1629_v29 = vpop.f32.mrf.mxu0 }
 0x10b   :  { %v1860_v30 = vpop.f32.mrf.mxu1 }
 0x10c   :  { %v7820_v31 = vadd.f32 %v1860_v30, %v1629_v29  ;;  %v1633_v32 = vpop.f32.mrf.mxu0  ;;  %2134 = vmatmul.mubr.bf16.gmra.mxu0 %v6709_v25  ;;  %v6729_v30 = vld [vmem:[%s8859_s0 + $0x244] ss:$28 sps:$4 sm:$0xff]  }
 0x10d   :  { %v1864_v33 = vpop.f32.mrf.mxu1  ;;  %5872 = vmatmul.mubr.msk.bf16.gmra.mxu1 %vm1522_vm1, %v6710_v26  ;;  %2143 = vmatprep.mubr.bf16.mxu0 %v6711_v28  ;;  %v6723_v26 = vld [vmem:[%s8859_s0 + $0x208] ss:$28 sps:$4 sm:$0xff]   ;;  %v6726_v28 = vld [vmem:[%s8859_s0 + $0x210] ss:$28 sps:$4 sm:$0xff]  }
 0x10e   :  { %v7823_v34 = vadd.f32 %v1864_v33, %v1633_v32  ;;  %2374 = vmatprep.mubr.bf16.mxu1 %v8870_v63  ;;  %v1635_v35 = vpop.f32.mrf.mxu0 }
 0x10f   :  { %v1866_v36 = vpop.f32.mrf.mxu1 }
 0x110   :  { %v7826_v37 = vadd.f32 %v1866_v36, %v1635_v35  ;;  %v1637_v38 = vpop.f32.mrf.mxu0 }
 0x111   :  { %v1868_v39 = vpop.f32.mrf.mxu1 }
 0x112   :  { %v7834_v42 = vadd.f32 %v1868_v39, %v1637_v38  ;;  %v1639_v44 = vpop.f32.mrf.mxu0 }
 0x113   :  { %v1870_v45 = vpop.f32.mrf.mxu1 }
 0x114   :  { %v7839_v46 = vadd.f32 %v1870_v45, %v1639_v44  ;;  %v1643_v47 = vpop.f32.mrf.mxu0  ;;  %2144 = vmatmul.mubr.bf16.gmra.mxu0 %v6713_v40 }
 0x115   :  { %v1874_v48 = vpop.f32.mrf.mxu1  ;;  %5873 = vmatmul.mubr.msk.bf16.gmra.mxu1 %vm1522_vm1, %v6714_v41  ;;  %2153 = vmatprep.mubr.bf16.mxu0 %v6715_v43 }
 0x116   :  { %v7842_v49 = vadd.f32 %v1874_v48, %v1643_v47  ;;  %2384 = vmatprep.mubr.bf16.mxu1 %v8870_v63  ;;  %v1645_v50 = vpop.f32.mrf.mxu0  ;;  %v6727_v47 = vld [vmem:[%s8859_s0 + $0x240] ss:$28 sps:$4 sm:$0xff]   ;;  %v6731_v48 = vld [vmem:[%s8859_s0 + $0x248] ss:$28 sps:$4 sm:$0xff]  }
 0x117   :  { %v1876_v51 = vpop.f32.mrf.mxu1 }
 0x118   :  { %v7845_v52 = vadd.f32 %v1876_v51, %v1645_v50  ;;  %v1647_v53 = vpop.f32.mrf.mxu0  ;;  %v6734_v51 = vld [vmem:[%s8859_s0 + $0x27c] ss:$28 sps:$4 sm:$0xff]  }
 0x119   :  { %v1878_v54 = vpop.f32.mrf.mxu1 }
 0x11a   :  { %v7853_v57 = vadd.f32 %v1878_v54, %v1647_v53  ;;  %v1649_v59 = vpop.f32.mrf.mxu0 }
 0x11b   :  { %v1880_v60 = vpop.f32.mrf.mxu1 }
 0x11c   :  { %v7858_v61 = vadd.f32 %v1880_v60, %v1649_v59  ;;  %v1653_v62 = vpop.f32.mrf.mxu0  ;;  %2154 = vmatmul.mubr.bf16.gmra.mxu0 %v6717_v55 }
 0x11d   :  { %v1884_v0 = vpop.f32.mrf.mxu1  ;;  %5874 = vmatmul.mubr.msk.bf16.gmra.mxu1 %vm1522_vm1, %v6718_v56  ;;  %2163 = vmatprep.mubr.bf16.mxu0 %v6721_v58 }
 0x11e   :  { %v7861_v1 = vadd.f32 %v1884_v0, %v1653_v62  ;;  %2394 = vmatprep.mubr.bf16.mxu1 %v8870_v63  ;;  %v1655_v3 = vpop.f32.mrf.mxu0 }
 0x11f   :  { %v1886_v5 = vpop.f32.mrf.mxu1 }
 0x120   :  { %v7864_v6 = vadd.f32 %v1886_v5, %v1655_v3  ;;  %v1657_v7 = vpop.f32.mrf.mxu0 }
 0x121   :  { %v1888_v8 = vpop.f32.mrf.mxu1 }
 0x122   :  { %v7872_v11 = vadd.f32 %v1888_v8, %v1657_v7  ;;  %v1659_v13 = vpop.f32.mrf.mxu0  ;;  %v6732_v7 = vld [vmem:[%s8859_s0 + $0x278] ss:$28 sps:$4 sm:$0xff]   ;;  %v6735_v8 = vld [vmem:[%s8859_s0 + $0x280] ss:$28 sps:$4 sm:$0xff]  }
 0x123   :  { %v1890_v14 = vpop.f32.mrf.mxu1 }
 0x124   :  { %v7877_v15 = vadd.f32 %v1890_v14, %v1659_v13  ;;  %v1663_v16 = vpop.f32.mrf.mxu0  ;;  %2164 = vmatmul.mubr.bf16.gmra.mxu0 %v6719_v9 }
 0x125   :  { %v1894_v17 = vpop.f32.mrf.mxu1  ;;  %5875 = vmatmul.mubr.msk.bf16.gmra.mxu1 %vm1522_vm1, %v6722_v10  ;;  %2173 = vmatprep.mubr.bf16.mxu0 %v6725_v12  ;;  %v6738_v10 = vld [vmem:[%s8859_s0 + $0x2b4] ss:$28 sps:$4 sm:$0xff]  }
 0x126   :  { %v7880_v18 = vadd.f32 %v1894_v17, %v1663_v16  ;;  %2404 = vmatprep.mubr.bf16.mxu1 %v8870_v63  ;;  %v1665_v21 = vpop.f32.mrf.mxu0 }
 0x127   :  { %v1896_v22 = vpop.f32.mrf.mxu1 }
 0x128   :  { %v7883_v23 = vadd.f32 %v1896_v22, %v1665_v21  ;;  %v1667_v24 = vpop.f32.mrf.mxu0 }
 0x129   :  { %v1898_v25 = vpop.f32.mrf.mxu1 }
 0x12a   :  { %v7891_v29 = vadd.f32 %v1898_v25, %v1667_v24  ;;  %v1669_v32 = vpop.f32.mrf.mxu0 }
 0x12b   :  { %v1900_v33 = vpop.f32.mrf.mxu1 }
 0x12c   :  { %v7896_v35 = vadd.f32 %v1900_v33, %v1669_v32  ;;  %v1673_v36 = vpop.f32.mrf.mxu0  ;;  %2174 = vmatmul.mubr.bf16.gmra.mxu0 %v6723_v26  ;;  %v6739_v32 = vld [vmem:[%s8859_s0 + $0x2b8] ss:$28 sps:$4 sm:$0xff]  }
 0x12d   :  { %v1904_v38 = vpop.f32.mrf.mxu1  ;;  %5876 = vmatmul.mubr.msk.bf16.gmra.mxu1 %vm1522_vm1, %v6726_v28  ;;  %2183 = vmatprep.mubr.bf16.mxu0 %v6729_v30  ;;  %v6736_v30 = vld [vmem:[%s8859_s0 + $0x2b0] ss:$28 sps:$4 sm:$0xff]  }
 0x12e   :  { %v7899_v39 = vadd.f32 %v1904_v38, %v1673_v36  ;;  %2414 = vmatprep.mubr.bf16.mxu1 %v8870_v63  ;;  %v1675_v40 = vpop.f32.mrf.mxu0  ;;  %v6742_v36 = vld [vmem:[%s8859_s0 + $0x2ec] ss:$28 sps:$4 sm:$0xff]  }
 0x12f   :  { %v1906_v41 = vpop.f32.mrf.mxu1 }
 0x130   :  { %v7902_v43 = vadd.f32 %v1906_v41, %v1675_v40  ;;  %v1677_v44 = vpop.f32.mrf.mxu0 }
 0x131   :  { %v1908_v45 = vpop.f32.mrf.mxu1 }
 0x132   :  { %v7910_v50 = vadd.f32 %v1908_v45, %v1677_v44  ;;  %v1679_v53 = vpop.f32.mrf.mxu0 }
 0x133   :  { %v1910_v54 = vpop.f32.mrf.mxu1 }
 0x134   :  { %v7915_v55 = vadd.f32 %v1910_v54, %v1679_v53  ;;  %v1683_v56 = vpop.f32.mrf.mxu0  ;;  %2184 = vmatmul.mubr.bf16.gmra.mxu0 %v6727_v47 }
 0x135   :  { %v1914_v58 = vpop.f32.mrf.mxu1  ;;  %5877 = vmatmul.mubr.msk.bf16.gmra.mxu1 %vm1522_vm1, %v6731_v48  ;;  %2193 = vmatprep.mubr.bf16.mxu0 %v6734_v51 }
 0x136   :  { %v7918_v59 = vadd.f32 %v1914_v58, %v1683_v56  ;;  %2424 = vmatprep.mubr.bf16.mxu1 %v8870_v63  ;;  %v1685_v60 = vpop.f32.mrf.mxu0  ;;  %v6740_v58 = vld [vmem:[%s8859_s0 + $0x2e8] ss:$28 sps:$4 sm:$0xff]  }
 0x137   :  { %v1916_v62 = vpop.f32.mrf.mxu1 }
 0x138   :  { %v7921_v0 = vadd.f32 %v1916_v62, %v1685_v60  ;;  %v1687_v3 = vpop.f32.mrf.mxu0  ;;  %v6743_v60 = vld [vmem:[%s8859_s0 + $0x2f0] ss:$28 sps:$4 sm:$0xff]  }
 0x139   :  { %v1918_v5 = vpop.f32.mrf.mxu1 }
 0x13a   :  { %v7929_v9 = vadd.f32 %v1918_v5, %v1687_v3  ;;  %v1689_v12 = vpop.f32.mrf.mxu0  ;;  %v6746_v3 = vld [vmem:[%s8859_s0 + $0x324] ss:$28 sps:$4 sm:$0xff]  }
 0x13b   :  { %v1920_v13 = vpop.f32.mrf.mxu1 }
 0x13c   :  { %v7934_v14 = vadd.f32 %v1920_v13, %v1689_v12  ;;  %v1693_v16 = vpop.f32.mrf.mxu0  ;;  %2194 = vmatmul.mubr.bf16.gmra.mxu0 %v6732_v7 }
 0x13d   :  { %v1924_v17 = vpop.f32.mrf.mxu1  ;;  %5878 = vmatmul.mubr.msk.bf16.gmra.mxu1 %vm1522_vm1, %v6735_v8  ;;  %2203 = vmatprep.mubr.bf16.mxu0 %v6738_v10 }
 0x13e   :  { %v7937_v21 = vadd.f32 %v1924_v17, %v1693_v16  ;;  %2434 = vmatprep.mubr.bf16.mxu1 %v8870_v63  ;;  %v1695_v22 = vpop.f32.mrf.mxu0 }
 0x13f   :  { %v1926_v24 = vpop.f32.mrf.mxu1 }
 0x140   :  { %v7940_v25 = vadd.f32 %v1926_v24, %v1695_v22  ;;  %v1697_v26 = vpop.f32.mrf.mxu0 }
 0x141   :  { %v1928_v28 = vpop.f32.mrf.mxu1 }
 0x142   :  { %v7948_v33 = vadd.f32 %v1928_v28, %v1697_v26  ;;  %v1699_v38 = vpop.f32.mrf.mxu0  ;;  %v6744_v28 = vld [vmem:[%s8859_s0 + $0x320] ss:$28 sps:$4 sm:$0xff]  }
 0x143   :  { %v1930_v40 = vpop.f32.mrf.mxu1 }
 0x144   :  { %v7953_v41 = vadd.f32 %v1930_v40, %v1699_v38  ;;  %v1703_v44 = vpop.f32.mrf.mxu0  ;;  %2204 = vmatmul.mubr.bf16.gmra.mxu0 %v6736_v30  ;;  %v6747_v30 = vld [vmem:[%s8859_s0 + $0x328] ss:$28 sps:$4 sm:$0xff]  }
 0x145   :  { %v1934_v45 = vpop.f32.mrf.mxu1  ;;  %5879 = vmatmul.mubr.msk.bf16.gmra.mxu1 %vm1522_vm1, %v6739_v32  ;;  %2213 = vmatprep.mubr.bf16.mxu0 %v6742_v36  ;;  %v6750_v36 = vld [vmem:[%s8859_s0 + $0x35c] ss:$28 sps:$4 sm:$0xff]  }
 0x146   :  { %v7956_v47 = vadd.f32 %v1934_v45, %v1703_v44  ;;  %2444 = vmatprep.mubr.bf16.mxu1 %v8870_v63  ;;  %v1705_v48 = vpop.f32.mrf.mxu0 }
 0x147   :  { %v1936_v51 = vpop.f32.mrf.mxu1 }
 0x148   :  { %v7959_v53 = vadd.f32 %v1936_v51, %v1705_v48  ;;  %v1707_v54 = vpop.f32.mrf.mxu0 }
 0x149   :  { %v1938_v56 = vpop.f32.mrf.mxu1 }
 0x14a   :  { %v7967_v62 = vadd.f32 %v1938_v56, %v1707_v54  ;;  %v1709_v5 = vpop.f32.mrf.mxu0 }
 0x14b   :  { %v1940_v7 = vpop.f32.mrf.mxu1 }
 0x14c   :  { %v7972_v8 = vadd.f32 %v1940_v7, %v1709_v5  ;;  %v1713_v10 = vpop.f32.mrf.mxu0  ;;  %2214 = vmatmul.mubr.bf16.gmra.mxu0 %v6740_v58  ;;  %v6748_v5 = vld [vmem:[%s8859_s0 + $0x358] ss:$28 sps:$4 sm:$0xff]   ;;  %v6751_v7 = vld [vmem:[%s8859_s0 + $0x360] ss:$28 sps:$4 sm:$0xff]  }
 0x14d   :  { %v1944_v12 = vpop.f32.mrf.mxu1  ;;  %5880 = vmatmul.mubr.msk.bf16.gmra.mxu1 %vm1522_vm1, %v6743_v60  ;;  %2223 = vmatprep.mubr.bf16.mxu0 %v6746_v3 }
 0x14e   :  { %v7975_v13 = vadd.f32 %v1944_v12, %v1713_v10  ;;  %2454 = vmatprep.mubr.bf16.mxu1 %v8870_v63  ;;  %v1715_v16 = vpop.f32.mrf.mxu0  ;;  %v6754_v12 = vld [vmem:[%s8859_s0 + $0x394] ss:$28 sps:$4 sm:$0xff]  }
 0x14f   :  { %v1946_v17 = vpop.f32.mrf.mxu1 }
 0x150   :  { %v7978_v22 = vadd.f32 %v1946_v17, %v1715_v16  ;;  %v1717_v24 = vpop.f32.mrf.mxu0 }
 0x151   :  { %v1948_v26 = vpop.f32.mrf.mxu1 }
 0x152   :  { %v7986_v32 = vadd.f32 %v1948_v26, %v1717_v24  ;;  %v1719_v38 = vpop.f32.mrf.mxu0 }
 0x153   :  { %v1950_v40 = vpop.f32.mrf.mxu1 }
 0x154   :  { %v7991_v44 = vadd.f32 %v1950_v40, %v1719_v38  ;;  %v1723_v45 = vpop.f32.mrf.mxu0  ;;  %2224 = vmatmul.mubr.bf16.gmra.mxu0 %v6744_v28 }
 0x155   :  { %v1954_v48 = vpop.f32.mrf.mxu1  ;;  %5881 = vmatmul.mubr.msk.bf16.gmra.mxu1 %vm1522_vm1, %v6747_v30  ;;  %2233 = vmatprep.mubr.bf16.mxu0 %v6750_v36 }
 0x156   :  { %v7994_v51 = vadd.f32 %v1954_v48, %v1723_v45  ;;  %2464 = vmatprep.mubr.bf16.mxu1 %v8870_v63  ;;  %v1725_v54 = vpop.f32.mrf.mxu0 }
 0x157   :  { %v1956_v56 = vpop.f32.mrf.mxu1 }
 0x158   :  { %v7997_v58 = vadd.f32 %v1956_v56, %v1725_v54  ;;  %v1727_v60 = vpop.f32.mrf.mxu0  ;;  %v6752_v54 = vld [vmem:[%s8859_s0 + $0x390] ss:$28 sps:$4 sm:$0xff]   ;;  %v6755_v56 = vld [vmem:[%s8859_s0 + $0x398] ss:$28 sps:$4 sm:$0xff]  }
 0x159   :  { %v1958_v3 = vpop.f32.mrf.mxu1 }
 0x15a   :  { %v8005_v10 = vadd.f32 %v1958_v3, %v1727_v60  ;;  %v1729_v16 = vpop.f32.mrf.mxu0  ;;  %v6758_v3 = vld [vmem:[%s8859_s0 + $0x3cc] ss:$28 sps:$4 sm:$0xff]  }
 0x15b   :  { %v1960_v17 = vpop.f32.mrf.mxu1 }
 0x15c   :  { %v8010_v24 = vadd.f32 %v1960_v17, %v1729_v16  ;;  %v1733_v26 = vpop.f32.mrf.mxu0  ;;  %2234 = vmatmul.mubr.bf16.gmra.mxu0 %v6748_v5 }
 0x15d   :  { %v1964_v28 = vpop.f32.mrf.mxu1  ;;  %5882 = vmatmul.mubr.msk.bf16.gmra.mxu1 %vm1522_vm1, %v6751_v7  ;;  %2243 = vmatprep.mubr.bf16.mxu0 %v6754_v12 }
 0x15e   :  { %v8013_v30 = vadd.f32 %v1964_v28, %v1733_v26  ;;  %2474 = vmatprep.mubr.bf16.mxu1 %v8870_v63  ;;  %v1735_v36 = vpop.f32.mrf.mxu0 }
 0x15f   :  { %v1966_v38 = vpop.f32.mrf.mxu1 }
 0x160   :  { %v8016_v40 = vadd.f32 %v1966_v38, %v1735_v36  ;;  %v1737_v45 = vpop.f32.mrf.mxu0 }
 0x161   :  { %v1968_v48 = vpop.f32.mrf.mxu1 }
 0x162   :  { %v8024_v60 = vadd.f32 %v1968_v48, %v1737_v45  ;;  %v1739_v5 = vpop.f32.mrf.mxu0 }
 0x163   :  { %v1970_v7 = vpop.f32.mrf.mxu1 }
 0x164   :  { %8873 = vst [vmem:[#allocation7_spill] sm:$0xff] %v8024_v60  ;;  %v8029_v12 = vadd.f32 %v1970_v7, %v1739_v5  ;;  %v1743_v16 = vpop.f32.mrf.mxu0  ;;  %2244 = vmatmul.mubr.bf16.gmra.mxu0 %v6752_v54  ;;  %v6756_v5 = vld [vmem:[%s8859_s0 + $0x3c8] ss:$28 sps:$4 sm:$0xff]   ;;  %v6759_v54 = vld [vmem:[%s8859_s0 + $0x3d0] ss:$28 sps:$4 sm:$0xff]  }
 0x165   :  { %v1974_v17 = vpop.f32.mrf.mxu1  ;;  %5883 = vmatmul.mubr.msk.bf16.gmra.mxu1 %vm1522_vm1, %v6755_v56  ;;  %2253 = vmatprep.mubr.bf16.mxu0 %v6758_v3  ;;  %v6762_v3 = vld [vmem:[%s8859_s0 + $0x404] ss:$28 sps:$4 sm:$0xff]  }
 0x166   :  { %8874 = vst [vmem:[#allocation8_spill] sm:$0xff] %v8029_v12  ;;  %v8032_v26 = vadd.f32 %v1974_v17, %v1743_v16  ;;  %2484 = vmatprep.mubr.bf16.mxu1 %v8870_v63  ;;  %v1745_v28 = vpop.f32.mrf.mxu0 }
 0x167   :  { %v1976_v36 = vpop.f32.mrf.mxu1 }
 0x168   :  { %8875 = vst [vmem:[#allocation9_spill] sm:$0xff] %v8032_v26  ;;  %v8035_v38 = vadd.f32 %v1976_v36, %v1745_v28  ;;  %v1747_v45 = vpop.f32.mrf.mxu0 }
 0x169   :  { %v1978_v48 = vpop.f32.mrf.mxu1 }
 0x16a   :  { %8876 = vst [vmem:[#allocation10_spill] sm:$0xff] %v8035_v38  ;;  %v8043_v56 = vadd.f32 %v1978_v48, %v1747_v45  ;;  %v8048_v7 = vpop.f32.mrf.mxu0 }
 0x16b   :  { %8878 = vst [vmem:[#allocation12_spill] sm:$0xff] %v8048_v7  ;;  %v8050_v16 = vpop.f32.mrf.mxu1 }
 0x16c   :  { %8877 = vst [vmem:[#allocation11_spill] sm:$0xff] %v8043_v56  ;;  %8879 = vst [vmem:[#allocation13_spill] sm:$0xff] %v8050_v16  ;;  %v1753_v17 = vpop.f32.mrf.mxu0  ;;  %2254 = vmatmul.mubr.bf16.gmra.mxu0 %v6756_v5  ;;  %v6760_v16 = vld [vmem:[%s8859_s0 + $0x400] ss:$28 sps:$4 sm:$0xff]   ;;  %v6763_v5 = vld [vmem:[%s8859_s0 + $0x408] ss:$28 sps:$4 sm:$0xff]  }
 0x16d   :  { %v1984_v28 = vpop.f32.mrf.mxu1  ;;  %5884 = vmatmul.mubr.msk.bf16.gmra.mxu1 %vm1522_vm1, %v6759_v54  ;;  %2263 = vmatprep.mubr.bf16.mxu0 %v6762_v3  ;;  %v6766_v3 = vld [vmem:[%s8859_s0 + $0x43c] ss:$28 sps:$4 sm:$0xff]  }
 0x16e   :  { %v8053_v36 = vadd.f32 %v1984_v28, %v1753_v17  ;;  %2494 = vmatprep.mubr.bf16.mxu1 %v8870_v63  ;;  %v1755_v45 = vpop.f32.mrf.mxu0 }
 0x16f   :  { %v1986_v48 = vpop.f32.mrf.mxu1 }
 0x170   :  { %8880 = vst [vmem:[#allocation14_spill] sm:$0xff] %v8053_v36  ;;  %v8056_v19 = vadd.f32 %v1986_v48, %v1755_v45  ;;  %v1757_v56 = vpop.f32.mrf.mxu0 }
 0x171   :  { %v1988_v38 = vpop.f32.mrf.mxu1 }
 0x172   :  { %8881 = vst [vmem:[#allocation15_spill] sm:$0xff] %v8056_v19  ;;  %v8064_v54 = vadd.f32 %v1988_v38, %v1757_v56  ;;  %v8069_v17 = vpop.f32.mrf.mxu0  ;;  %v8886_v19 = vmov 0  }
 0x173   :  { %8883 = vst [vmem:[#allocation17_spill] sm:$0xff] %v8069_v17  ;;  %v8071_v28 = vpop.f32.mrf.mxu1 }
 0x174   :  { %8882 = vst [vmem:[#allocation16_spill] sm:$0xff] %v8064_v54  ;;  %8884 = vst [vmem:[#allocation18_spill] sm:$0xff] %v8071_v28  ;;  %v1763_v45 = vpop.f32.mrf.mxu0  ;;  %2264 = vmatmul.mubr.bf16.gmra.mxu0 %v6760_v16  ;;  %v6764_v28 = vld [vmem:[%s8859_s0 + $0x438] ss:$28 sps:$4 sm:$0xff]   ;;  %v6767_v16 = vld [vmem:[%s8859_s0 + $0x440] ss:$28 sps:$4 sm:$0xff]  }
 0x175   :  { %v1994_v48 = vpop.f32.mrf.mxu1  ;;  %5885 = vmatmul.mubr.msk.bf16.gmra.mxu1 %vm1522_vm1, %v6763_v5  ;;  %2273 = vmatprep.mubr.bf16.mxu0 %v6766_v3 }
 0x176   :  { %v8074_v63 = vadd.f32 %v1994_v48, %v1763_v45  ;;  %2504 = vmatprep.mubr.bf16.mxu1 %v8886_v19  ;;  %v1765_v38 = vpop.f32.mrf.mxu0 }
 0x177   :  { %v1996_v56 = vpop.f32.mrf.mxu1 }
 0x178   :  { %8885 = vst [vmem:[#allocation19_spill] sm:$0xff] %v8074_v63  ;;  %v8077_v54 = vadd.f32 %v1996_v56, %v1765_v38  ;;  %v1767_v36 = vpop.f32.mrf.mxu0  ;;  %v8892_v56 = vmov 0.0  }
 0x179   :  { %v1998_v7 = vpop.f32.mrf.mxu1 }
 0x17a   :  { %8887 = vst [vmem:[#allocation20_spill] sm:$0xff] %v8077_v54  ;;  %v8085_v5 = vadd.f32 %v1998_v7, %v1767_v36  ;;  %v8087_v45 = vpop.f32.mrf.mxu0 }
 0x17b   :  { %8889 = vst [vmem:[#allocation22_spill] sm:$0xff] %v8087_v45  ;;  %v8089_v3 = vpop.f32.mrf.mxu1 }
 0x17c   :  { %8888 = vst [vmem:[#allocation21_spill] sm:$0xff] %v8085_v5  ;;  %8890 = vst [vmem:[#allocation23_spill] sm:$0xff] %v8089_v3  ;;  %v1773_v48 = vpop.f32.mrf.mxu0  ;;  %2274 = vmatmul.mubr.bf16.gmra.mxu0 %v6764_v28 }
 0x17d   :  { %v2004_v63 = vpop.f32.mrf.mxu1  ;;  %5886 = vmatmul.mubr.msk.bf16.gmra.mxu1 %vm1522_vm1, %v6767_v16  ;;  %6091 = vmatprep.mubr.msk.bf16.mxu0 %vm7120_vm2, %v8892_v56 }
 0x17e   :  { %v8092_v38 = vadd.f32 %v2004_v63, %v1773_v48  ;;  %6099 = vmatprep.mubr.msk.bf16.mxu1 %vm7120_vm2, %v8892_v56  ;;  %v1775_v7 = vpop.f32.mrf.mxu0 }
 0x17f   :  { %v2006_v36 = vpop.f32.mrf.mxu1 }
 0x180   :  { %8891 = vst [vmem:[#allocation24_spill] sm:$0xff] %v8092_v38  ;;  %v8098_v5 = vadd.f32 %v2006_v36, %v1775_v7  ;;  %v1777_v45 = vpop.f32.mrf.mxu0 }
 0x181   :  { %v2008_v3 = vpop.f32.mrf.mxu1 }
 0x182   :  { %8893 = vst [vmem:[#allocation25_spill] sm:$0xff] %v8098_v5  ;;  %v8100_v54 = vadd.f32 %v2008_v3, %v1777_v45  ;;  %v8102_v28 = vpop.f32.mrf.mxu0 }
 0x183   :  { %8895 = vst [vmem:[#allocation27_spill] sm:$0xff] %v8102_v28  ;;  %v8104_v16 = vpop.f32.mrf.mxu1 }
 0x184   :  { %8894 = vst [vmem:[#allocation26_spill] sm:$0xff] %v8100_v54  ;;  %8896 = vst [vmem:[#allocation28_spill] sm:$0xff] %v8104_v16  ;;  %v1783_v63 = vpop.f32.mrf.mxu0  ;;  %6092 = vmatmul.mubr.bf16.vlgmr.msra.gmra.mxu0 %v8886_v19 }
 0x185   :  { %v2014_v48 = vpop.f32.mrf.mxu1  ;;  %6104 = vmatpush3.bf16.msra.mxu0 %v7743_v2  ;;  %6107 = vmatprep.mubr.msk.bf16.mxu0 %vm7120_vm2, %v8892_v56 }
 0x186   :  { %v8107_v38 = vadd.f32 %v2014_v48, %v1783_v63  ;;  %v1785_v7 = vpop.f32.mrf.mxu0  ;;  %6105 = vmatprep.subr.bf16.mxu0 %v8892_v56 }
 0x187   :  { %v2016_v36 = vpop.f32.mrf.mxu1 }
 0x188   :  { %8897 = vst [vmem:[#allocation29_spill] sm:$0xff] %v8107_v38  ;;  %v8113_v45 = vadd.f32 %v2016_v36, %v1785_v7  ;;  %v1787_v3 = vpop.f32.mrf.mxu0 }
 0x189   :  { %v2018_v54 = vpop.f32.mrf.mxu1  ;;  %6106 = vmatpush3.bf16.msra.mxu0 %v7753_v4 }
 0x18a   :  { %8898 = vst [vmem:[#allocation30_spill] sm:$0xff] %v8113_v45  ;;  %v8115_v16 = vadd.f32 %v2018_v54, %v1787_v3  ;;  %v8118_v19 = vpop.f32.mrf.mxu0  ;;  %6119 = vmatprep.subr.bf16.mxu0 %v8892_v56 }
 0x18b   :  { %8900 = vst [vmem:[#allocation32_spill] sm:$0xff] %v8118_v19  ;;  %v8120_v63 = vpop.f32.mrf.mxu1 }
 0x18c   :  { %8899 = vst [vmem:[#allocation31_spill] sm:$0xff] %v8115_v16  ;;  %8901 = vst [vmem:[#allocation33_spill] sm:$0xff] %v8120_v63  ;;  %v1793_v2 = vpop.f32.mrf.mxu0 }
 0x18d   :  { %v2024_v48 = vpop.f32.mrf.mxu1 }
 0x18e   :  { %v8123_v38 = vadd.f32 %v2024_v48, %v1793_v2  ;;  %v1795_v28 = vpop.f32.mrf.mxu0 }
 0x18f   :  { %v2026_v5 = vpop.f32.mrf.mxu1 }
 0x190   :  { %8902 = vst [vmem:[#allocation34_spill] sm:$0xff] %v8123_v38  ;;  %v8125_v7 = vadd.f32 %v2026_v5, %v1795_v28  ;;  %v1797_v36 = vpop.f32.mrf.mxu0 }
 0x191   :  { %v2028_v45 = vpop.f32.mrf.mxu1 }
 0x192   :  { %8903 = vst [vmem:[#allocation35_spill] sm:$0xff] %v8125_v7  ;;  %v8127_v54 = vadd.f32 %v2028_v45, %v1797_v36  ;;  %v8129_v3 = vpop.f32.mrf.mxu0 }
 0x193   :  { %8905 = vst [vmem:[#allocation37_spill] sm:$0xff] %v8129_v3  ;;  %v8131_v4 = vpop.f32.mrf.mxu1 }
 0x194   :  { %8904 = vst [vmem:[#allocation36_spill] sm:$0xff] %v8127_v54  ;;  %8906 = vst [vmem:[#allocation38_spill] sm:$0xff] %v8131_v4  ;;  %v1803_v16 = vpop.f32.mrf.mxu0 }
 0x195   :  { %v2034_v63 = vpop.f32.mrf.mxu1 }
 0x196   :  { %v8133_v19 = vadd.f32 %v2034_v63, %v1803_v16  ;;  %v1805_v56 = vpop.f32.mrf.mxu0 }
 0x197   :  { %v2036_v17 = vpop.f32.mrf.mxu1 }
 0x198   :  { %8907 = vst [vmem:[#allocation39_spill] sm:$0xff] %v8133_v19  ;;  %v8135_v2 = vadd.f32 %v2036_v17, %v1805_v56  ;;  %v1807_v48 = vpop.f32.mrf.mxu0 }
 0x199   :  { %v2038_v38 = vpop.f32.mrf.mxu1 }
 0x19a   :  { %8908 = vst [vmem:[#allocation40_spill] sm:$0xff] %v8135_v2  ;;  %v8137_v5 = vadd.f32 %v2038_v38, %v1807_v48  ;;  %v8139_v28 = vpop.f32.mrf.mxu0 }
 0x19b   :  { %8910 = vst [vmem:[#allocation42_spill] sm:$0xff] %v8139_v28  ;;  %v8141_v45 = vpop.f32.mrf.mxu1 }
 0x19c   :  { %8909 = vst [vmem:[#allocation41_spill] sm:$0xff] %v8137_v5  ;;  %8911 = vst [vmem:[#allocation43_spill] sm:$0xff] %v8141_v45  ;;  %v1813_v36 = vpop.f32.mrf.mxu0 }
 0x19d   :  { %v2044_v54 = vpop.f32.mrf.mxu1 }
 0x19e   :  { %v8143_v3 = vadd.f32 %v2044_v54, %v1813_v36  ;;  %v1815_v4 = vpop.f32.mrf.mxu0 }
 0x19f   :  { %v2046_v7 = vpop.f32.mrf.mxu1 }
 0x1a0   :  { %8912 = vst [vmem:[#allocation44_spill] sm:$0xff] %v8143_v3  ;;  %v8145_v16 = vadd.f32 %v2046_v7, %v1815_v4  ;;  %v1817_v63 = vpop.f32.mrf.mxu0 }
 0x1a1   :  { %v2048_v19 = vpop.f32.mrf.mxu1 }
 0x1a2   :  { %8913 = vst [vmem:[#allocation45_spill] sm:$0xff] %v8145_v16  ;;  %v8147_v17 = vpop.f32.mrf.mxu0 }
 0x1a3   :  { %8914 = vst [vmem:[#allocation46_spill] sm:$0xff] %v8147_v17  ;;  %v8149_v56 = vpop.f32.mrf.mxu1 }
 0x1a4   :  { %8915 = vst [vmem:[#allocation47_spill] sm:$0xff] %v8149_v56  ;;  %v2086_v38 = vpop.f32.mrf.mxu0 }
 0x1a5   :  { %v2317_v48 = vpop.f32.mrf.mxu1  ;;  %v2087_v5 = vadd.f32 %v2086_v38, %v7806_v20 }
 0x1a6   :  { %v2088_v28 = vpop.f32.mrf.mxu0 }
 0x1a7   :  { %v2319_v45 = vpop.f32.mrf.mxu1  ;;  %v2318_v2 = vadd.f32 %v2317_v48, %v2087_v5 }
 0x1a8   :  { %v2089_v26 = vpop.f32.mrf.mxu0 }
 0x1a9   :  { %v2320_v54 = vpop.f32.mrf.mxu1  ;;  %v2090_v36 = vadd.f32 %v2089_v26, %v7815_v27 }
 0x1aa   :  { %v2091_v3 = vpop.f32.mrf.mxu0 }
 0x1ab   :  { %v2322_v7 = vpop.f32.mrf.mxu1  ;;  %v2092_v4 = vadd.f32 %v2091_v3, %v7820_v31  ;;  %v2321_v19 = vadd.f32 %v2320_v54, %v2090_v36 }
 0x1ac   :  { %v2095_v63 = vpop.f32.mrf.mxu0 }
 0x1ad   :  { %v2326_v17 = vpop.f32.mrf.mxu1  ;;  %v2096_v56 = vadd.f32 %v2095_v63, %v7823_v34  ;;  %v2323_v16 = vadd.f32 %v2322_v7, %v2092_v4 }
 0x1ae   :  { %v2097_v12 = vpop.f32.mrf.mxu0 }
 0x1af   :  { %v2328_v60 = vpop.f32.mrf.mxu1  ;;  %v8155_v20 = vadd.f32 %v2323_v16, %v2318_v2  ;;  %v2098_v5 = vadd.f32 %v2097_v12, %v7826_v37  ;;  %v2327_v28 = vadd.f32 %v2326_v17, %v2096_v56 }
 0x1b0   :  { %v2099_v45 = vpop.f32.mrf.mxu0 }
 0x1b1   :  { %v2330_v38 = vpop.f32.mrf.mxu1  ;;  %v2100_v27 = vadd.f32 %v2099_v45, %v7834_v42  ;;  %v2329_v26 = vadd.f32 %v2328_v60, %v2098_v5 }
 0x1b2   :  { %v2101_v48 = vpop.f32.mrf.mxu0 }
 0x1b3   :  { %v2332_v31 = vpop.f32.mrf.mxu1  ;;  %v8159_v3 = vadd.f32 %v2329_v26, %v2321_v19  ;;  %v2102_v54 = vadd.f32 %v2101_v48, %v7839_v46  ;;  %v2331_v34 = vadd.f32 %v2330_v38, %v2100_v27 }
 0x1b4   :  { %v2105_v36 = vpop.f32.mrf.mxu0 }
 0x1b5   :  { %v2336_v7 = vpop.f32.mrf.mxu1  ;;  %v2106_v2 = vadd.f32 %v2105_v36, %v7842_v49  ;;  %v2333_v16 = vadd.f32 %v2332_v31, %v2102_v54 }
 0x1b6   :  { %v2107_v4 = vpop.f32.mrf.mxu0 }
 0x1b7   :  { %v2338_v37 = vpop.f32.mrf.mxu1  ;;  %v8163_v12 = vadd.f32 %v2333_v16, %v2327_v28  ;;  %v2108_v17 = vadd.f32 %v2107_v4, %v7845_v52  ;;  %v2337_v42 = vadd.f32 %v2336_v7, %v2106_v2 }
 0x1b8   :  { %v2109_v60 = vpop.f32.mrf.mxu0 }
 0x1b9   :  { %v2340_v56 = vpop.f32.mrf.mxu1  ;;  %v2110_v19 = vadd.f32 %v2109_v60, %v7853_v57  ;;  %v2339_v63 = vadd.f32 %v2338_v37, %v2108_v17 }
 0x1ba   :  { %v2111_v5 = vpop.f32.mrf.mxu0 }
 0x1bb   :  { %v2342_v46 = vpop.f32.mrf.mxu1  ;;  %v8167_v45 = vadd.f32 %v2339_v63, %v2331_v34  ;;  %v2112_v38 = vadd.f32 %v2111_v5, %v7858_v61  ;;  %v2341_v49 = vadd.f32 %v2340_v56, %v2110_v19 }
 0x1bc   :  { %v2115_v27 = vpop.f32.mrf.mxu0 }
 0x1bd   :  { %v2346_v26 = vpop.f32.mrf.mxu1  ;;  %v2116_v28 = vadd.f32 %v2115_v27, %v7861_v1  ;;  %v2343_v48 = vadd.f32 %v2342_v46, %v2112_v38 }
 0x1be   :  { %v2117_v31 = vpop.f32.mrf.mxu0 }
 0x1bf   :  { %v2348_v52 = vpop.f32.mrf.mxu1  ;;  %v8171_v54 = vadd.f32 %v2343_v48, %v2337_v42  ;;  %v2118_v36 = vadd.f32 %v2117_v31, %v7864_v6  ;;  %v2347_v57 = vadd.f32 %v2346_v26, %v2116_v28 }
 0x1c0   :  { %v2119_v7 = vpop.f32.mrf.mxu0 }
 0x1c1   :  { %v2350_v2 = vpop.f32.mrf.mxu1  ;;  %v2120_v34 = vadd.f32 %v2119_v7, %v7872_v11  ;;  %v2349_v16 = vadd.f32 %v2348_v52, %v2118_v36 }
 0x1c2   :  { %v2121_v4 = vpop.f32.mrf.mxu0 }
 0x1c3   :  { %v2352_v61 = vpop.f32.mrf.mxu1  ;;  %v8175_v37 = vadd.f32 %v2349_v16, %v2341_v49  ;;  %v2122_v17 = vadd.f32 %v2121_v4, %v7877_v15  ;;  %v2351_v1 = vadd.f32 %v2350_v2, %v2120_v34 }
 0x1c4   :  { %v2125_v60 = vpop.f32.mrf.mxu0 }
 0x1c5   :  { %v2356_v56 = vpop.f32.mrf.mxu1  ;;  %v2126_v42 = vadd.f32 %v2125_v60, %v7880_v18  ;;  %v2353_v19 = vadd.f32 %v2352_v61, %v2122_v17 }
 0x1c6   :  { %v2127_v63 = vpop.f32.mrf.mxu0 }
 0x1c7   :  { %v2358_v6 = vpop.f32.mrf.mxu1  ;;  %v8179_v5 = vadd.f32 %v2353_v19, %v2347_v57  ;;  %v2128_v46 = vadd.f32 %v2127_v63, %v7883_v23  ;;  %v2357_v11 = vadd.f32 %v2356_v56, %v2126_v42 }
 0x1c8   :  { %v2129_v38 = vpop.f32.mrf.mxu0 }
 0x1c9   :  { %v2360_v27 = vpop.f32.mrf.mxu1  ;;  %v2130_v49 = vadd.f32 %v2129_v38, %v7891_v29  ;;  %v2359_v26 = vadd.f32 %v2358_v6, %v2128_v46 }
 0x1ca   :  { %v2131_v28 = vpop.f32.mrf.mxu0 }
 0x1cb   :  { %v2362_v15 = vpop.f32.mrf.mxu1  ;;  %v8183_v48 = vadd.f32 %v2359_v26, %v2351_v1  ;;  %v2132_v31 = vadd.f32 %v2131_v28, %v7896_v35  ;;  %v2361_v18 = vadd.f32 %v2360_v27, %v2130_v49 }
 0x1cc   :  { %v2135_v52 = vpop.f32.mrf.mxu0 }
 0x1cd   :  { %v2366_v36 = vpop.f32.mrf.mxu1  ;;  %v2136_v57 = vadd.f32 %v2135_v52, %v7899_v39  ;;  %v2363_v7 = vadd.f32 %v2362_v15, %v2132_v31 }
 0x1ce   :  { %v2137_v2 = vpop.f32.mrf.mxu0 }
 0x1cf   :  { %v2368_v23 = vpop.f32.mrf.mxu1  ;;  %v8187_v34 = vadd.f32 %v2363_v7, %v2357_v11  ;;  %v2138_v16 = vadd.f32 %v2137_v2, %v7902_v43  ;;  %v2367_v29 = vadd.f32 %v2366_v36, %v2136_v57 }
 0x1d0   :  { %v2139_v4 = vpop.f32.mrf.mxu0 }
 0x1d1   :  { %v2370_v61 = vpop.f32.mrf.mxu1  ;;  %v2140_v17 = vadd.f32 %v2139_v4, %v7910_v50  ;;  %v2369_v1 = vadd.f32 %v2368_v23, %v2138_v16 }
 0x1d2   :  { %v2141_v60 = vpop.f32.mrf.mxu0 }
 0x1d3   :  { %v2372_v35 = vpop.f32.mrf.mxu1  ;;  %v8191_v56 = vadd.f32 %v2369_v1, %v2361_v18  ;;  %v2142_v42 = vadd.f32 %v2141_v60, %v7915_v55  ;;  %v2371_v39 = vadd.f32 %v2370_v61, %v2140_v17 }
 0x1d4   :  { %v2145_v19 = vpop.f32.mrf.mxu0 }
 0x1d5   :  { %v2376_v63 = vpop.f32.mrf.mxu1  ;;  %v2146_v6 = vadd.f32 %v2145_v19, %v7918_v59  ;;  %v2373_v46 = vadd.f32 %v2372_v35, %v2142_v42 }
 0x1d6   :  { %v2147_v11 = vpop.f32.mrf.mxu0 }
 0x1d7   :  { %v2378_v43 = vpop.f32.mrf.mxu1  ;;  %v8195_v38 = vadd.f32 %v2373_v46, %v2367_v29  ;;  %v2148_v27 = vadd.f32 %v2147_v11, %v7921_v0  ;;  %v2377_v50 = vadd.f32 %v2376_v63, %v2146_v6 }
 0x1d8   :  { %v2149_v49 = vpop.f32.mrf.mxu0 }
 0x1d9   :  { %v2380_v26 = vpop.f32.mrf.mxu1  ;;  %v2150_v28 = vadd.f32 %v2149_v49, %v7929_v9  ;;  %v2379_v15 = vadd.f32 %v2378_v43, %v2148_v27 }
 0x1da   :  { %v2151_v31 = vpop.f32.mrf.mxu0 }
 0x1db   :  { %v2382_v55 = vpop.f32.mrf.mxu1  ;;  %v8199_v18 = vadd.f32 %v2379_v15, %v2371_v39  ;;  %v2152_v52 = vadd.f32 %v2151_v31, %v7934_v14  ;;  %v2381_v59 = vadd.f32 %v2380_v26, %v2150_v28 }
 0x1dc   :  { %v2155_v36 = vpop.f32.mrf.mxu0 }
 0x1dd   :  { %v2386_v57 = vpop.f32.mrf.mxu1  ;;  %v2156_v7 = vadd.f32 %v2155_v36, %v7937_v21  ;;  %v2383_v2 = vadd.f32 %v2382_v55, %v2152_v52 }
 0x1de   :  { %v2157_v23 = vpop.f32.mrf.mxu0 }
 0x1df   :  { %v2388_v0 = vpop.f32.mrf.mxu1  ;;  %v8203_v16 = vadd.f32 %v2383_v2, %v2377_v50  ;;  %v2158_v29 = vadd.f32 %v2157_v23, %v7940_v25  ;;  %v2387_v9 = vadd.f32 %v2386_v57, %v2156_v7 }
 0x1e0   :  { %v2159_v4 = vpop.f32.mrf.mxu0 }
 0x1e1   :  { %v2390_v61 = vpop.f32.mrf.mxu1  ;;  %v2160_v17 = vadd.f32 %v2159_v4, %v7948_v33  ;;  %v2389_v1 = vadd.f32 %v2388_v0, %v2158_v29 }
 0x1e2   :  { %v2161_v60 = vpop.f32.mrf.mxu0 }
 0x1e3   :  { %v2392_v14 = vpop.f32.mrf.mxu1  ;;  %v8207_v35 = vadd.f32 %v2389_v1, %v2381_v59  ;;  %v2162_v42 = vadd.f32 %v2161_v60, %v7953_v41  ;;  %v2391_v21 = vadd.f32 %v2390_v61, %v2160_v17 }
 0x1e4   :  { %v2165_v39 = vpop.f32.mrf.mxu0 }
 0x1e5   :  { %v2396_v19 = vpop.f32.mrf.mxu1  ;;  %v2166_v63 = vadd.f32 %v2165_v39, %v7956_v47  ;;  %v2393_v6 = vadd.f32 %v2392_v14, %v2162_v42 }
 0x1e6   :  { %v2167_v46 = vpop.f32.mrf.mxu0 }
 0x1e7   :  { %v2398_v25 = vpop.f32.mrf.mxu1  ;;  %v8211_v11 = vadd.f32 %v2393_v6, %v2387_v9  ;;  %v2168_v43 = vadd.f32 %v2167_v46, %v7959_v53  ;;  %v2397_v33 = vadd.f32 %v2396_v19, %v2166_v63 }
 0x1e8   :  { %v2169_v27 = vpop.f32.mrf.mxu0 }
 0x1e9   :  { %v2400_v50 = vpop.f32.mrf.mxu1  ;;  %v2170_v49 = vadd.f32 %v2169_v27, %v7967_v62  ;;  %v2399_v26 = vadd.f32 %v2398_v25, %v2168_v43 }
 0x1ea   :  { %v2171_v28 = vpop.f32.mrf.mxu0 }
 0x1eb   :  { %v2402_v41 = vpop.f32.mrf.mxu1  ;;  %v8215_v15 = vadd.f32 %v2399_v26, %v2391_v21  ;;  %v2172_v31 = vadd.f32 %v2171_v28, %v7972_v8  ;;  %v2401_v47 = vadd.f32 %v2400_v50, %v2170_v49 }
 0x1ec   :  { %v2175_v55 = vpop.f32.mrf.mxu0 }
 0x1ed   :  { %v2406_v52 = vpop.f32.mrf.mxu1  ;;  %v2176_v59 = vadd.f32 %v2175_v55, %v7975_v13  ;;  %v2403_v36 = vadd.f32 %v2402_v41, %v2172_v31 }
 0x1ee   :  { %v2177_v57 = vpop.f32.mrf.mxu0 }
 0x1ef   :  { %v2408_v53 = vpop.f32.mrf.mxu1  ;;  %v8219_v7 = vadd.f32 %v2403_v36, %v2397_v33  ;;  %v2178_v2 = vadd.f32 %v2177_v57, %v7978_v22  ;;  %v2407_v62 = vadd.f32 %v2406_v52, %v2176_v59  ;;  %v8916_v59 = vld [vmem:[#allocation7_spill] sm:$0xff] }
 0x1f0   :  { %v2179_v23 = vpop.f32.mrf.mxu0 }
 0x1f1   :  { %v2410_v0 = vpop.f32.mrf.mxu1  ;;  %v2180_v29 = vadd.f32 %v2179_v23, %v7986_v32  ;;  %v2409_v9 = vadd.f32 %v2408_v53, %v2178_v2 }
 0x1f2   :  { %v2181_v4 = vpop.f32.mrf.mxu0 }
 0x1f3   :  { %v2412_v8 = vpop.f32.mrf.mxu1  ;;  %v8223_v61 = vadd.f32 %v2409_v9, %v2401_v47  ;;  %v2182_v17 = vadd.f32 %v2181_v4, %v7991_v44  ;;  %v2411_v13 = vadd.f32 %v2410_v0, %v2180_v29  ;;  %v8918_v9 = vld [vmem:[#allocation9_spill] sm:$0xff] }
 0x1f4   :  { %v2185_v1 = vpop.f32.mrf.mxu0 }
 0x1f5   :  { %v2416_v60 = vpop.f32.mrf.mxu1  ;;  %v2186_v14 = vadd.f32 %v2185_v1, %v7994_v51  ;;  %v2413_v42 = vadd.f32 %v2412_v8, %v2182_v17  ;;  %v8919_v1 = vld [vmem:[#allocation10_spill] sm:$0xff] }
 0x1f6   :  { %v2187_v21 = vpop.f32.mrf.mxu0 }
 0x1f7   :  { %v2418_v22 = vpop.f32.mrf.mxu1  ;;  %v8227_v39 = vadd.f32 %v2413_v42, %v2407_v62  ;;  %v2188_v19 = vadd.f32 %v2187_v21, %v7997_v58  ;;  %v2417_v32 = vadd.f32 %v2416_v60, %v2186_v14  ;;  %v8917_v62 = vld [vmem:[#allocation8_spill] sm:$0xff] }
 0x1f8   :  { %v2189_v63 = vpop.f32.mrf.mxu0 }
 0x1f9   :  { %v2420_v6 = vpop.f32.mrf.mxu1  ;;  %v2190_v46 = vadd.f32 %v2189_v63, %v8005_v10  ;;  %v2419_v25 = vadd.f32 %v2418_v22, %v2188_v19  ;;  %v8920_v22 = vld [vmem:[#allocation12_spill] sm:$0xff]  ;;  %v8921_v19 = vld [vmem:[#allocation13_spill] sm:$0xff]  ;;  %v8922_v63 = vld [vmem:[#allocation11_spill] sm:$0xff] }
 0x1fa   :  { %v2191_v43 = vpop.f32.mrf.mxu0 }
 0x1fb   :  { %v2422_v44 = vpop.f32.mrf.mxu1  ;;  %v8231_v33 = vadd.f32 %v2419_v25, %v2411_v13  ;;  %v2192_v27 = vadd.f32 %v2191_v43, %v8010_v24  ;;  %v2421_v51 = vadd.f32 %v2420_v6, %v2190_v46 }
 0x1fc   :  { %v2195_v50 = vpop.f32.mrf.mxu0 }
 0x1fd   :  { %v2426_v49 = vpop.f32.mrf.mxu1  ;;  %v2196_v26 = vadd.f32 %v2195_v50, %v8013_v30  ;;  %v2423_v28 = vadd.f32 %v2422_v44, %v2192_v27 }
 0x1fe   :  { %v2197_v41 = vpop.f32.mrf.mxu0 }
 0x1ff   :  { %v2428_v58 = vpop.f32.mrf.mxu1  ;;  %v8235_v31 = vadd.f32 %v2423_v28, %v2417_v32  ;;  %v2198_v47 = vadd.f32 %v2197_v41, %v8016_v40  ;;  %v2427_v10 = vadd.f32 %v2426_v49, %v2196_v26  ;;  %v1981_v32 = vadd.f32 %v8921_v19, %v8920_v22  ;;  %v8923_v26 = vld [vmem:[#allocation14_spill] sm:$0xff] }
 0x200   :  { %v2199_v55 = vpop.f32.mrf.mxu0 }
 0x201   :  { %v2430_v52 = vpop.f32.mrf.mxu1  ;;  %v2200_v36 = vadd.f32 %v2199_v55, %v8916_v59  ;;  %v2429_v57 = vadd.f32 %v2428_v58, %v2198_v47  ;;  %v8924_v55 = vld [vmem:[#allocation15_spill] sm:$0xff] }
 0x202   :  { %v2201_v53 = vpop.f32.mrf.mxu0 }
 0x203   :  { %v2432_v24 = vpop.f32.mrf.mxu1  ;;  %v8239_v2 = vadd.f32 %v2429_v57, %v2421_v51  ;;  %v2202_v23 = vadd.f32 %v2201_v53, %v8917_v62  ;;  %v2431_v30 = vadd.f32 %v2430_v52, %v2200_v36  ;;  %v8925_v53 = vld [vmem:[#allocation17_spill] sm:$0xff] }
 0x204   :  { %v2205_v0 = vpop.f32.mrf.mxu0 }
 0x205   :  { %v2436_v29 = vpop.f32.mrf.mxu1  ;;  %v2206_v4 = vadd.f32 %v2205_v0, %v8918_v9  ;;  %v2433_v8 = vadd.f32 %v2432_v24, %v2202_v23  ;;  %v8926_v24 = vld [vmem:[#allocation18_spill] sm:$0xff]  ;;  %v8927_v23 = vld [vmem:[#allocation16_spill] sm:$0xff] }
 0x206   :  { %v2207_v17 = vpop.f32.mrf.mxu0  ;;  %v1991_v62 = vadd.f32 %v8926_v24, %v8925_v53 }
 0x207   :  { %v2438_v40 = vpop.f32.mrf.mxu1  ;;  %v8243_v13 = vadd.f32 %v2433_v8, %v2427_v10  ;;  %v2208_v60 = vadd.f32 %v2207_v17, %v8919_v1  ;;  %v2437_v14 = vadd.f32 %v2436_v29, %v2206_v4 }
 0x208   :  { %v2209_v42 = vpop.f32.mrf.mxu0 }
 0x209   :  { %v2440_v21 = vpop.f32.mrf.mxu1  ;;  %v2210_v6 = vadd.f32 %v2209_v42, %v8922_v63  ;;  %v2439_v46 = vadd.f32 %v2438_v40, %v2208_v60  ;;  %v8928_v60 = vld [vmem:[#allocation19_spill] sm:$0xff] }
 0x20a   :  { %v2211_v25 = vpop.f32.mrf.mxu0 }
 0x20b   :  { %v2442_v43 = vpop.f32.mrf.mxu1  ;;  %v8249_v44 = vadd.f32 %v2439_v46, %v2431_v30  ;;  %v2212_v27 = vadd.f32 %v2211_v25, %v1981_v32  ;;  %v2441_v51 = vadd.f32 %v2440_v21, %v2210_v6  ;;  %v8929_v32 = vld [vmem:[#allocation20_spill] sm:$0xff] }
 0x20c   :  { %v2215_v50 = vpop.f32.mrf.mxu0 }
 0x20d   :  { %v2446_v49 = vpop.f32.mrf.mxu1  ;;  %v2216_v28 = vadd.f32 %v2215_v50, %v8923_v26  ;;  %v2443_v41 = vadd.f32 %v2442_v43, %v2212_v27  ;;  %v8930_v43 = vld [vmem:[#allocation22_spill] sm:$0xff]  ;;  %v8931_v27 = vld [vmem:[#allocation23_spill] sm:$0xff]  ;;  %v8932_v50 = vld [vmem:[#allocation21_spill] sm:$0xff] }
 0x20e   :  { %v2217_v58 = vpop.f32.mrf.mxu0 }
 0x20f   :  { %v2448_v47 = vpop.f32.mrf.mxu1  ;;  %v8252_v10 = vadd.f32 %v2443_v41, %v2437_v14  ;;  %v2218_v52 = vadd.f32 %v2217_v58, %v8924_v55  ;;  %v2447_v59 = vadd.f32 %v2446_v49, %v2216_v28 }
 0x210   :  { %v2219_v36 = vpop.f32.mrf.mxu0 }
 0x211   :  { %v2450_v57 = vpop.f32.mrf.mxu1  ;;  %v2220_v30 = vadd.f32 %v2219_v36, %v8927_v23  ;;  %v2449_v0 = vadd.f32 %v2448_v47, %v2218_v52  ;;  %v8933_v36 = vld [vmem:[#allocation24_spill] sm:$0xff] }
 0x212   :  { %v2221_v29 = vpop.f32.mrf.mxu0 }
 0x213   :  { %v2452_v9 = vpop.f32.mrf.mxu1  ;;  %v8258_v4 = vadd.f32 %v2449_v0, %v2441_v51  ;;  %v2222_v8 = vadd.f32 %v2221_v29, %v1991_v62  ;;  %v2451_v17 = vadd.f32 %v2450_v57, %v2220_v30  ;;  %v2001_v51 = vadd.f32 %v8931_v27, %v8930_v43  ;;  %v8934_v30 = vld [vmem:[#allocation25_spill] sm:$0xff] }
 0x214   :  { %v2225_v40 = vpop.f32.mrf.mxu0  ;;  %v8938_v43 = vld [vmem:[#allocation29_spill] sm:$0xff] }
 0x215   :  { %v2456_v1 = vpop.f32.mrf.mxu1  ;;  %v2226_v14 = vadd.f32 %v2225_v40, %v8928_v60  ;;  %v2453_v42 = vadd.f32 %v2452_v9, %v2222_v8  ;;  %v8935_v40 = vld [vmem:[#allocation27_spill] sm:$0xff]  ;;  %v8937_v60 = vld [vmem:[#allocation26_spill] sm:$0xff] }
 0x216   :  { %v2227_v21 = vpop.f32.mrf.mxu0 }
 0x217   :  { %v2458_v22 = vpop.f32.mrf.mxu1  ;;  %v8261_v19 = vadd.f32 %v2453_v42, %v2447_v59  ;;  %v2228_v63 = vadd.f32 %v2227_v21, %v8929_v32  ;;  %v2457_v6 = vadd.f32 %v2456_v1, %v2226_v14  ;;  %v8936_v1 = vld [vmem:[#allocation28_spill] sm:$0xff] }
 0x218   :  { %v2229_v46 = vpop.f32.mrf.mxu0 }
 0x219   :  { %v2460_v25 = vpop.f32.mrf.mxu1  ;;  %v2230_v49 = vadd.f32 %v2229_v46, %v8932_v50  ;;  %v2459_v26 = vadd.f32 %v2458_v22, %v2228_v63 }
 0x21a   :  { %v2231_v28 = vpop.f32.mrf.mxu0 }
 0x21b   :  { %v2462_v41 = vpop.f32.mrf.mxu1  ;;  %v8267_v58 = vadd.f32 %v2459_v26, %v2451_v17  ;;  %v2232_v47 = vadd.f32 %v2231_v28, %v2001_v51  ;;  %v2461_v55 = vadd.f32 %v2460_v25, %v2230_v49  ;;  %v2011_v17 = vadd.f32 %v8936_v1, %v8935_v40  ;;  %v8939_v28 = vld [vmem:[#allocation30_spill] sm:$0xff] }
 0x21c   :  { %v2235_v52 = vpop.f32.mrf.mxu0 }
 0x21d   :  { %v2466_v59 = vpop.f32.mrf.mxu1  ;;  %v2236_v57 = vadd.f32 %v2235_v52, %v8933_v36  ;;  %v2463_v53 = vadd.f32 %v2462_v41, %v2232_v47  ;;  %v8940_v36 = vld [vmem:[#allocation32_spill] sm:$0xff] }
 0x21e   :  { %v2237_v24 = vpop.f32.mrf.mxu0 }
 0x21f   :  { %v2468_v62 = vpop.f32.mrf.mxu1  ;;  %v8270_v23 = vadd.f32 %v2463_v53, %v2457_v6  ;;  %v2238_v0 = vadd.f32 %v2237_v24, %v8934_v30  ;;  %v2467_v29 = vadd.f32 %v2466_v59, %v2236_v57  ;;  %v8941_v57 = vld [vmem:[#allocation33_spill] sm:$0xff]  ;;  %v8942_v53 = vld [vmem:[#allocation31_spill] sm:$0xff] }
 0x220   :  { %v2239_v9 = vpop.f32.mrf.mxu0 }
 0x221   :  { %v2470_v8 = vpop.f32.mrf.mxu1  ;;  %v2240_v14 = vadd.f32 %v2239_v9, %v8937_v60  ;;  %v2469_v42 = vadd.f32 %v2468_v62, %v2238_v0 }
 0x222   :  { %v2241_v21 = vpop.f32.mrf.mxu0 }
 0x223   :  { %v2472_v22 = vpop.f32.mrf.mxu1  ;;  %v8276_v32 = vadd.f32 %v2469_v42, %v2461_v55  ;;  %v2242_v63 = vadd.f32 %v2241_v21, %v2011_v17  ;;  %v2471_v46 = vadd.f32 %v2470_v8, %v2240_v14  ;;  %v2021_v55 = vadd.f32 %v8941_v57, %v8940_v36  ;;  %v8943_v17 = vld [vmem:[#allocation34_spill] sm:$0xff] }
 0x224   :  { %v2245_v25 = vpop.f32.mrf.mxu0 }
 0x225   :  { %v2476_v6 = vpop.f32.mrf.mxu1  ;;  %v2246_v27 = vadd.f32 %v2245_v25, %v8938_v43  ;;  %v2473_v51 = vadd.f32 %v2472_v22, %v2242_v63  ;;  %v8944_v63 = vld [vmem:[#allocation35_spill] sm:$0xff] }
 0x226   :  { %v2247_v50 = vpop.f32.mrf.mxu0 }
 0x227   :  { %v2478_v49 = vpop.f32.mrf.mxu1  ;;  %v8279_v26 = vadd.f32 %v2473_v51, %v2467_v29  ;;  %v2248_v41 = vadd.f32 %v2247_v50, %v8939_v28  ;;  %v2477_v47 = vadd.f32 %v2476_v6, %v2246_v27  ;;  %v8945_v51 = vld [vmem:[#allocation37_spill] sm:$0xff]  ;;  %v8946_v50 = vld [vmem:[#allocation38_spill] sm:$0xff] }
 0x228   :  { %v2249_v52 = vpop.f32.mrf.mxu0 }
 0x229   :  { %v2480_v59 = vpop.f32.mrf.mxu1  ;;  %v2250_v24 = vadd.f32 %v2249_v52, %v8942_v53  ;;  %v2479_v62 = vadd.f32 %v2478_v49, %v2248_v41  ;;  %v8947_v49 = vld [vmem:[#allocation36_spill] sm:$0xff] }
 0x22a   :  { %v2251_v30 = vpop.f32.mrf.mxu0 }
 0x22b   :  { %v2482_v0 = vpop.f32.mrf.mxu1  ;;  %v8285_v9 = vadd.f32 %v2479_v62, %v2471_v46  ;;  %v2252_v8 = vadd.f32 %v2251_v30, %v2021_v55  ;;  %v2481_v40 = vadd.f32 %v2480_v59, %v2250_v24  ;;  %v2031_v46 = vadd.f32 %v8946_v50, %v8945_v51  ;;  %v8948_v24 = vld [vmem:[#allocation39_spill] sm:$0xff] }
 0x22c   :  { %v2255_v1 = vpop.f32.mrf.mxu0 }
 0x22d   :  { %v2486_v29 = vpop.f32.mrf.mxu1  ;;  %v2256_v60 = vadd.f32 %v2255_v1, %v8943_v17  ;;  %v2483_v14 = vadd.f32 %v2482_v0, %v2252_v8 }
 0x22e   :  { %v2257_v42 = vpop.f32.mrf.mxu0 }
 0x22f   :  { %v2488_v21 = vpop.f32.mrf.mxu1  ;;  %v8288_v22 = vadd.f32 %v2483_v14, %v2477_v47  ;;  %v2258_v25 = vadd.f32 %v2257_v42, %v8944_v63  ;;  %v2487_v6 = vadd.f32 %v2486_v29, %v2256_v60  ;;  %v8949_v29 = vld [vmem:[#allocation40_spill] sm:$0xff]  ;;  %v8951_v63 = vld [vmem:[#allocation43_spill] sm:$0xff] }
 0x230   :  { %v2259_v43 = vpop.f32.mrf.mxu0 }
 0x231   :  { %v2490_v27 = vpop.f32.mrf.mxu1  ;;  %v2260_v28 = vadd.f32 %v2259_v43, %v8947_v49  ;;  %v2489_v41 = vadd.f32 %v2488_v21, %v2258_v25  ;;  %v8950_v21 = vld [vmem:[#allocation42_spill] sm:$0xff]  ;;  %v8952_v25 = vld [vmem:[#allocation41_spill] sm:$0xff] }
 0x232   :  { %v2261_v52 = vpop.f32.mrf.mxu0 }
 0x233   :  { %v2492_v59 = vpop.f32.mrf.mxu1  ;;  %v8294_v36 = vadd.f32 %v2489_v41, %v2481_v40  ;;  %v2262_v57 = vadd.f32 %v2261_v52, %v2031_v46  ;;  %v2491_v55 = vadd.f32 %v2490_v27, %v2260_v28  ;;  %v2041_v40 = vadd.f32 %v8951_v63, %v8950_v21  ;;  %v8953_v52 = vld [vmem:[#allocation44_spill] sm:$0xff] }
 0x234   :  { %v2265_v53 = vpop.f32.mrf.mxu0 }
 0x235   :  { %v2496_v47 = vpop.f32.mrf.mxu1  ;;  %v2266_v62 = vadd.f32 %v2265_v53, %v8948_v24  ;;  %v2493_v30 = vadd.f32 %v2492_v59, %v2262_v57 }
 0x236   :  { %v2267_v0 = vpop.f32.mrf.mxu0 }
 0x237   :  { %v2498_v8 = vpop.f32.mrf.mxu1  ;;  %v8297_v1 = vadd.f32 %v2493_v30, %v2487_v6  ;;  %v2268_v17 = vadd.f32 %v2267_v0, %v8949_v29  ;;  %v2497_v60 = vadd.f32 %v2496_v47, %v2266_v62  ;;  %v8954_v62 = vld [vmem:[#allocation45_spill] sm:$0xff] }
 0x238   :  { %v2269_v14 = vpop.f32.mrf.mxu0 }
 0x239   :  { %v2500_v42 = vpop.f32.mrf.mxu1  ;;  %v2270_v43 = vadd.f32 %v2269_v14, %v8952_v25  ;;  %v2499_v27 = vadd.f32 %v2498_v8, %v2268_v17  ;;  %v8955_v17 = vld [vmem:[#allocation46_spill] sm:$0xff]  ;;  %v8956_v14 = vld [vmem:[#allocation47_spill] sm:$0xff] }
 0x23a   :  { %v2271_v51 = vpop.f32.mrf.mxu0 }
 0x23b   :  { %v2502_v50 = vpop.f32.mrf.mxu1  ;;  %v8303_v46 = vadd.f32 %v2499_v27, %v2491_v55  ;;  %v2272_v49 = vadd.f32 %v2271_v51, %v2041_v40  ;;  %v2501_v28 = vadd.f32 %v2500_v42, %v2270_v43  ;;  %v8312_v55 = vld [vmem:[%s8861_s2] ss:$0 sm:$0xff]  ;;  %v2050_v42 = vadd.f32 %v8956_v14, %v8955_v17 }
 0x23c   :  { %v2275_v41 = vpop.f32.mrf.mxu0  ;;  %v2560_v43 = vadd.f32 %v8312_v55, %v8155_v20 }
 0x23d   :  { %v2506_v6 = vpop.f32.mrf.mxu1  ;;  %v2276_v59 = vadd.f32 %v2275_v41, %v8953_v52  ;;  %v2503_v57 = vadd.f32 %v2502_v50, %v2272_v49 }
 0x23e   :  { %v2277_v53 = vpop.f32.mrf.mxu0 }
 0x23f   :  { %v2508_v47 = vpop.f32.mrf.mxu1  ;;  %v8306_v24 = vadd.f32 %v2503_v57, %v2497_v60  ;;  %v2278_v30 = vadd.f32 %v2277_v53, %v8954_v62  ;;  %v2507_v0 = vadd.f32 %v2506_v6, %v2276_v59 }
 0x240   :  { %v2279_v29 = vpop.f32.mrf.mxu0 }
 0x241   :  { %v2510_v8 = vpop.f32.mrf.mxu1  ;;  %v2509_v21 = vadd.f32 %v2508_v47, %v2278_v30 }
 0x242   :  { %v2280_v63 = vpop.f32.mrf.mxu0 }
 0x243   :  { %v2511_v40 = vpop.f32.mrf.mxu1  ;;  %v8316_v25 = vadd.f32 %v2509_v21, %v2501_v28  ;;  %v2281_v60 = vadd.f32 %v2280_v63, %v2050_v42  ;;  %v8330_v63 = vld [vmem:[%s8862_s3 + $0x8] sm:$0xff]  }
 0x244   :  { %v2693_v27 = vpop.f32.mrf.mxu0 }
 0x245   :  { %v2512_v51 = vadd.f32 %v2511_v40, %v2281_v60  ;;  %v2699_v50 = vadd.f32 %v2693_v27, %v2560_v43  ;;  %v8957_v40 = vmov 0.0   ;;  %v8339_v60 = vld [vmem:[%s8862_s3] sm:$0xff]   ;;  %v2561_v43 = vadd.f32 %v8312_v55, %v8159_v3 }
 0x246   :  { %v6093_v49 = vpop.f32.mrf.mxu0 }
 0x247   :  { %v8320_v41 = vadd.f32 %v2512_v51, %v2507_v0  ;;  %6768 = vtanh.f32 %v2699_v50  ;;  %v5890_v57 = vmul.f32 -1.442695, %v2699_v50 }
 0x248   :  { %v2696_v6 = vpop.f32.mrf.mxu0 }
 0x249   :  { %6770 = vpow2.f32 %v5890_v57 }
 0x24a   :  { %v6094_v52 = vpop.f32.mrf.mxu0 }
 0x254   :  { %v6769_v59 = vpop.eup %6768 }
 0x255   :  { %2709 = vrot.lane.b32.xlu0 %v6769_v59, %s7121_s10 }
 0x256   :  { %v6771_v28 = vpop.eup %6770 }
 0x257   :  { %v2703_v53 = vadd.f32 1.0, %v6771_v28 }
 0x259   :  { %6772 = vrcp.f32 %v2703_v53 }
 0x266   :  { %v6773_v47 = vpop.eup %6772 }
 0x267   :  { %v2707_v30 = vmul.f32 0.0, %v6773_v47 }
 0x2c7   :  { %v2710_v20 = vpop.permute.xlu0 %2709 }
 0x2c8   :  { %v2712_v62 = vmul.f32 %v6773_v47, %v2710_v20 }
 0x2ca   :  { %2714 = vrot.lane.b32.xlu0 %v2712_v62, %s7122_s11 }
 0x33c   :  { %v2715_v0 = vpop.permute.xlu0 %2714 }
 0x33d   :  { %v2717_v29 = vadd.f32 %v2715_v0, %v2707_v30 }
 0x33f   :  { %6774 = vtanh.f32 %v2717_v29 }
 0x34c   :  { %v6775_v8 = vpop.eup %6774 }
 0x34d   :  { %2720 = vrot.lane.b32.xlu1 %v6775_v8, %s7121_s10 }
 0x3bf   :  { %v2721_v17 = vpop.permute.xlu1 %2720 }
 0x3c0   :  { %v2723_v14 = vmul.f32 %v6773_v47, %v2721_v17 }
 0x3c2   :  { %v2726_v42 = vpack.c.bf16 %v2723_v14, %v2723_v14 }
 0x3c4   :  { %2728 = vrot.lane.b32.xlu1 %v2726_v42, %s7122_s11 }
 0x436   :  { %v2729_v21 = vpop.permute.xlu1 %2728 }
 0x437   :  { %6100 = vmatmul.mubr.msk.bf16.vlgmr.msra.gmra.mxu1 %vm2655_vm3, %v2729_v21 }
 0x438   :  { %6112 = vmatpush3.bf16.msra.mxu1 %v8330_v63  ;;  %6115 = vmatprep.mubr.msk.bf16.mxu1 %vm7120_vm2, %v8957_v40 }
 0x439   :  { %6113 = vmatprep.subr.bf16.mxu1 %v8957_v40 }
 0x43c   :  { %6114 = vmatpush3.bf16.msra.mxu1 %v8339_v60 }
 0x43d   :  { %6127 = vmatprep.subr.bf16.mxu1 %v8957_v40 }
 0x4f7   :  { %v2767_v27 = vpop.f32.mrf.mxu1 }
 0x4f8   :  { %v2773_v51 = vadd.f32 %v2767_v27, %v2561_v43 }
 0x4f9   :  { %v6101_v50 = vpop.f32.mrf.mxu1 }
 0x4fa   :  { %6776 = vtanh.f32 %v2773_v51  ;;  %v5892_v59 = vmul.f32 -1.442695, %v2773_v51 }
 0x4fb   :  { %v2770_v49 = vpop.f32.mrf.mxu1 }
 0x4fc   :  { %6778 = vpow2.f32 %v5892_v59 }
 0x4fd   :  { %v6102_v6 = vpop.f32.mrf.mxu1 }
 0x507   :  { %v6777_v52 = vpop.eup %6776 }
 0x508   :  { %2783 = vrot.lane.b32.xlu0 %v6777_v52, %s7121_s10 }
 0x509   :  { %v6779_v57 = vpop.eup %6778 }
 0x50a   :  { %v2777_v28 = vadd.f32 1.0, %v6779_v57 }
 0x50c   :  { %6780 = vrcp.f32 %v2777_v28 }
 0x519   :  { %v6781_v53 = vpop.eup %6780 }
 0x51a   :  { %v2781_v3 = vmul.f32 %v6781_v53, %v2717_v29  ;;  %v2562_v29 = vadd.f32 %v8312_v55, %v8163_v12 }
 0x57a   :  { %v2784_v47 = vpop.permute.xlu0 %2783 }
 0x57b   :  { %v2786_v20 = vmul.f32 %v6781_v53, %v2784_v47 }
 0x57d   :  { %2788 = vrot.lane.b32.xlu1 %v2786_v20, %s7122_s11 }
 0x5ef   :  { %v2789_v62 = vpop.permute.xlu1 %2788 }
 0x5f0   :  { %v2791_v30 = vadd.f32 %v2789_v62, %v2781_v3 }
 0x5f2   :  { %6782 = vtanh.f32 %v2791_v30 }
 0x5ff   :  { %v6783_v0 = vpop.eup %6782 }
 0x600   :  { %2794 = vrot.lane.b32.xlu0 %v6783_v0, %s7121_s10 }
 0x672   :  { %v2795_v8 = vpop.permute.xlu0 %2794 }
 0x673   :  { %v2797_v17 = vmul.f32 %v6781_v53, %v2795_v8 }
 0x675   :  { %v2800_v14 = vpack.c.bf16 %v2797_v17, %v2797_v17 }
 0x677   :  { %2802 = vrot.lane.b32.xlu1 %v2800_v14, %s7122_s11 }
 0x6e9   :  { %v2803_v42 = vpop.permute.xlu1 %2802 }
 0x6ea   :  { %6108 = vmatmul.mubr.msk.bf16.vlgmr.msra.gmra.mxu0 %vm2655_vm3, %v2803_v42 }
 0x6eb   :  { %6120 = vmatpush3.bf16.msra.mxu0 %v8330_v63  ;;  %6123 = vmatprep.mubr.msk.bf16.mxu0 %vm7120_vm2, %v8957_v40 }
 0x6ec   :  { %6121 = vmatprep.subr.bf16.mxu0 %v8957_v40 }
 0x6ef   :  { %6122 = vmatpush3.bf16.msra.mxu0 %v8339_v60 }
 0x6f0   :  { %6135 = vmatprep.subr.bf16.mxu0 %v8957_v40 }
 0x7aa   :  { %v2841_v21 = vpop.f32.mrf.mxu0 }
 0x7ab   :  { %v2847_v43 = vadd.f32 %v2841_v21, %v2562_v29 }
 0x7ac   :  { %v6109_v27 = vpop.f32.mrf.mxu0 }
 0x7ad   :  { %6784 = vtanh.f32 %v2847_v43  ;;  %v5894_v6 = vmul.f32 -1.442695, %v2847_v43 }
 0x7ae   :  { %v2844_v51 = vpop.f32.mrf.mxu0 }
 0x7af   :  { %6786 = vpow2.f32 %v5894_v6 }
 0x7b0   :  { %v6110_v50 = vpop.f32.mrf.mxu0 }
 0x7ba   :  { %v6785_v49 = vpop.eup %6784 }
 0x7bb   :  { %2857 = vrot.lane.b32.xlu0 %v6785_v49, %s7121_s10 }
 0x7bc   :  { %v6787_v52 = vpop.eup %6786 }
 0x7bd   :  { %v2851_v59 = vadd.f32 1.0, %v6787_v52 }
 0x7bf   :  { %6788 = vrcp.f32 %v2851_v59 }
 0x7cc   :  { %v6789_v57 = vpop.eup %6788 }
 0x7cd   :  { %v2855_v12 = vmul.f32 %v6789_v57, %v2791_v30  ;;  %v2563_v30 = vadd.f32 %v8312_v55, %v8167_v45 }
 0x82d   :  { %v2858_v28 = vpop.permute.xlu0 %2857 }
 0x82e   :  { %v2860_v53 = vmul.f32 %v6789_v57, %v2858_v28 }
 0x830   :  { %2862 = vrot.lane.b32.xlu1 %v2860_v53, %s7122_s11 }
 0x8a2   :  { %v2863_v47 = vpop.permute.xlu1 %2862 }
 0x8a3   :  { %v2865_v20 = vadd.f32 %v2863_v47, %v2855_v12 }
 0x8a5   :  { %6790 = vtanh.f32 %v2865_v20 }
 0x8b2   :  { %v6791_v3 = vpop.eup %6790 }
 0x8b3   :  { %2868 = vrot.lane.b32.xlu0 %v6791_v3, %s7121_s10 }
 0x925   :  { %v2869_v62 = vpop.permute.xlu0 %2868 }
 0x926   :  { %v2871_v0 = vmul.f32 %v6789_v57, %v2869_v62 }
 0x928   :  { %v2874_v8 = vpack.c.bf16 %v2871_v0, %v2871_v0 }
 0x92a   :  { %2876 = vrot.lane.b32.xlu1 %v2874_v8, %s7122_s11 }
 0x99c   :  { %v2877_v17 = vpop.permute.xlu1 %2876 }
 0x99d   :  { %6116 = vmatmul.mubr.msk.bf16.vlgmr.msra.gmra.mxu1 %vm2655_vm3, %v2877_v17 }
 0x99e   :  { %6128 = vmatpush3.bf16.msra.mxu1 %v8330_v63  ;;  %6131 = vmatprep.mubr.msk.bf16.mxu1 %vm7120_vm2, %v8957_v40 }
 0x99f   :  { %6129 = vmatprep.subr.bf16.mxu1 %v8957_v40 }
 0x9a2   :  { %6130 = vmatpush3.bf16.msra.mxu1 %v8339_v60 }
 0x9a3   :  { %6143 = vmatprep.subr.bf16.mxu1 %v8957_v40 }
 0xa5d   :  { %v2915_v14 = vpop.f32.mrf.mxu1 }
 0xa5e   :  { %v2921_v42 = vadd.f32 %v2915_v14, %v2563_v30 }
 0xa5f   :  { %v6117_v29 = vpop.f32.mrf.mxu1 }
 0xa60   :  { %6792 = vtanh.f32 %v2921_v42  ;;  %v5896_v51 = vmul.f32 -1.442695, %v2921_v42 }
 0xa61   :  { %v2918_v21 = vpop.f32.mrf.mxu1 }
 0xa62   :  { %6794 = vpow2.f32 %v5896_v51 }
 0xa63   :  { %v6118_v43 = vpop.f32.mrf.mxu1 }
 0xa6d   :  { %v6793_v27 = vpop.eup %6792 }
 0xa6e   :  { %2931 = vrot.lane.b32.xlu0 %v6793_v27, %s7121_s10 }
 0xa6f   :  { %v6795_v50 = vpop.eup %6794 }
 0xa70   :  { %v2925_v49 = vadd.f32 1.0, %v6795_v50 }
 0xa72   :  { %6796 = vrcp.f32 %v2925_v49 }
 0xa7f   :  { %v6797_v6 = vpop.eup %6796 }
 0xa80   :  { %v2929_v45 = vmul.f32 %v6797_v6, %v2865_v20  ;;  %v2564_v20 = vadd.f32 %v8312_v55, %v8171_v54 }
 0xae0   :  { %v2932_v52 = vpop.permute.xlu0 %2931 }
 0xae1   :  { %v2934_v59 = vmul.f32 %v6797_v6, %v2932_v52 }
 0xae3   :  { %2936 = vrot.lane.b32.xlu1 %v2934_v59, %s7122_s11 }
 0xb55   :  { %v2937_v57 = vpop.permute.xlu1 %2936 }
 0xb56   :  { %v2939_v28 = vadd.f32 %v2937_v57, %v2929_v45 }
 0xb58   :  { %6798 = vtanh.f32 %v2939_v28 }
 0xb65   :  { %v6799_v53 = vpop.eup %6798 }
 0xb66   :  { %2942 = vrot.lane.b32.xlu0 %v6799_v53, %s7121_s10 }
 0xbd8   :  { %v2943_v12 = vpop.permute.xlu0 %2942 }
 0xbd9   :  { %v2945_v47 = vmul.f32 %v6797_v6, %v2943_v12 }
 0xbdb   :  { %v2948_v3 = vpack.c.bf16 %v2945_v47, %v2945_v47 }
 0xbdd   :  { %2950 = vrot.lane.b32.xlu1 %v2948_v3, %s7122_s11 }
 0xc4f   :  { %v2951_v62 = vpop.permute.xlu1 %2950 }
 0xc50   :  { %6124 = vmatmul.mubr.msk.bf16.vlgmr.msra.gmra.mxu0 %vm2655_vm3, %v2951_v62 }
 0xc51   :  { %6136 = vmatpush3.bf16.msra.mxu0 %v8330_v63  ;;  %6139 = vmatprep.mubr.msk.bf16.mxu0 %vm7120_vm2, %v8957_v40 }
 0xc52   :  { %6137 = vmatprep.subr.bf16.mxu0 %v8957_v40 }
 0xc55   :  { %6138 = vmatpush3.bf16.msra.mxu0 %v8339_v60 }
 0xc56   :  { %6151 = vmatprep.subr.bf16.mxu0 %v8957_v40 }
 0xd10   :  { %v2989_v0 = vpop.f32.mrf.mxu0 }
 0xd11   :  { %v2995_v8 = vadd.f32 %v2989_v0, %v2564_v20 }
 0xd12   :  { %v6125_v17 = vpop.f32.mrf.mxu0 }
 0xd13   :  { %6800 = vtanh.f32 %v2995_v8  ;;  %v5898_v29 = vmul.f32 -1.442695, %v2995_v8 }
 0xd14   :  { %v2992_v30 = vpop.f32.mrf.mxu0 }
 0xd15   :  { %6802 = vpow2.f32 %v5898_v29 }
 0xd16   :  { %v6126_v14 = vpop.f32.mrf.mxu0 }
 0xd20   :  { %v6801_v42 = vpop.eup %6800 }
 0xd21   :  { %3005 = vrot.lane.b32.xlu0 %v6801_v42, %s7121_s10 }
 0xd22   :  { %v6803_v21 = vpop.eup %6802 }
 0xd23   :  { %v2999_v43 = vadd.f32 1.0, %v6803_v21 }
 0xd25   :  { %6804 = vrcp.f32 %v2999_v43 }
 0xd32   :  { %v6805_v27 = vpop.eup %6804 }
 0xd33   :  { %v3003_v54 = vmul.f32 %v6805_v27, %v2939_v28  ;;  %v2565_v28 = vadd.f32 %v8312_v55, %v8175_v37 }
 0xd93   :  { %v3006_v51 = vpop.permute.xlu0 %3005 }
 0xd94   :  { %v3008_v50 = vmul.f32 %v6805_v27, %v3006_v51 }
 0xd96   :  { %3010 = vrot.lane.b32.xlu1 %v3008_v50, %s7122_s11 }
 0xe08   :  { %v3011_v49 = vpop.permute.xlu1 %3010 }
 0xe09   :  { %v3013_v6 = vadd.f32 %v3011_v49, %v3003_v54 }
 0xe0b   :  { %6806 = vtanh.f32 %v3013_v6 }
 0xe18   :  { %v6807_v52 = vpop.eup %6806 }
 0xe19   :  { %3016 = vrot.lane.b32.xlu0 %v6807_v52, %s7121_s10 }
 0xe8b   :  { %v3017_v59 = vpop.permute.xlu0 %3016 }
 0xe8c   :  { %v3019_v45 = vmul.f32 %v6805_v27, %v3017_v59 }
 0xe8e   :  { %v3022_v57 = vpack.c.bf16 %v3019_v45, %v3019_v45 }
 0xe90   :  { %3024 = vrot.lane.b32.xlu1 %v3022_v57, %s7122_s11 }
 0xf02   :  { %v3025_v53 = vpop.permute.xlu1 %3024 }
 0xf03   :  { %6132 = vmatmul.mubr.msk.bf16.vlgmr.msra.gmra.mxu1 %vm2655_vm3, %v3025_v53 }
 0xf04   :  { %6144 = vmatpush3.bf16.msra.mxu1 %v8330_v63  ;;  %6147 = vmatprep.mubr.msk.bf16.mxu1 %vm7120_vm2, %v8957_v40 }
 0xf05   :  { %6145 = vmatprep.subr.bf16.mxu1 %v8957_v40 }
 0xf08   :  { %6146 = vmatpush3.bf16.msra.mxu1 %v8339_v60 }
 0xf09   :  { %6159 = vmatprep.subr.bf16.mxu1 %v8957_v40 }
 0xfc3   :  { %v3063_v12 = vpop.f32.mrf.mxu1 }
 0xfc4   :  { %v3069_v47 = vadd.f32 %v3063_v12, %v2565_v28 }
 0xfc5   :  { %v6133_v3 = vpop.f32.mrf.mxu1 }
 0xfc6   :  { %6808 = vtanh.f32 %v3069_v47  ;;  %v5900_v8 = vmul.f32 -1.442695, %v3069_v47 }
 0xfc7   :  { %v3066_v62 = vpop.f32.mrf.mxu1 }
 0xfc8   :  { %6810 = vpow2.f32 %v5900_v8 }
 0xfc9   :  { %v6134_v20 = vpop.f32.mrf.mxu1 }
 0xfd3   :  { %v6809_v0 = vpop.eup %6808 }
 0xfd4   :  { %3079 = vrot.lane.b32.xlu0 %v6809_v0, %s7121_s10 }
 0xfd5   :  { %v6811_v17 = vpop.eup %6810 }
 0xfd6   :  { %v3073_v30 = vadd.f32 1.0, %v6811_v17 }
 0xfd8   :  { %6812 = vrcp.f32 %v3073_v30 }
 0xfe5   :  { %v6813_v14 = vpop.eup %6812 }
 0xfe6   :  { %v3077_v37 = vmul.f32 %v6813_v14, %v3013_v6  ;;  %v2566_v6 = vadd.f32 %v8312_v55, %v8179_v5 }
0x1046   :  { %v3080_v42 = vpop.permute.xlu0 %3079 }
0x1047   :  { %v3082_v29 = vmul.f32 %v6813_v14, %v3080_v42 }
0x1049   :  { %3084 = vrot.lane.b32.xlu1 %v3082_v29, %s7122_s11 }
0x10bb   :  { %v3085_v21 = vpop.permute.xlu1 %3084 }
0x10bc   :  { %v3087_v43 = vadd.f32 %v3085_v21, %v3077_v37  ;;  %v2567_v21 = vadd.f32 %v8312_v55, %v8183_v48 }
0x10be   :  { %6814 = vtanh.f32 %v3087_v43 }
0x10cb   :  { %v6815_v27 = vpop.eup %6814 }
0x10cc   :  { %3090 = vrot.lane.b32.xlu0 %v6815_v27, %s7121_s10 }
0x113e   :  { %v3091_v51 = vpop.permute.xlu0 %3090 }
0x113f   :  { %v3093_v50 = vmul.f32 %v6813_v14, %v3091_v51 }
0x1141   :  { %v3096_v54 = vpack.c.bf16 %v3093_v50, %v3093_v50 }
0x1143   :  { %3098 = vrot.lane.b32.xlu1 %v3096_v54, %s7122_s11 }
0x11b5   :  { %v3099_v49 = vpop.permute.xlu1 %3098 }
0x11b6   :  { %6140 = vmatmul.mubr.msk.bf16.vlgmr.msra.gmra.mxu0 %vm2655_vm3, %v3099_v49 }
0x11b7   :  { %6152 = vmatpush3.bf16.msra.mxu0 %v8330_v63  ;;  %6155 = vmatprep.mubr.msk.bf16.mxu0 %vm7120_vm2, %v8957_v40 }
0x11b8   :  { %6153 = vmatprep.subr.bf16.mxu0 %v8957_v40 }
0x11bb   :  { %6154 = vmatpush3.bf16.msra.mxu0 %v8339_v60 }
0x11bc   :  { %6167 = vmatprep.subr.bf16.mxu0 %v8957_v40 }
0x1276   :  { %v3137_v52 = vpop.f32.mrf.mxu0 }
0x1277   :  { %v3143_v59 = vadd.f32 %v3137_v52, %v2566_v6 }
0x1278   :  { %v6141_v45 = vpop.f32.mrf.mxu0 }
0x1279   :  { %6816 = vtanh.f32 %v3143_v59  ;;  %v5902_v12 = vmul.f32 -1.442695, %v3143_v59 }
0x127a   :  { %v3140_v57 = vpop.f32.mrf.mxu0 }
0x127b   :  { %6818 = vpow2.f32 %v5902_v12 }
0x127c   :  { %v6142_v53 = vpop.f32.mrf.mxu0 }
0x1286   :  { %v6817_v28 = vpop.eup %6816 }
0x1287   :  { %3153 = vrot.lane.b32.xlu0 %v6817_v28, %s7121_s10 }
0x1288   :  { %v6819_v47 = vpop.eup %6818 }
0x1289   :  { %v3147_v3 = vadd.f32 1.0, %v6819_v47 }
0x128b   :  { %6820 = vrcp.f32 %v3147_v3 }
0x1298   :  { %v6821_v62 = vpop.eup %6820 }
0x1299   :  { %v3151_v5 = vmul.f32 %v6821_v62, %v3087_v43 }
0x12f9   :  { %v3154_v20 = vpop.permute.xlu0 %3153 }
0x12fa   :  { %v3156_v0 = vmul.f32 %v6821_v62, %v3154_v20 }
0x12fc   :  { %3158 = vrot.lane.b32.xlu1 %v3156_v0, %s7122_s11 }
0x136e   :  { %v3159_v8 = vpop.permute.xlu1 %3158 }
0x136f   :  { %v3161_v17 = vadd.f32 %v3159_v8, %v3151_v5  ;;  %v2568_v5 = vadd.f32 %v8312_v55, %v8187_v34 }
0x1371   :  { %6822 = vtanh.f32 %v3161_v17 }
0x137e   :  { %v6823_v30 = vpop.eup %6822 }
0x137f   :  { %3164 = vrot.lane.b32.xlu0 %v6823_v30, %s7121_s10 }
0x13f1   :  { %v3165_v14 = vpop.permute.xlu0 %3164 }
0x13f2   :  { %v3167_v42 = vmul.f32 %v6821_v62, %v3165_v14 }
0x13f4   :  { %v3170_v29 = vpack.c.bf16 %v3167_v42, %v3167_v42 }
0x13f6   :  { %3172 = vrot.lane.b32.xlu1 %v3170_v29, %s7122_s11 }
0x1468   :  { %v3173_v37 = vpop.permute.xlu1 %3172 }
0x1469   :  { %6148 = vmatmul.mubr.msk.bf16.vlgmr.msra.gmra.mxu1 %vm2655_vm3, %v3173_v37 }
0x146a   :  { %6160 = vmatpush3.bf16.msra.mxu1 %v8330_v63  ;;  %6163 = vmatprep.mubr.msk.bf16.mxu1 %vm7120_vm2, %v8957_v40 }
0x146b   :  { %6161 = vmatprep.subr.bf16.mxu1 %v8957_v40 }
0x146e   :  { %6162 = vmatpush3.bf16.msra.mxu1 %v8339_v60 }
0x146f   :  { %6175 = vmatprep.subr.bf16.mxu1 %v8957_v40 }
0x1529   :  { %v3211_v43 = vpop.f32.mrf.mxu1 }
0x152a   :  { %v3217_v27 = vadd.f32 %v3211_v43, %v2567_v21 }
0x152b   :  { %v6149_v51 = vpop.f32.mrf.mxu1 }
0x152c   :  { %6824 = vtanh.f32 %v3217_v27  ;;  %v5904_v6 = vmul.f32 -1.442695, %v3217_v27 }
0x152d   :  { %v3214_v50 = vpop.f32.mrf.mxu1 }
0x152e   :  { %6826 = vpow2.f32 %v5904_v6 }
0x152f   :  { %v6150_v54 = vpop.f32.mrf.mxu1 }
0x1539   :  { %v6825_v49 = vpop.eup %6824 }
0x153a   :  { %3227 = vrot.lane.b32.xlu0 %v6825_v49, %s7121_s10 }
0x153b   :  { %v6827_v52 = vpop.eup %6826 }
0x153c   :  { %v3221_v59 = vadd.f32 1.0, %v6827_v52 }
0x153e   :  { %6828 = vrcp.f32 %v3221_v59 }
0x154b   :  { %v6829_v45 = vpop.eup %6828 }
0x154c   :  { %v3225_v48 = vmul.f32 %v6829_v45, %v3161_v17 }
0x15ac   :  { %v3228_v57 = vpop.permute.xlu0 %3227 }
0x15ad   :  { %v3230_v53 = vmul.f32 %v6829_v45, %v3228_v57 }
0x15af   :  { %3232 = vrot.lane.b32.xlu1 %v3230_v53, %s7122_s11  ;;  %v2569_v53 = vadd.f32 %v8312_v55, %v8191_v56 }
0x1621   :  { %v3233_v28 = vpop.permute.xlu1 %3232 }
0x1622   :  { %v3235_v12 = vadd.f32 %v3233_v28, %v3225_v48 }
0x1624   :  { %6830 = vtanh.f32 %v3235_v12 }
0x1631   :  { %v6831_v47 = vpop.eup %6830 }
0x1632   :  { %3238 = vrot.lane.b32.xlu0 %v6831_v47, %s7121_s10 }
0x16a4   :  { %v3239_v3 = vpop.permute.xlu0 %3238 }
0x16a5   :  { %v3241_v62 = vmul.f32 %v6829_v45, %v3239_v3 }
0x16a7   :  { %v3244_v20 = vpack.c.bf16 %v3241_v62, %v3241_v62 }
0x16a9   :  { %3246 = vrot.lane.b32.xlu1 %v3244_v20, %s7122_s11 }
0x171b   :  { %v3247_v0 = vpop.permute.xlu1 %3246 }
0x171c   :  { %6156 = vmatmul.mubr.msk.bf16.vlgmr.msra.gmra.mxu0 %vm2655_vm3, %v3247_v0 }
0x171d   :  { %6168 = vmatpush3.bf16.msra.mxu0 %v8330_v63  ;;  %6171 = vmatprep.mubr.msk.bf16.mxu0 %vm7120_vm2, %v8957_v40 }
0x171e   :  { %6169 = vmatprep.subr.bf16.mxu0 %v8957_v40 }
0x1721   :  { %6170 = vmatpush3.bf16.msra.mxu0 %v8339_v60 }
0x1722   :  { %6183 = vmatprep.subr.bf16.mxu0 %v8957_v40 }
0x17dc   :  { %v3285_v8 = vpop.f32.mrf.mxu0 }
0x17dd   :  { %v3291_v17 = vadd.f32 %v3285_v8, %v2568_v5 }
0x17de   :  { %v6157_v30 = vpop.f32.mrf.mxu0 }
0x17df   :  { %6832 = vtanh.f32 %v3291_v17  ;;  %v5906_v37 = vmul.f32 -1.442695, %v3291_v17 }
0x17e0   :  { %v3288_v14 = vpop.f32.mrf.mxu0 }
0x17e1   :  { %6834 = vpow2.f32 %v5906_v37 }
0x17e2   :  { %v6158_v42 = vpop.f32.mrf.mxu0 }
0x17ec   :  { %v6833_v29 = vpop.eup %6832 }
0x17ed   :  { %3301 = vrot.lane.b32.xlu0 %v6833_v29, %s7121_s10 }
0x17ee   :  { %v6835_v21 = vpop.eup %6834 }
0x17ef   :  { %v3295_v43 = vadd.f32 1.0, %v6835_v21 }
0x17f1   :  { %6836 = vrcp.f32 %v3295_v43 }
0x17fe   :  { %v6837_v27 = vpop.eup %6836 }
0x17ff   :  { %v3299_v34 = vmul.f32 %v6837_v27, %v3235_v12 }
0x185f   :  { %v3302_v51 = vpop.permute.xlu0 %3301 }
0x1860   :  { %v3304_v50 = vmul.f32 %v6837_v27, %v3302_v51  ;;  %v2570_v51 = vadd.f32 %v8312_v55, %v8195_v38 }
0x1862   :  { %3306 = vrot.lane.b32.xlu1 %v3304_v50, %s7122_s11 }
0x18d4   :  { %v3307_v54 = vpop.permute.xlu1 %3306 }
0x18d5   :  { %v3309_v49 = vadd.f32 %v3307_v54, %v3299_v34 }
0x18d7   :  { %6838 = vtanh.f32 %v3309_v49 }
0x18e4   :  { %v6839_v6 = vpop.eup %6838 }
0x18e5   :  { %3312 = vrot.lane.b32.xlu0 %v6839_v6, %s7121_s10 }
0x1957   :  { %v3313_v52 = vpop.permute.xlu0 %3312 }
0x1958   :  { %v3315_v59 = vmul.f32 %v6837_v27, %v3313_v52 }
0x195a   :  { %v3318_v45 = vpack.c.bf16 %v3315_v59, %v3315_v59 }
0x195c   :  { %3320 = vrot.lane.b32.xlu1 %v3318_v45, %s7122_s11 }
0x19ce   :  { %v3321_v57 = vpop.permute.xlu1 %3320 }
0x19cf   :  { %6164 = vmatmul.mubr.msk.bf16.vlgmr.msra.gmra.mxu1 %vm2655_vm3, %v3321_v57 }
0x19d0   :  { %6176 = vmatpush3.bf16.msra.mxu1 %v8330_v63  ;;  %6179 = vmatprep.mubr.msk.bf16.mxu1 %vm7120_vm2, %v8957_v40 }
0x19d1   :  { %6177 = vmatprep.subr.bf16.mxu1 %v8957_v40 }
0x19d4   :  { %6178 = vmatpush3.bf16.msra.mxu1 %v8339_v60 }
0x19d5   :  { %6191 = vmatprep.subr.bf16.mxu1 %v8957_v40 }
0x1a8f   :  { %v3359_v48 = vpop.f32.mrf.mxu1 }
0x1a90   :  { %v3365_v28 = vadd.f32 %v3359_v48, %v2569_v53 }
0x1a91   :  { %v6165_v12 = vpop.f32.mrf.mxu1 }
0x1a92   :  { %6840 = vtanh.f32 %v3365_v28  ;;  %v5908_v20 = vmul.f32 -1.442695, %v3365_v28 }
0x1a93   :  { %v3362_v47 = vpop.f32.mrf.mxu1 }
0x1a94   :  { %6842 = vpow2.f32 %v5908_v20 }
0x1a95   :  { %v6166_v3 = vpop.f32.mrf.mxu1 }
0x1a9f   :  { %v6841_v62 = vpop.eup %6840 }
0x1aa0   :  { %3375 = vrot.lane.b32.xlu0 %v6841_v62, %s7121_s10 }
0x1aa1   :  { %v6843_v0 = vpop.eup %6842 }
0x1aa2   :  { %v3369_v5 = vadd.f32 1.0, %v6843_v0 }
0x1aa4   :  { %6844 = vrcp.f32 %v3369_v5 }
0x1ab1   :  { %v6845_v8 = vpop.eup %6844 }
0x1ab2   :  { %v3373_v56 = vmul.f32 %v6845_v8, %v3309_v49 }
0x1b12   :  { %v3376_v17 = vpop.permute.xlu0 %3375 }
0x1b13   :  { %v3378_v30 = vmul.f32 %v6845_v8, %v3376_v17 }
0x1b15   :  { %3380 = vrot.lane.b32.xlu1 %v3378_v30, %s7122_s11 }
0x1b87   :  { %v3381_v14 = vpop.permute.xlu1 %3380 }
0x1b88   :  { %v3383_v42 = vadd.f32 %v3381_v14, %v3373_v56 }
0x1b8a   :  { %6846 = vtanh.f32 %v3383_v42 }
0x1b97   :  { %v6847_v29 = vpop.eup %6846 }
0x1b98   :  { %3386 = vrot.lane.b32.xlu0 %v6847_v29, %s7121_s10 }
0x1c0a   :  { %v3387_v37 = vpop.permute.xlu0 %3386 }
0x1c0b   :  { %v3389_v21 = vmul.f32 %v6845_v8, %v3387_v37  ;;  %v2571_v8 = vadd.f32 %v8312_v55, %v8199_v18 }
0x1c0d   :  { %v3392_v43 = vpack.c.bf16 %v3389_v21, %v3389_v21 }
0x1c0f   :  { %3394 = vrot.lane.b32.xlu1 %v3392_v43, %s7122_s11 }
0x1c81   :  { %v3395_v27 = vpop.permute.xlu1 %3394 }
0x1c82   :  { %6172 = vmatmul.mubr.msk.bf16.vlgmr.msra.gmra.mxu0 %vm2655_vm3, %v3395_v27 }
0x1c83   :  { %6184 = vmatpush3.bf16.msra.mxu0 %v8330_v63  ;;  %6187 = vmatprep.mubr.msk.bf16.mxu0 %vm7120_vm2, %v8957_v40 }
0x1c84   :  { %6185 = vmatprep.subr.bf16.mxu0 %v8957_v40 }
0x1c87   :  { %6186 = vmatpush3.bf16.msra.mxu0 %v8339_v60 }
0x1c88   :  { %6199 = vmatprep.subr.bf16.mxu0 %v8957_v40 }
0x1d42   :  { %v3433_v50 = vpop.f32.mrf.mxu0 }
0x1d43   :  { %v3439_v34 = vadd.f32 %v3433_v50, %v2570_v51 }
0x1d44   :  { %v6173_v54 = vpop.f32.mrf.mxu0 }
0x1d45   :  { %6848 = vtanh.f32 %v3439_v34  ;;  %v5910_v59 = vmul.f32 -1.442695, %v3439_v34 }
0x1d46   :  { %v3436_v49 = vpop.f32.mrf.mxu0 }
0x1d47   :  { %6850 = vpow2.f32 %v5910_v59 }
0x1d48   :  { %v6174_v6 = vpop.f32.mrf.mxu0 }
0x1d52   :  { %v6849_v52 = vpop.eup %6848 }
0x1d53   :  { %3449 = vrot.lane.b32.xlu0 %v6849_v52, %s7121_s10 }
0x1d54   :  { %v6851_v45 = vpop.eup %6850 }
0x1d55   :  { %v3443_v57 = vadd.f32 1.0, %v6851_v45 }
0x1d57   :  { %6852 = vrcp.f32 %v3443_v57  ;;  %v2572_v57 = vadd.f32 %v8312_v55, %v8203_v16 }
0x1d64   :  { %v6853_v53 = vpop.eup %6852 }
0x1d65   :  { %v3447_v38 = vmul.f32 %v6853_v53, %v3383_v42 }
0x1dc5   :  { %v3450_v48 = vpop.permute.xlu0 %3449 }
0x1dc6   :  { %v3452_v28 = vmul.f32 %v6853_v53, %v3450_v48 }
0x1dc8   :  { %3454 = vrot.lane.b32.xlu1 %v3452_v28, %s7122_s11 }
0x1e3a   :  { %v3455_v12 = vpop.permute.xlu1 %3454 }
0x1e3b   :  { %v3457_v47 = vadd.f32 %v3455_v12, %v3447_v38 }
0x1e3d   :  { %6854 = vtanh.f32 %v3457_v47 }
0x1e4a   :  { %v6855_v3 = vpop.eup %6854 }
0x1e4b   :  { %3460 = vrot.lane.b32.xlu0 %v6855_v3, %s7121_s10 }
0x1ebd   :  { %v3461_v62 = vpop.permute.xlu0 %3460 }
0x1ebe   :  { %v3463_v20 = vmul.f32 %v6853_v53, %v3461_v62 }
0x1ec0   :  { %v3466_v0 = vpack.c.bf16 %v3463_v20, %v3463_v20 }
0x1ec2   :  { %3468 = vrot.lane.b32.xlu1 %v3466_v0, %s7122_s11 }
0x1f34   :  { %v3469_v5 = vpop.permute.xlu1 %3468 }
0x1f35   :  { %6180 = vmatmul.mubr.msk.bf16.vlgmr.msra.gmra.mxu1 %vm2655_vm3, %v3469_v5 }
0x1f36   :  { %6192 = vmatpush3.bf16.msra.mxu1 %v8330_v63  ;;  %6195 = vmatprep.mubr.msk.bf16.mxu1 %vm7120_vm2, %v8957_v40 }
0x1f37   :  { %6193 = vmatprep.subr.bf16.mxu1 %v8957_v40 }
0x1f3a   :  { %6194 = vmatpush3.bf16.msra.mxu1 %v8339_v60 }
0x1f3b   :  { %6207 = vmatprep.subr.bf16.mxu1 %v8957_v40 }
0x1ff5   :  { %v3507_v17 = vpop.f32.mrf.mxu1 }
0x1ff6   :  { %v3513_v30 = vadd.f32 %v3507_v17, %v2571_v8 }
0x1ff7   :  { %v6181_v56 = vpop.f32.mrf.mxu1 }
0x1ff8   :  { %6856 = vtanh.f32 %v3513_v30  ;;  %v5912_v37 = vmul.f32 -1.442695, %v3513_v30 }
0x1ff9   :  { %v3510_v14 = vpop.f32.mrf.mxu1 }
0x1ffa   :  { %6858 = vpow2.f32 %v5912_v37 }
0x1ffb   :  { %v6182_v42 = vpop.f32.mrf.mxu1 }
0x2005   :  { %v6857_v29 = vpop.eup %6856 }
0x2006   :  { %3523 = vrot.lane.b32.xlu0 %v6857_v29, %s7121_s10 }
0x2007   :  { %v6859_v21 = vpop.eup %6858 }
0x2008   :  { %v3517_v43 = vadd.f32 1.0, %v6859_v21  ;;  %v2573_v21 = vadd.f32 %v8312_v55, %v8207_v35 }
0x200a   :  { %6860 = vrcp.f32 %v3517_v43 }
0x2017   :  { %v6861_v27 = vpop.eup %6860 }
0x2018   :  { %v3521_v18 = vmul.f32 %v6861_v27, %v3457_v47 }
0x2078   :  { %v3524_v51 = vpop.permute.xlu0 %3523 }
0x2079   :  { %v3526_v50 = vmul.f32 %v6861_v27, %v3524_v51 }
0x207b   :  { %3528 = vrot.lane.b32.xlu1 %v3526_v50, %s7122_s11 }
0x20ed   :  { %v3529_v34 = vpop.permute.xlu1 %3528 }
0x20ee   :  { %v3531_v54 = vadd.f32 %v3529_v34, %v3521_v18 }
0x20f0   :  { %6862 = vtanh.f32 %v3531_v54 }
0x20fd   :  { %v6863_v49 = vpop.eup %6862 }
0x20fe   :  { %3534 = vrot.lane.b32.xlu0 %v6863_v49, %s7121_s10 }
0x2170   :  { %v3535_v6 = vpop.permute.xlu0 %3534 }
0x2171   :  { %v3537_v52 = vmul.f32 %v6861_v27, %v3535_v6 }
0x2173   :  { %v3540_v59 = vpack.c.bf16 %v3537_v52, %v3537_v52 }
0x2175   :  { %3542 = vrot.lane.b32.xlu1 %v3540_v59, %s7122_s11 }
0x21e7   :  { %v3543_v45 = vpop.permute.xlu1 %3542 }
0x21e8   :  { %6188 = vmatmul.mubr.msk.bf16.vlgmr.msra.gmra.mxu0 %vm2655_vm3, %v3543_v45 }
0x21e9   :  { %6200 = vmatpush3.bf16.msra.mxu0 %v8330_v63  ;;  %6203 = vmatprep.mubr.msk.bf16.mxu0 %vm7120_vm2, %v8957_v40 }
0x21ea   :  { %6201 = vmatprep.subr.bf16.mxu0 %v8957_v40 }
0x21ed   :  { %6202 = vmatpush3.bf16.msra.mxu0 %v8339_v60 }
0x21ee   :  { %6215 = vmatprep.subr.bf16.mxu0 %v8957_v40 }
0x22a8   :  { %v3581_v53 = vpop.f32.mrf.mxu0 }
0x22a9   :  { %v3587_v48 = vadd.f32 %v3581_v53, %v2572_v57 }
0x22aa   :  { %v6189_v28 = vpop.f32.mrf.mxu0 }
0x22ab   :  { %6864 = vtanh.f32 %v3587_v48  ;;  %v5914_v3 = vmul.f32 -1.442695, %v3587_v48 }
0x22ac   :  { %v3584_v38 = vpop.f32.mrf.mxu0 }
0x22ad   :  { %6866 = vpow2.f32 %v5914_v3  ;;  %v2574_v3 = vadd.f32 %v8312_v55, %v8211_v11 }
0x22ae   :  { %v6190_v12 = vpop.f32.mrf.mxu0 }
0x22b8   :  { %v6865_v47 = vpop.eup %6864 }
0x22b9   :  { %3597 = vrot.lane.b32.xlu0 %v6865_v47, %s7121_s10 }
0x22ba   :  { %v6867_v62 = vpop.eup %6866 }
0x22bb   :  { %v3591_v20 = vadd.f32 1.0, %v6867_v62 }
0x22bd   :  { %6868 = vrcp.f32 %v3591_v20 }
0x22ca   :  { %v6869_v0 = vpop.eup %6868 }
0x22cb   :  { %v3595_v16 = vmul.f32 %v6869_v0, %v3531_v54 }
0x232b   :  { %v3598_v5 = vpop.permute.xlu0 %3597 }
0x232c   :  { %v3600_v8 = vmul.f32 %v6869_v0, %v3598_v5 }
0x232e   :  { %3602 = vrot.lane.b32.xlu1 %v3600_v8, %s7122_s11 }
0x23a0   :  { %v3603_v17 = vpop.permute.xlu1 %3602 }
0x23a1   :  { %v3605_v30 = vadd.f32 %v3603_v17, %v3595_v16 }
0x23a3   :  { %6870 = vtanh.f32 %v3605_v30 }
0x23b0   :  { %v6871_v56 = vpop.eup %6870 }
0x23b1   :  { %3608 = vrot.lane.b32.xlu0 %v6871_v56, %s7121_s10 }
0x2423   :  { %v3609_v14 = vpop.permute.xlu0 %3608 }
0x2424   :  { %v3611_v42 = vmul.f32 %v6869_v0, %v3609_v14 }
0x2426   :  { %v3614_v29 = vpack.c.bf16 %v3611_v42, %v3611_v42 }
0x2428   :  { %3616 = vrot.lane.b32.xlu1 %v3614_v29, %s7122_s11 }
0x249a   :  { %v3617_v37 = vpop.permute.xlu1 %3616 }
0x249b   :  { %6196 = vmatmul.mubr.msk.bf16.vlgmr.msra.gmra.mxu1 %vm2655_vm3, %v3617_v37 }
0x249c   :  { %6208 = vmatpush3.bf16.msra.mxu1 %v8330_v63  ;;  %6211 = vmatprep.mubr.msk.bf16.mxu1 %vm7120_vm2, %v8957_v40 }
0x249d   :  { %6209 = vmatprep.subr.bf16.mxu1 %v8957_v40 }
0x24a0   :  { %6210 = vmatpush3.bf16.msra.mxu1 %v8339_v60 }
0x24a1   :  { %6223 = vmatprep.subr.bf16.mxu1 %v8957_v40 }
0x255b   :  { %v3655_v43 = vpop.f32.mrf.mxu1 }
0x255c   :  { %v3661_v27 = vadd.f32 %v3655_v43, %v2573_v21 }
0x255d   :  { %v6197_v51 = vpop.f32.mrf.mxu1 }
0x255e   :  { %6872 = vtanh.f32 %v3661_v27  ;;  %v5916_v54 = vmul.f32 -1.442695, %v3661_v27 }
0x255f   :  { %v3658_v50 = vpop.f32.mrf.mxu1 }
0x2560   :  { %6874 = vpow2.f32 %v5916_v54 }
0x2561   :  { %v6198_v18 = vpop.f32.mrf.mxu1 }
0x2562   :  { %v8528_v18 = vld [vmem:[%s8861_s2] ss:$0 sm:$0xff] }
0x256b   :  { %v6873_v34 = vpop.eup %6872 }
0x256c   :  { %3671 = vrot.lane.b32.xlu0 %v6873_v34, %s7121_s10  ;;  %v2575_v34 = vadd.f32 %v8528_v18, %v8215_v15 }
0x256d   :  { %v6875_v49 = vpop.eup %6874 }
0x256e   :  { %v3665_v6 = vadd.f32 1.0, %v6875_v49 }
0x2570   :  { %6876 = vrcp.f32 %v3665_v6 }
0x257d   :  { %v6877_v52 = vpop.eup %6876 }
0x257e   :  { %v3669_v35 = vmul.f32 %v6877_v52, %v3605_v30 }
0x25de   :  { %v3672_v59 = vpop.permute.xlu0 %3671 }
0x25df   :  { %v3674_v45 = vmul.f32 %v6877_v52, %v3672_v59 }
0x25e1   :  { %3676 = vrot.lane.b32.xlu1 %v3674_v45, %s7122_s11 }
0x2653   :  { %v3677_v57 = vpop.permute.xlu1 %3676 }
0x2654   :  { %v3679_v53 = vadd.f32 %v3677_v57, %v3669_v35 }
0x2656   :  { %6878 = vtanh.f32 %v3679_v53 }
0x2663   :  { %v6879_v48 = vpop.eup %6878 }
0x2664   :  { %3682 = vrot.lane.b32.xlu0 %v6879_v48, %s7121_s10 }
0x26d6   :  { %v3683_v28 = vpop.permute.xlu0 %3682 }
0x26d7   :  { %v3685_v38 = vmul.f32 %v6877_v52, %v3683_v28 }
0x26d9   :  { %v3688_v12 = vpack.c.bf16 %v3685_v38, %v3685_v38 }
0x26db   :  { %3690 = vrot.lane.b32.xlu1 %v3688_v12, %s7122_s11 }
0x274d   :  { %v3691_v47 = vpop.permute.xlu1 %3690 }
0x274e   :  { %6204 = vmatmul.mubr.msk.bf16.vlgmr.msra.gmra.mxu0 %vm2655_vm3, %v3691_v47 }
0x274f   :  { %6216 = vmatpush3.bf16.msra.mxu0 %v8330_v63  ;;  %6219 = vmatprep.mubr.msk.bf16.mxu0 %vm7120_vm2, %v8957_v40 }
0x2750   :  { %6217 = vmatprep.subr.bf16.mxu0 %v8957_v40 }
0x2753   :  { %6218 = vmatpush3.bf16.msra.mxu0 %v8339_v60 }
0x2754   :  { %6231 = vmatprep.subr.bf16.mxu0 %v8957_v40 }
0x280e   :  { %v3729_v62 = vpop.f32.mrf.mxu0 }
0x280f   :  { %v3735_v20 = vadd.f32 %v3729_v62, %v2574_v3 }
0x2810   :  { %v6205_v0 = vpop.f32.mrf.mxu0 }
0x2811   :  { %6880 = vtanh.f32 %v3735_v20  ;;  %v5918_v17 = vmul.f32 -1.442695, %v3735_v20  ;;  %v8540_v0 = vld [vmem:[%s8862_s3 + $0x8] sm:$0xff]  }
0x2812   :  { %v3732_v5 = vpop.f32.mrf.mxu0 }
0x2813   :  { %6882 = vpow2.f32 %v5918_v17  ;;  %v8549_v5 = vld [vmem:[%s8862_s3] sm:$0xff]  }
0x2814   :  { %v6206_v8 = vpop.f32.mrf.mxu0 }
0x2815   :  { %v2576_v8 = vadd.f32 %v8528_v18, %v8219_v7 }
0x281e   :  { %v6881_v16 = vpop.eup %6880 }
0x281f   :  { %3745 = vrot.lane.b32.xlu0 %v6881_v16, %s7121_s10 }
0x2820   :  { %v6883_v30 = vpop.eup %6882 }
0x2821   :  { %v3739_v56 = vadd.f32 1.0, %v6883_v30 }
0x2823   :  { %6884 = vrcp.f32 %v3739_v56 }
0x2830   :  { %v6885_v14 = vpop.eup %6884 }
0x2831   :  { %v3743_v11 = vmul.f32 %v6885_v14, %v3679_v53 }
0x2891   :  { %v3746_v42 = vpop.permute.xlu0 %3745 }
0x2892   :  { %v3748_v29 = vmul.f32 %v6885_v14, %v3746_v42 }
0x2894   :  { %3750 = vrot.lane.b32.xlu1 %v3748_v29, %s7122_s11 }
0x2906   :  { %v3751_v55 = vpop.permute.xlu1 %3750 }
0x2907   :  { %v3753_v37 = vadd.f32 %v3751_v55, %v3743_v11 }
0x2909   :  { %6886 = vtanh.f32 %v3753_v37 }
0x2916   :  { %v6887_v21 = vpop.eup %6886 }
0x2917   :  { %3756 = vrot.lane.b32.xlu0 %v6887_v21, %s7121_s10 }
0x2989   :  { %v3757_v43 = vpop.permute.xlu0 %3756 }
0x298a   :  { %v3759_v27 = vmul.f32 %v6885_v14, %v3757_v43 }
0x298c   :  { %v3762_v51 = vpack.c.bf16 %v3759_v27, %v3759_v27 }
0x298e   :  { %3764 = vrot.lane.b32.xlu1 %v3762_v51, %s7122_s11 }
0x2a00   :  { %v3765_v50 = vpop.permute.xlu1 %3764 }
0x2a01   :  { %6212 = vmatmul.mubr.msk.bf16.vlgmr.msra.gmra.mxu1 %vm2655_vm3, %v3765_v50 }
0x2a02   :  { %6224 = vmatpush3.bf16.msra.mxu1 %v8330_v63  ;;  %6227 = vmatprep.mubr.msk.bf16.mxu1 %vm7120_vm2, %v8957_v40 }
0x2a03   :  { %6225 = vmatprep.subr.bf16.mxu1 %v8957_v40 }
0x2a06   :  { %6226 = vmatpush3.bf16.msra.mxu1 %v8339_v60 }
0x2a07   :  { %6239 = vmatprep.subr.bf16.mxu1 %v8957_v40 }
0x2ac1   :  { %v3803_v54 = vpop.f32.mrf.mxu1 }
0x2ac2   :  { %v3809_v49 = vadd.f32 %v3803_v54, %v2575_v34 }
0x2ac3   :  { %v6213_v63 = vpop.f32.mrf.mxu1 }
0x2ac4   :  { %6888 = vtanh.f32 %v3809_v49  ;;  %v5920_v60 = vmul.f32 -1.442695, %v3809_v49 }
0x2ac5   :  { %v3806_v6 = vpop.f32.mrf.mxu1 }
0x2ac6   :  { %6890 = vpow2.f32 %v5920_v60  ;;  %v2577_v6 = vadd.f32 %v8528_v18, %v8223_v61 }
0x2ac7   :  { %v6214_v52 = vpop.f32.mrf.mxu1 }
0x2ad1   :  { %v6889_v59 = vpop.eup %6888 }
0x2ad2   :  { %3819 = vrot.lane.b32.xlu0 %v6889_v59, %s7121_s10 }
0x2ad3   :  { %v6891_v45 = vpop.eup %6890 }
0x2ad4   :  { %v3813_v35 = vadd.f32 1.0, %v6891_v45 }
0x2ad6   :  { %6892 = vrcp.f32 %v3813_v35 }
0x2ae3   :  { %v6893_v57 = vpop.eup %6892 }
0x2ae4   :  { %v3817_v15 = vmul.f32 %v6893_v57, %v3753_v37 }
0x2b44   :  { %v3820_v53 = vpop.permute.xlu0 %3819 }
0x2b45   :  { %v3822_v48 = vmul.f32 %v6893_v57, %v3820_v53 }
0x2b47   :  { %3824 = vrot.lane.b32.xlu1 %v3822_v48, %s7122_s11 }
0x2bb9   :  { %v3825_v28 = vpop.permute.xlu1 %3824 }
0x2bba   :  { %v3827_v38 = vadd.f32 %v3825_v28, %v3817_v15 }
0x2bbc   :  { %6894 = vtanh.f32 %v3827_v38 }
0x2bc9   :  { %v6895_v12 = vpop.eup %6894 }
0x2bca   :  { %3830 = vrot.lane.b32.xlu0 %v6895_v12, %s7121_s10 }
0x2c3c   :  { %v3831_v47 = vpop.permute.xlu0 %3830 }
0x2c3d   :  { %v3833_v3 = vmul.f32 %v6893_v57, %v3831_v47 }
0x2c3f   :  { %v3836_v62 = vpack.c.bf16 %v3833_v3, %v3833_v3 }
0x2c41   :  { %3838 = vrot.lane.b32.xlu1 %v3836_v62, %s7122_s11 }
0x2cb3   :  { %v3839_v20 = vpop.permute.xlu1 %3838 }
0x2cb4   :  { %6220 = vmatmul.mubr.msk.bf16.vlgmr.msra.gmra.mxu0 %vm2655_vm3, %v3839_v20 }
0x2cb5   :  { %6232 = vmatpush3.bf16.msra.mxu0 %v8540_v0  ;;  %6235 = vmatprep.mubr.msk.bf16.mxu0 %vm7120_vm2, %v8957_v40 }
0x2cb6   :  { %6233 = vmatprep.subr.bf16.mxu0 %v8957_v40 }
0x2cb9   :  { %6234 = vmatpush3.bf16.msra.mxu0 %v8549_v5 }
0x2cba   :  { %6247 = vmatprep.subr.bf16.mxu0 %v8957_v40 }
0x2d74   :  { %v3877_v16 = vpop.f32.mrf.mxu0 }
0x2d75   :  { %v3883_v17 = vadd.f32 %v3877_v16, %v2576_v8 }
0x2d76   :  { %v6221_v30 = vpop.f32.mrf.mxu0 }
0x2d77   :  { %6896 = vtanh.f32 %v3883_v17  ;;  %v5922_v29 = vmul.f32 -1.442695, %v3883_v17  ;;  %v2578_v30 = vadd.f32 %v8528_v18, %v8227_v39 }
0x2d78   :  { %v3880_v56 = vpop.f32.mrf.mxu0 }
0x2d79   :  { %6898 = vpow2.f32 %v5922_v29 }
0x2d7a   :  { %v6222_v14 = vpop.f32.mrf.mxu0 }
0x2d84   :  { %v6897_v42 = vpop.eup %6896 }
0x2d85   :  { %3893 = vrot.lane.b32.xlu0 %v6897_v42, %s7121_s10 }
0x2d86   :  { %v6899_v11 = vpop.eup %6898 }
0x2d87   :  { %v3887_v55 = vadd.f32 1.0, %v6899_v11 }
0x2d89   :  { %6900 = vrcp.f32 %v3887_v55 }
0x2d96   :  { %v6901_v37 = vpop.eup %6900 }
0x2d97   :  { %v3891_v7 = vmul.f32 %v6901_v37, %v3827_v38 }
0x2df7   :  { %v3894_v21 = vpop.permute.xlu0 %3893 }
0x2df8   :  { %v3896_v43 = vmul.f32 %v6901_v37, %v3894_v21 }
0x2dfa   :  { %3898 = vrot.lane.b32.xlu1 %v3896_v43, %s7122_s11 }
0x2e6c   :  { %v3899_v27 = vpop.permute.xlu1 %3898 }
0x2e6d   :  { %v3901_v51 = vadd.f32 %v3899_v27, %v3891_v7 }
0x2e6f   :  { %6902 = vtanh.f32 %v3901_v51 }
0x2e7c   :  { %v6903_v50 = vpop.eup %6902 }
0x2e7d   :  { %3904 = vrot.lane.b32.xlu0 %v6903_v50, %s7121_s10 }
0x2eef   :  { %v3905_v34 = vpop.permute.xlu0 %3904 }
0x2ef0   :  { %v3907_v54 = vmul.f32 %v6901_v37, %v3905_v34 }
0x2ef2   :  { %v3910_v49 = vpack.c.bf16 %v3907_v54, %v3907_v54 }
0x2ef4   :  { %3912 = vrot.lane.b32.xlu1 %v3910_v49, %s7122_s11 }
0x2f66   :  { %v3913_v63 = vpop.permute.xlu1 %3912 }
0x2f67   :  { %6228 = vmatmul.mubr.msk.bf16.vlgmr.msra.gmra.mxu1 %vm2655_vm3, %v3913_v63 }
0x2f68   :  { %6240 = vmatpush3.bf16.msra.mxu1 %v8540_v0  ;;  %6243 = vmatprep.mubr.msk.bf16.mxu1 %vm7120_vm2, %v8957_v40 }
0x2f69   :  { %6241 = vmatprep.subr.bf16.mxu1 %v8957_v40 }
0x2f6c   :  { %6242 = vmatpush3.bf16.msra.mxu1 %v8549_v5 }
0x2f6d   :  { %6255 = vmatprep.subr.bf16.mxu1 %v8957_v40 }
0x3027   :  { %v3951_v52 = vpop.f32.mrf.mxu1 }
0x3028   :  { %v3957_v59 = vadd.f32 %v3951_v52, %v2577_v6 }
0x3029   :  { %v6229_v60 = vpop.f32.mrf.mxu1 }
0x302a   :  { %6904 = vtanh.f32 %v3957_v59  ;;  %v5924_v53 = vmul.f32 -1.442695, %v3957_v59  ;;  %v2579_v59 = vadd.f32 %v8528_v18, %v8231_v33 }
0x302b   :  { %v3954_v45 = vpop.f32.mrf.mxu1 }
0x302c   :  { %6906 = vpow2.f32 %v5924_v53 }
0x302d   :  { %v6230_v35 = vpop.f32.mrf.mxu1 }
0x3037   :  { %v6905_v57 = vpop.eup %6904 }
0x3038   :  { %3967 = vrot.lane.b32.xlu0 %v6905_v57, %s7121_s10 }
0x3039   :  { %v6907_v48 = vpop.eup %6906 }
0x303a   :  { %v3961_v15 = vadd.f32 1.0, %v6907_v48 }
0x303c   :  { %6908 = vrcp.f32 %v3961_v15 }
0x3049   :  { %v6909_v28 = vpop.eup %6908 }
0x304a   :  { %v3965_v61 = vmul.f32 %v6909_v28, %v3901_v51 }
0x30aa   :  { %v3968_v38 = vpop.permute.xlu0 %3967 }
0x30ab   :  { %v3970_v12 = vmul.f32 %v6909_v28, %v3968_v38 }
0x30ad   :  { %3972 = vrot.lane.b32.xlu1 %v3970_v12, %s7122_s11 }
0x311f   :  { %v3973_v47 = vpop.permute.xlu1 %3972 }
0x3120   :  { %v3975_v3 = vadd.f32 %v3973_v47, %v3965_v61 }
0x3122   :  { %6910 = vtanh.f32 %v3975_v3 }
0x312f   :  { %v6911_v62 = vpop.eup %6910 }
0x3130   :  { %3978 = vrot.lane.b32.xlu0 %v6911_v62, %s7121_s10 }
0x31a2   :  { %v3979_v20 = vpop.permute.xlu0 %3978 }
0x31a3   :  { %v3981_v8 = vmul.f32 %v6909_v28, %v3979_v20 }
0x31a5   :  { %v3984_v16 = vpack.c.bf16 %v3981_v8, %v3981_v8 }
0x31a7   :  { %3986 = vrot.lane.b32.xlu1 %v3984_v16, %s7122_s11 }
0x3219   :  { %v3987_v17 = vpop.permute.xlu1 %3986 }
0x321a   :  { %6236 = vmatmul.mubr.msk.bf16.vlgmr.msra.gmra.mxu0 %vm2655_vm3, %v3987_v17 }
0x321b   :  { %6248 = vmatpush3.bf16.msra.mxu0 %v8540_v0  ;;  %6251 = vmatprep.mubr.msk.bf16.mxu0 %vm7120_vm2, %v8957_v40 }
0x321c   :  { %6249 = vmatprep.subr.bf16.mxu0 %v8957_v40 }
0x321f   :  { %6250 = vmatpush3.bf16.msra.mxu0 %v8549_v5 }
0x3220   :  { %6263 = vmatprep.subr.bf16.mxu0 %v8957_v40 }
0x32da   :  { %v4025_v56 = vpop.f32.mrf.mxu0 }
0x32db   :  { %v4031_v14 = vadd.f32 %v4025_v56, %v2578_v30  ;;  %v2580_v56 = vadd.f32 %v8528_v18, %v8235_v31 }
0x32dc   :  { %v6237_v42 = vpop.f32.mrf.mxu0 }
0x32dd   :  { %6912 = vtanh.f32 %v4031_v14  ;;  %v5926_v37 = vmul.f32 -1.442695, %v4031_v14 }
0x32de   :  { %v4028_v29 = vpop.f32.mrf.mxu0 }
0x32df   :  { %6914 = vpow2.f32 %v5926_v37 }
0x32e0   :  { %v6238_v11 = vpop.f32.mrf.mxu0 }
0x32ea   :  { %v6913_v55 = vpop.eup %6912 }
0x32eb   :  { %4041 = vrot.lane.b32.xlu0 %v6913_v55, %s7121_s10 }
0x32ec   :  { %v6915_v21 = vpop.eup %6914 }
0x32ed   :  { %v4035_v43 = vadd.f32 1.0, %v6915_v21 }
0x32ef   :  { %6916 = vrcp.f32 %v4035_v43 }
0x32fc   :  { %v6917_v7 = vpop.eup %6916 }
0x32fd   :  { %v4039_v39 = vmul.f32 %v6917_v7, %v3975_v3 }
0x335d   :  { %v4042_v27 = vpop.permute.xlu0 %4041 }
0x335e   :  { %v4044_v51 = vmul.f32 %v6917_v7, %v4042_v27 }
0x3360   :  { %4046 = vrot.lane.b32.xlu1 %v4044_v51, %s7122_s11 }
0x33d2   :  { %v4047_v50 = vpop.permute.xlu1 %4046 }
0x33d3   :  { %v4049_v34 = vadd.f32 %v4047_v50, %v4039_v39 }
0x33d5   :  { %6918 = vtanh.f32 %v4049_v34 }
0x33e2   :  { %v6919_v54 = vpop.eup %6918 }
0x33e3   :  { %4052 = vrot.lane.b32.xlu0 %v6919_v54, %s7121_s10 }
0x3455   :  { %v4053_v49 = vpop.permute.xlu0 %4052 }
0x3456   :  { %v4055_v63 = vmul.f32 %v6917_v7, %v4053_v49 }
0x3458   :  { %v4058_v6 = vpack.c.bf16 %v4055_v63, %v4055_v63 }
0x345a   :  { %4060 = vrot.lane.b32.xlu1 %v4058_v6, %s7122_s11 }
0x34cc   :  { %v4061_v52 = vpop.permute.xlu1 %4060 }
0x34cd   :  { %6244 = vmatmul.mubr.msk.bf16.vlgmr.msra.gmra.mxu1 %vm2655_vm3, %v4061_v52 }
0x34ce   :  { %6256 = vmatpush3.bf16.msra.mxu1 %v8540_v0  ;;  %6259 = vmatprep.mubr.msk.bf16.mxu1 %vm7120_vm2, %v8957_v40 }
0x34cf   :  { %6257 = vmatprep.subr.bf16.mxu1 %v8957_v40 }
0x34d2   :  { %6258 = vmatpush3.bf16.msra.mxu1 %v8549_v5 }
0x34d3   :  { %6271 = vmatprep.subr.bf16.mxu1 %v8957_v40 }
0x358d   :  { %v4099_v60 = vpop.f32.mrf.mxu1 }
0x358e   :  { %v4105_v45 = vadd.f32 %v4099_v60, %v2579_v59  ;;  %v2581_v59 = vadd.f32 %v8528_v18, %v8239_v2 }
0x358f   :  { %v6245_v35 = vpop.f32.mrf.mxu1 }
0x3590   :  { %6920 = vtanh.f32 %v4105_v45  ;;  %v5928_v15 = vmul.f32 -1.442695, %v4105_v45 }
0x3591   :  { %v4102_v57 = vpop.f32.mrf.mxu1 }
0x3592   :  { %6922 = vpow2.f32 %v5928_v15 }
0x3593   :  { %v6246_v53 = vpop.f32.mrf.mxu1 }
0x359d   :  { %v6921_v48 = vpop.eup %6920 }
0x359e   :  { %4115 = vrot.lane.b32.xlu0 %v6921_v48, %s7121_s10 }
0x359f   :  { %v6923_v28 = vpop.eup %6922 }
0x35a0   :  { %v4109_v38 = vadd.f32 1.0, %v6923_v28 }
0x35a2   :  { %6924 = vrcp.f32 %v4109_v38 }
0x35af   :  { %v6925_v12 = vpop.eup %6924 }
0x35b0   :  { %v4113_v33 = vmul.f32 %v6925_v12, %v4049_v34 }
0x3610   :  { %v4116_v61 = vpop.permute.xlu0 %4115 }
0x3611   :  { %v4118_v47 = vmul.f32 %v6925_v12, %v4116_v61 }
0x3613   :  { %4120 = vrot.lane.b32.xlu1 %v4118_v47, %s7122_s11 }
0x3685   :  { %v4121_v3 = vpop.permute.xlu1 %4120 }
0x3686   :  { %v4123_v62 = vadd.f32 %v4121_v3, %v4113_v33 }
0x3688   :  { %6926 = vtanh.f32 %v4123_v62 }
0x3695   :  { %v6927_v20 = vpop.eup %6926 }
0x3696   :  { %4126 = vrot.lane.b32.xlu0 %v6927_v20, %s7121_s10 }
0x3708   :  { %v4127_v8 = vpop.permute.xlu0 %4126 }
0x3709   :  { %v4129_v16 = vmul.f32 %v6925_v12, %v4127_v8 }
0x370b   :  { %v4132_v17 = vpack.c.bf16 %v4129_v16, %v4129_v16 }
0x370d   :  { %4134 = vrot.lane.b32.xlu1 %v4132_v17, %s7122_s11 }
0x377f   :  { %v4135_v30 = vpop.permute.xlu1 %4134 }
0x3780   :  { %6252 = vmatmul.mubr.msk.bf16.vlgmr.msra.gmra.mxu0 %vm2655_vm3, %v4135_v30  ;;  %v2582_v30 = vadd.f32 %v8528_v18, %v8243_v13 }
0x3781   :  { %6264 = vmatpush3.bf16.msra.mxu0 %v8540_v0  ;;  %6267 = vmatprep.mubr.msk.bf16.mxu0 %vm7120_vm2, %v8957_v40 }
0x3782   :  { %6265 = vmatprep.subr.bf16.mxu0 %v8957_v40 }
0x3785   :  { %6266 = vmatpush3.bf16.msra.mxu0 %v8549_v5 }
0x3786   :  { %6279 = vmatprep.subr.bf16.mxu0 %v8957_v40 }
0x3840   :  { %v4173_v14 = vpop.f32.mrf.mxu0 }
0x3841   :  { %v4179_v42 = vadd.f32 %v4173_v14, %v2580_v56 }
0x3842   :  { %v6253_v29 = vpop.f32.mrf.mxu0 }
0x3843   :  { %6928 = vtanh.f32 %v4179_v42  ;;  %v5930_v21 = vmul.f32 -1.442695, %v4179_v42 }
0x3844   :  { %v4176_v11 = vpop.f32.mrf.mxu0 }
0x3845   :  { %6930 = vpow2.f32 %v5930_v21 }
0x3846   :  { %v6254_v55 = vpop.f32.mrf.mxu0 }
0x3850   :  { %v6929_v37 = vpop.eup %6928 }
0x3851   :  { %4189 = vrot.lane.b32.xlu0 %v6929_v37, %s7121_s10 }
0x3852   :  { %v6931_v43 = vpop.eup %6930 }
0x3853   :  { %v4183_v7 = vadd.f32 1.0, %v6931_v43 }
0x3855   :  { %6932 = vrcp.f32 %v4183_v7 }
0x3862   :  { %v6933_v27 = vpop.eup %6932 }
0x3863   :  { %v4187_v31 = vmul.f32 %v6933_v27, %v4123_v62 }
0x38c3   :  { %v4190_v51 = vpop.permute.xlu0 %4189 }
0x38c4   :  { %v4192_v39 = vmul.f32 %v6933_v27, %v4190_v51 }
0x38c6   :  { %4194 = vrot.lane.b32.xlu1 %v4192_v39, %s7122_s11 }
0x3938   :  { %v4195_v50 = vpop.permute.xlu1 %4194 }
0x3939   :  { %v4197_v34 = vadd.f32 %v4195_v50, %v4187_v31 }
0x393b   :  { %6934 = vtanh.f32 %v4197_v34 }
0x3948   :  { %v6935_v54 = vpop.eup %6934 }
0x3949   :  { %4200 = vrot.lane.b32.xlu0 %v6935_v54, %s7121_s10 }
0x39bb   :  { %v4201_v49 = vpop.permute.xlu0 %4200 }
0x39bc   :  { %v4203_v63 = vmul.f32 %v6933_v27, %v4201_v49 }
0x39be   :  { %v4206_v6 = vpack.c.bf16 %v4203_v63, %v4203_v63 }
0x39c0   :  { %4208 = vrot.lane.b32.xlu1 %v4206_v6, %s7122_s11  ;;  %v2583_v6 = vadd.f32 %v8528_v18, %v8249_v44 }
0x3a32   :  { %v4209_v52 = vpop.permute.xlu1 %4208 }
0x3a33   :  { %6260 = vmatmul.mubr.msk.bf16.vlgmr.msra.gmra.mxu1 %vm2655_vm3, %v4209_v52 }
0x3a34   :  { %6272 = vmatpush3.bf16.msra.mxu1 %v8540_v0  ;;  %6275 = vmatprep.mubr.msk.bf16.mxu1 %vm7120_vm2, %v8957_v40 }
0x3a35   :  { %6273 = vmatprep.subr.bf16.mxu1 %v8957_v40 }
0x3a38   :  { %6274 = vmatpush3.bf16.msra.mxu1 %v8549_v5 }
0x3a39   :  { %6287 = vmatprep.subr.bf16.mxu1 %v8957_v40 }
0x3af3   :  { %v4247_v60 = vpop.f32.mrf.mxu1 }
0x3af4   :  { %v4253_v45 = vadd.f32 %v4247_v60, %v2581_v59 }
0x3af5   :  { %v6261_v35 = vpop.f32.mrf.mxu1 }
0x3af6   :  { %6936 = vtanh.f32 %v4253_v45  ;;  %v5932_v15 = vmul.f32 -1.442695, %v4253_v45 }
0x3af7   :  { %v4250_v57 = vpop.f32.mrf.mxu1 }
0x3af8   :  { %6938 = vpow2.f32 %v5932_v15 }
0x3af9   :  { %v6262_v53 = vpop.f32.mrf.mxu1 }
0x3b03   :  { %v6937_v48 = vpop.eup %6936 }
0x3b04   :  { %4263 = vrot.lane.b32.xlu0 %v6937_v48, %s7121_s10 }
0x3b05   :  { %v6939_v28 = vpop.eup %6938 }
0x3b06   :  { %v4257_v38 = vadd.f32 1.0, %v6939_v28 }
0x3b08   :  { %6940 = vrcp.f32 %v4257_v38 }
0x3b15   :  { %v6941_v12 = vpop.eup %6940 }
0x3b16   :  { %v4261_v2 = vmul.f32 %v6941_v12, %v4197_v34 }
0x3b76   :  { %v4264_v61 = vpop.permute.xlu0 %4263 }
0x3b77   :  { %v4266_v47 = vmul.f32 %v6941_v12, %v4264_v61 }
0x3b79   :  { %4268 = vrot.lane.b32.xlu1 %v4266_v47, %s7122_s11 }
0x3beb   :  { %v4269_v33 = vpop.permute.xlu1 %4268 }
0x3bec   :  { %v4271_v3 = vadd.f32 %v4269_v33, %v4261_v2 }
0x3bee   :  { %6942 = vtanh.f32 %v4271_v3 }
0x3bfb   :  { %v6943_v62 = vpop.eup %6942 }
0x3bfc   :  { %4274 = vrot.lane.b32.xlu0 %v6943_v62, %s7121_s10 }
0x3c6e   :  { %v4275_v20 = vpop.permute.xlu0 %4274 }
0x3c6f   :  { %v4277_v8 = vmul.f32 %v6941_v12, %v4275_v20 }
0x3c71   :  { %v4280_v16 = vpack.c.bf16 %v4277_v8, %v4277_v8  ;;  %v2584_v8 = vadd.f32 %v8528_v18, %v8252_v10 }
0x3c73   :  { %4282 = vrot.lane.b32.xlu1 %v4280_v16, %s7122_s11 }
0x3ce5   :  { %v4283_v17 = vpop.permute.xlu1 %4282 }
0x3ce6   :  { %6268 = vmatmul.mubr.msk.bf16.vlgmr.msra.gmra.mxu0 %vm2655_vm3, %v4283_v17 }
0x3ce7   :  { %6280 = vmatpush3.bf16.msra.mxu0 %v8540_v0  ;;  %6283 = vmatprep.mubr.msk.bf16.mxu0 %vm7120_vm2, %v8957_v40 }
0x3ce8   :  { %6281 = vmatprep.subr.bf16.mxu0 %v8957_v40 }
0x3ceb   :  { %6282 = vmatpush3.bf16.msra.mxu0 %v8549_v5 }
0x3cec   :  { %6295 = vmatprep.subr.bf16.mxu0 %v8957_v40 }
0x3da6   :  { %v4321_v56 = vpop.f32.mrf.mxu0 }
0x3da7   :  { %v4327_v14 = vadd.f32 %v4321_v56, %v2582_v30 }
0x3da8   :  { %v6269_v42 = vpop.f32.mrf.mxu0 }
0x3da9   :  { %6944 = vtanh.f32 %v4327_v14  ;;  %v5934_v37 = vmul.f32 -1.442695, %v4327_v14 }
0x3daa   :  { %v4324_v29 = vpop.f32.mrf.mxu0 }
0x3dab   :  { %6946 = vpow2.f32 %v5934_v37 }
0x3dac   :  { %v6270_v11 = vpop.f32.mrf.mxu0 }
0x3db6   :  { %v6945_v55 = vpop.eup %6944 }
0x3db7   :  { %4337 = vrot.lane.b32.xlu0 %v6945_v55, %s7121_s10 }
0x3db8   :  { %v6947_v21 = vpop.eup %6946 }
0x3db9   :  { %v4331_v43 = vadd.f32 1.0, %v6947_v21 }
0x3dbb   :  { %6948 = vrcp.f32 %v4331_v43 }
0x3dc8   :  { %v6949_v7 = vpop.eup %6948 }
0x3dc9   :  { %v4335_v13 = vmul.f32 %v6949_v7, %v4271_v3 }
0x3e29   :  { %v4338_v27 = vpop.permute.xlu0 %4337 }
0x3e2a   :  { %v4340_v51 = vmul.f32 %v6949_v7, %v4338_v27 }
0x3e2c   :  { %4342 = vrot.lane.b32.xlu1 %v4340_v51, %s7122_s11 }
0x3e9e   :  { %v4343_v39 = vpop.permute.xlu1 %4342 }
0x3e9f   :  { %v4345_v31 = vadd.f32 %v4343_v39, %v4335_v13 }
0x3ea1   :  { %6950 = vtanh.f32 %v4345_v31 }
0x3eae   :  { %v6951_v50 = vpop.eup %6950 }
0x3eaf   :  { %4348 = vrot.lane.b32.xlu0 %v6951_v50, %s7121_s10 }
0x3f21   :  { %v4349_v34 = vpop.permute.xlu0 %4348 }
0x3f22   :  { %v4351_v54 = vmul.f32 %v6949_v7, %v4349_v34  ;;  %v2585_v34 = vadd.f32 %v8528_v18, %v8258_v4 }
0x3f24   :  { %v4354_v49 = vpack.c.bf16 %v4351_v54, %v4351_v54 }
0x3f26   :  { %4356 = vrot.lane.b32.xlu1 %v4354_v49, %s7122_s11 }
0x3f98   :  { %v4357_v63 = vpop.permute.xlu1 %4356 }
0x3f99   :  { %6276 = vmatmul.mubr.msk.bf16.vlgmr.msra.gmra.mxu1 %vm2655_vm3, %v4357_v63 }
0x3f9a   :  { %6288 = vmatpush3.bf16.msra.mxu1 %v8540_v0  ;;  %6291 = vmatprep.mubr.msk.bf16.mxu1 %vm7120_vm2, %v8957_v40 }
0x3f9b   :  { %6289 = vmatprep.subr.bf16.mxu1 %v8957_v40 }
0x3f9e   :  { %6290 = vmatpush3.bf16.msra.mxu1 %v8549_v5 }
0x3f9f   :  { %6303 = vmatprep.subr.bf16.mxu1 %v8957_v40 }
0x4059   :  { %v4395_v52 = vpop.f32.mrf.mxu1 }
0x405a   :  { %v4401_v59 = vadd.f32 %v4395_v52, %v2583_v6 }
0x405b   :  { %v6277_v60 = vpop.f32.mrf.mxu1 }
0x405c   :  { %6952 = vtanh.f32 %v4401_v59  ;;  %v5936_v53 = vmul.f32 -1.442695, %v4401_v59 }
0x405d   :  { %v4398_v45 = vpop.f32.mrf.mxu1 }
0x405e   :  { %6954 = vpow2.f32 %v5936_v53 }
0x405f   :  { %v6278_v35 = vpop.f32.mrf.mxu1 }
0x4069   :  { %v6953_v57 = vpop.eup %6952 }
0x406a   :  { %4411 = vrot.lane.b32.xlu0 %v6953_v57, %s7121_s10 }
0x406b   :  { %v6955_v48 = vpop.eup %6954 }
0x406c   :  { %v4405_v15 = vadd.f32 1.0, %v6955_v48 }
0x406e   :  { %6956 = vrcp.f32 %v4405_v15 }
0x407b   :  { %v6957_v28 = vpop.eup %6956 }
0x407c   :  { %v4409_v44 = vmul.f32 %v6957_v28, %v4345_v31 }
0x40dc   :  { %v4412_v38 = vpop.permute.xlu0 %4411 }
0x40dd   :  { %v4414_v12 = vmul.f32 %v6957_v28, %v4412_v38 }
0x40df   :  { %4416 = vrot.lane.b32.xlu1 %v4414_v12, %s7122_s11 }
0x4151   :  { %v4417_v61 = vpop.permute.xlu1 %4416 }
0x4152   :  { %v4419_v47 = vadd.f32 %v4417_v61, %v4409_v44 }
0x4154   :  { %6958 = vtanh.f32 %v4419_v47 }
0x4161   :  { %v6959_v2 = vpop.eup %6958 }
0x4162   :  { %4422 = vrot.lane.b32.xlu0 %v6959_v2, %s7121_s10  ;;  %v2586_v2 = vadd.f32 %v8528_v18, %v8261_v19 }
0x41d4   :  { %v4423_v33 = vpop.permute.xlu0 %4422 }
0x41d5   :  { %v4425_v3 = vmul.f32 %v6957_v28, %v4423_v33 }
0x41d7   :  { %v4428_v62 = vpack.c.bf16 %v4425_v3, %v4425_v3 }
0x41d9   :  { %4430 = vrot.lane.b32.xlu1 %v4428_v62, %s7122_s11 }
0x424b   :  { %v4431_v20 = vpop.permute.xlu1 %4430 }
0x424c   :  { %6284 = vmatmul.mubr.msk.bf16.vlgmr.msra.gmra.mxu0 %vm2655_vm3, %v4431_v20 }
0x424d   :  { %6296 = vmatpush3.bf16.msra.mxu0 %v8540_v0  ;;  %6299 = vmatprep.mubr.msk.bf16.mxu0 %vm7120_vm2, %v8957_v40 }
0x424e   :  { %6297 = vmatprep.subr.bf16.mxu0 %v8957_v40 }
0x4251   :  { %6298 = vmatpush3.bf16.msra.mxu0 %v8549_v5 }
0x4252   :  { %6311 = vmatprep.subr.bf16.mxu0 %v8957_v40 }
0x430c   :  { %v4469_v16 = vpop.f32.mrf.mxu0 }
0x430d   :  { %v4475_v17 = vadd.f32 %v4469_v16, %v2584_v8 }
0x430e   :  { %v6285_v30 = vpop.f32.mrf.mxu0 }
0x430f   :  { %6960 = vtanh.f32 %v4475_v17  ;;  %v5938_v29 = vmul.f32 -1.442695, %v4475_v17 }
0x4310   :  { %v4472_v56 = vpop.f32.mrf.mxu0 }
0x4311   :  { %6962 = vpow2.f32 %v5938_v29 }
0x4312   :  { %v6286_v14 = vpop.f32.mrf.mxu0 }
0x431c   :  { %v6961_v42 = vpop.eup %6960 }
0x431d   :  { %4485 = vrot.lane.b32.xlu0 %v6961_v42, %s7121_s10 }
0x431e   :  { %v6963_v11 = vpop.eup %6962 }
0x431f   :  { %v4479_v55 = vadd.f32 1.0, %v6963_v11 }
0x4321   :  { %6964 = vrcp.f32 %v4479_v55 }
0x432e   :  { %v6965_v37 = vpop.eup %6964 }
0x432f   :  { %v4483_v10 = vmul.f32 %v6965_v37, %v4419_v47 }
0x438f   :  { %v4486_v21 = vpop.permute.xlu0 %4485 }
0x4390   :  { %v4488_v43 = vmul.f32 %v6965_v37, %v4486_v21 }
0x4392   :  { %4490 = vrot.lane.b32.xlu1 %v4488_v43, %s7122_s11 }
0x4404   :  { %v4491_v7 = vpop.permute.xlu1 %4490 }
0x4405   :  { %v4493_v27 = vadd.f32 %v4491_v7, %v4483_v10 }
0x4407   :  { %6966 = vtanh.f32 %v4493_v27 }
0x4414   :  { %v6967_v51 = vpop.eup %6966 }
0x4415   :  { %4496 = vrot.lane.b32.xlu0 %v6967_v51, %s7121_s10 }
0x4487   :  { %v4497_v13 = vpop.permute.xlu0 %4496 }
0x4488   :  { %v4499_v39 = vmul.f32 %v6965_v37, %v4497_v13 }
0x448a   :  { %v4502_v31 = vpack.c.bf16 %v4499_v39, %v4499_v39 }
0x448c   :  { %4504 = vrot.lane.b32.xlu1 %v4502_v31, %s7122_s11 }
0x44fe   :  { %v4505_v50 = vpop.permute.xlu1 %4504 }
0x44ff   :  { %6292 = vmatmul.mubr.msk.bf16.vlgmr.msra.gmra.mxu1 %vm2655_vm3, %v4505_v50 }
0x4500   :  { %6304 = vmatpush3.bf16.msra.mxu1 %v8540_v0  ;;  %6307 = vmatprep.mubr.msk.bf16.mxu1 %vm7120_vm2, %v8957_v40 }
0x4501   :  { %6305 = vmatprep.subr.bf16.mxu1 %v8957_v40 }
0x4504   :  { %6306 = vmatpush3.bf16.msra.mxu1 %v8549_v5 }
0x4505   :  { %6319 = vmatprep.subr.bf16.mxu1 %v8957_v40 }
0x45bf   :  { %v4543_v54 = vpop.f32.mrf.mxu1 }
0x45c0   :  { %v4549_v49 = vadd.f32 %v4543_v54, %v2585_v34 }
0x45c1   :  { %v6293_v63 = vpop.f32.mrf.mxu1 }
0x45c2   :  { %6968 = vtanh.f32 %v4549_v49  ;;  %v5940_v60 = vmul.f32 -1.442695, %v4549_v49 }
0x45c3   :  { %v4546_v6 = vpop.f32.mrf.mxu1 }
0x45c4   :  { %6970 = vpow2.f32 %v5940_v60 }
0x45c5   :  { %v6294_v52 = vpop.f32.mrf.mxu1 }
0x45cf   :  { %v6969_v59 = vpop.eup %6968 }
0x45d0   :  { %4559 = vrot.lane.b32.xlu0 %v6969_v59, %s7121_s10 }
0x45d1   :  { %v6971_v45 = vpop.eup %6970 }
0x45d2   :  { %v4553_v35 = vadd.f32 1.0, %v6971_v45 }
0x45d4   :  { %6972 = vrcp.f32 %v4553_v35 }
0x45e1   :  { %v6973_v57 = vpop.eup %6972 }
0x45e2   :  { %v4557_v4 = vmul.f32 %v6973_v57, %v4493_v27  ;;  %v2587_v27 = vadd.f32 %v8528_v18, %v8267_v58 }
0x4642   :  { %v4560_v53 = vpop.permute.xlu0 %4559 }
0x4643   :  { %v4562_v48 = vmul.f32 %v6973_v57, %v4560_v53 }
0x4645   :  { %4564 = vrot.lane.b32.xlu1 %v4562_v48, %s7122_s11 }
0x46b7   :  { %v4565_v15 = vpop.permute.xlu1 %4564 }
0x46b8   :  { %v4567_v28 = vadd.f32 %v4565_v15, %v4557_v4  ;;  %v2588_v15 = vadd.f32 %v8528_v18, %v8270_v23 }
0x46ba   :  { %6974 = vtanh.f32 %v4567_v28 }
0x46c7   :  { %v6975_v38 = vpop.eup %6974 }
0x46c8   :  { %4570 = vrot.lane.b32.xlu0 %v6975_v38, %s7121_s10 }
0x473a   :  { %v4571_v12 = vpop.permute.xlu0 %4570 }
0x473b   :  { %v4573_v44 = vmul.f32 %v6973_v57, %v4571_v12 }
0x473d   :  { %v4576_v61 = vpack.c.bf16 %v4573_v44, %v4573_v44 }
0x473f   :  { %4578 = vrot.lane.b32.xlu1 %v4576_v61, %s7122_s11 }
0x47b1   :  { %v4579_v47 = vpop.permute.xlu1 %4578 }
0x47b2   :  { %6300 = vmatmul.mubr.msk.bf16.vlgmr.msra.gmra.mxu0 %vm2655_vm3, %v4579_v47 }
0x47b3   :  { %6312 = vmatpush3.bf16.msra.mxu0 %v8540_v0  ;;  %6315 = vmatprep.mubr.msk.bf16.mxu0 %vm7120_vm2, %v8957_v40 }
0x47b4   :  { %6313 = vmatprep.subr.bf16.mxu0 %v8957_v40 }
0x47b7   :  { %6314 = vmatpush3.bf16.msra.mxu0 %v8549_v5 }
0x47b8   :  { %6327 = vmatprep.subr.bf16.mxu0 %v8957_v40 }
0x4872   :  { %v4617_v33 = vpop.f32.mrf.mxu0 }
0x4873   :  { %v4623_v3 = vadd.f32 %v4617_v33, %v2586_v2 }
0x4874   :  { %v6301_v62 = vpop.f32.mrf.mxu0 }
0x4875   :  { %6976 = vtanh.f32 %v4623_v3  ;;  %v5942_v17 = vmul.f32 -1.442695, %v4623_v3 }
0x4876   :  { %v4620_v20 = vpop.f32.mrf.mxu0 }
0x4877   :  { %6978 = vpow2.f32 %v5942_v17 }
0x4878   :  { %v6302_v8 = vpop.f32.mrf.mxu0 }
0x4882   :  { %v6977_v16 = vpop.eup %6976 }
0x4883   :  { %4633 = vrot.lane.b32.xlu0 %v6977_v16, %s7121_s10 }
0x4884   :  { %v6979_v30 = vpop.eup %6978 }
0x4885   :  { %v4627_v56 = vadd.f32 1.0, %v6979_v30 }
0x4887   :  { %6980 = vrcp.f32 %v4627_v56 }
0x4894   :  { %v6981_v14 = vpop.eup %6980 }
0x4895   :  { %v4631_v19 = vmul.f32 %v6981_v14, %v4567_v28 }
0x48f5   :  { %v4634_v42 = vpop.permute.xlu0 %4633 }
0x48f6   :  { %v4636_v29 = vmul.f32 %v6981_v14, %v4634_v42 }
0x48f8   :  { %4638 = vrot.lane.b32.xlu1 %v4636_v29, %s7122_s11 }
0x496a   :  { %v4639_v11 = vpop.permute.xlu1 %4638 }
0x496b   :  { %v4641_v55 = vadd.f32 %v4639_v11, %v4631_v19  ;;  %v2589_v19 = vadd.f32 %v8528_v18, %v8276_v32 }
0x496d   :  { %6982 = vtanh.f32 %v4641_v55 }
0x497a   :  { %v6983_v37 = vpop.eup %6982 }
0x497b   :  { %4644 = vrot.lane.b32.xlu0 %v6983_v37, %s7121_s10 }
0x49ed   :  { %v4645_v21 = vpop.permute.xlu0 %4644 }
0x49ee   :  { %v4647_v43 = vmul.f32 %v6981_v14, %v4645_v21 }
0x49f0   :  { %v4650_v10 = vpack.c.bf16 %v4647_v43, %v4647_v43 }
0x49f2   :  { %4652 = vrot.lane.b32.xlu1 %v4650_v10, %s7122_s11 }
0x4a64   :  { %v4653_v7 = vpop.permute.xlu1 %4652 }
0x4a65   :  { %6308 = vmatmul.mubr.msk.bf16.vlgmr.msra.gmra.mxu1 %vm2655_vm3, %v4653_v7 }
0x4a66   :  { %6320 = vmatpush3.bf16.msra.mxu1 %v8540_v0  ;;  %6323 = vmatprep.mubr.msk.bf16.mxu1 %vm7120_vm2, %v8957_v40 }
0x4a67   :  { %6321 = vmatprep.subr.bf16.mxu1 %v8957_v40 }
0x4a6a   :  { %6322 = vmatpush3.bf16.msra.mxu1 %v8549_v5 }
0x4a6b   :  { %6335 = vmatprep.subr.bf16.mxu1 %v8957_v40 }
0x4b25   :  { %v4691_v51 = vpop.f32.mrf.mxu1 }
0x4b26   :  { %v4697_v13 = vadd.f32 %v4691_v51, %v2587_v27 }
0x4b27   :  { %v6309_v39 = vpop.f32.mrf.mxu1 }
0x4b28   :  { %6984 = vtanh.f32 %v4697_v13  ;;  %v5944_v54 = vmul.f32 -1.442695, %v4697_v13 }
0x4b29   :  { %v4694_v31 = vpop.f32.mrf.mxu1 }
0x4b2a   :  { %6986 = vpow2.f32 %v5944_v54 }
0x4b2b   :  { %v6310_v50 = vpop.f32.mrf.mxu1 }
0x4b35   :  { %v6985_v34 = vpop.eup %6984 }
0x4b36   :  { %4707 = vrot.lane.b32.xlu0 %v6985_v34, %s7121_s10 }
0x4b37   :  { %v6987_v49 = vpop.eup %6986 }
0x4b38   :  { %v4701_v63 = vadd.f32 1.0, %v6987_v49 }
0x4b3a   :  { %6988 = vrcp.f32 %v4701_v63 }
0x4b47   :  { %v6989_v6 = vpop.eup %6988 }
0x4b48   :  { %v4705_v58 = vmul.f32 %v6989_v6, %v4641_v55 }
0x4ba8   :  { %v4708_v52 = vpop.permute.xlu0 %4707 }
0x4ba9   :  { %v4710_v59 = vmul.f32 %v6989_v6, %v4708_v52  ;;  %v8738_v52 = vld [vmem:[%s8861_s2] ss:$0 sm:$0xff] }
0x4bab   :  { %4712 = vrot.lane.b32.xlu1 %v4710_v59, %s7122_s11  ;;  %v2590_v59 = vadd.f32 %v8738_v52, %v8279_v26 }
0x4c1d   :  { %v4713_v60 = vpop.permute.xlu1 %4712 }
0x4c1e   :  { %v4715_v45 = vadd.f32 %v4713_v60, %v4705_v58 }
0x4c20   :  { %6990 = vtanh.f32 %v4715_v45 }
0x4c2d   :  { %v6991_v35 = vpop.eup %6990 }
0x4c2e   :  { %4718 = vrot.lane.b32.xlu0 %v6991_v35, %s7121_s10 }
0x4ca0   :  { %v4719_v57 = vpop.permute.xlu0 %4718 }
0x4ca1   :  { %v4721_v53 = vmul.f32 %v6989_v6, %v4719_v57 }
0x4ca3   :  { %v4724_v48 = vpack.c.bf16 %v4721_v53, %v4721_v53 }
0x4ca5   :  { %4726 = vrot.lane.b32.xlu1 %v4724_v48, %s7122_s11 }
0x4d17   :  { %v4727_v4 = vpop.permute.xlu1 %4726 }
0x4d18   :  { %6316 = vmatmul.mubr.msk.bf16.vlgmr.msra.gmra.mxu0 %vm2655_vm3, %v4727_v4 }
0x4d19   :  { %6328 = vmatpush3.bf16.msra.mxu0 %v8540_v0  ;;  %6331 = vmatprep.mubr.msk.bf16.mxu0 %vm7120_vm2, %v8957_v40 }
0x4d1a   :  { %6329 = vmatprep.subr.bf16.mxu0 %v8957_v40 }
0x4d1d   :  { %6330 = vmatpush3.bf16.msra.mxu0 %v8549_v5 }
0x4d1e   :  { %6343 = vmatprep.subr.bf16.mxu0 %v8957_v40 }
0x4dd8   :  { %v4765_v28 = vpop.f32.mrf.mxu0 }
0x4dd9   :  { %v4771_v38 = vadd.f32 %v4765_v28, %v2588_v15 }
0x4dda   :  { %v6317_v12 = vpop.f32.mrf.mxu0 }
0x4ddb   :  { %6992 = vtanh.f32 %v4771_v38  ;;  %v5946_v2 = vmul.f32 -1.442695, %v4771_v38 }
0x4ddc   :  { %v4768_v44 = vpop.f32.mrf.mxu0 }
0x4ddd   :  { %6994 = vpow2.f32 %v5946_v2 }
0x4dde   :  { %v6318_v61 = vpop.f32.mrf.mxu0 }
0x4de8   :  { %v6993_v47 = vpop.eup %6992 }
0x4de9   :  { %4781 = vrot.lane.b32.xlu0 %v6993_v47, %s7121_s10 }
0x4dea   :  { %v6995_v33 = vpop.eup %6994 }
0x4deb   :  { %v4775_v3 = vadd.f32 1.0, %v6995_v33 }
0x4ded   :  { %6996 = vrcp.f32 %v4775_v3  ;;  %v8750_v3 = vld [vmem:[%s8862_s3 + $0x8] sm:$0xff]  }
0x4dfa   :  { %v6997_v62 = vpop.eup %6996 }
0x4dfb   :  { %v4779_v23 = vmul.f32 %v6997_v62, %v4715_v45 }
0x4e5b   :  { %v4782_v20 = vpop.permute.xlu0 %4781 }
0x4e5c   :  { %v4784_v8 = vmul.f32 %v6997_v62, %v4782_v20  ;;  %v2591_v20 = vadd.f32 %v8738_v52, %v8285_v9 }
0x4e5e   :  { %4786 = vrot.lane.b32.xlu1 %v4784_v8, %s7122_s11 }
0x4ed0   :  { %v4787_v16 = vpop.permute.xlu1 %4786 }
0x4ed1   :  { %v4789_v17 = vadd.f32 %v4787_v16, %v4779_v23 }
0x4ed3   :  { %6998 = vtanh.f32 %v4789_v17 }
0x4ee0   :  { %v6999_v30 = vpop.eup %6998 }
0x4ee1   :  { %4792 = vrot.lane.b32.xlu0 %v6999_v30, %s7121_s10 }
0x4f53   :  { %v4793_v56 = vpop.permute.xlu0 %4792 }
0x4f54   :  { %v4795_v14 = vmul.f32 %v6997_v62, %v4793_v56  ;;  %v8759_v62 = vld [vmem:[%s8862_s3] sm:$0xff]  }
0x4f56   :  { %v4798_v42 = vpack.c.bf16 %v4795_v14, %v4795_v14 }
0x4f58   :  { %4800 = vrot.lane.b32.xlu1 %v4798_v42, %s7122_s11 }
0x4fca   :  { %v4801_v29 = vpop.permute.xlu1 %4800 }
0x4fcb   :  { %6324 = vmatmul.mubr.msk.bf16.vlgmr.msra.gmra.mxu1 %vm2655_vm3, %v4801_v29 }
0x4fcc   :  { %6336 = vmatpush3.bf16.msra.mxu1 %v8540_v0  ;;  %6339 = vmatprep.mubr.msk.bf16.mxu1 %vm7120_vm2, %v8957_v40 }
0x4fcd   :  { %6337 = vmatprep.subr.bf16.mxu1 %v8957_v40 }
0x4fd0   :  { %6338 = vmatpush3.bf16.msra.mxu1 %v8549_v5 }
0x4fd1   :  { %6351 = vmatprep.subr.bf16.mxu1 %v8957_v40 }
0x508b   :  { %v4839_v11 = vpop.f32.mrf.mxu1 }
0x508c   :  { %v4845_v55 = vadd.f32 %v4839_v11, %v2589_v19 }
0x508d   :  { %v6325_v37 = vpop.f32.mrf.mxu1 }
0x508e   :  { %7000 = vtanh.f32 %v4845_v55  ;;  %v5948_v7 = vmul.f32 -1.442695, %v4845_v55 }
0x508f   :  { %v4842_v21 = vpop.f32.mrf.mxu1 }
0x5090   :  { %7002 = vpow2.f32 %v5948_v7 }
0x5091   :  { %v6326_v43 = vpop.f32.mrf.mxu1 }
0x509b   :  { %v7001_v10 = vpop.eup %7000 }
0x509c   :  { %4855 = vrot.lane.b32.xlu0 %v7001_v10, %s7121_s10 }
0x509d   :  { %v7003_v27 = vpop.eup %7002 }
0x509e   :  { %v4849_v51 = vadd.f32 1.0, %v7003_v27 }
0x50a0   :  { %7004 = vrcp.f32 %v4849_v51 }
0x50ad   :  { %v7005_v13 = vpop.eup %7004 }
0x50ae   :  { %v4853_v32 = vmul.f32 %v7005_v13, %v4789_v17 }
0x510e   :  { %v4856_v39 = vpop.permute.xlu0 %4855 }
0x510f   :  { %v4858_v31 = vmul.f32 %v7005_v13, %v4856_v39 }
0x5111   :  { %4860 = vrot.lane.b32.xlu1 %v4858_v31, %s7122_s11 }
0x5183   :  { %v4861_v18 = vpop.permute.xlu1 %4860 }
0x5184   :  { %v4863_v50 = vadd.f32 %v4861_v18, %v4853_v32 }
0x5186   :  { %7006 = vtanh.f32 %v4863_v50 }
0x5193   :  { %v7007_v34 = vpop.eup %7006 }
0x5194   :  { %4866 = vrot.lane.b32.xlu0 %v7007_v34, %s7121_s10 }
0x5206   :  { %v4867_v54 = vpop.permute.xlu0 %4866 }
0x5207   :  { %v4869_v49 = vmul.f32 %v7005_v13, %v4867_v54  ;;  %v2592_v13 = vadd.f32 %v8738_v52, %v8288_v22 }
0x5209   :  { %v4872_v63 = vpack.c.bf16 %v4869_v49, %v4869_v49 }
0x520b   :  { %4874 = vrot.lane.b32.xlu1 %v4872_v63, %s7122_s11 }
0x527d   :  { %v4875_v6 = vpop.permute.xlu1 %4874 }
0x527e   :  { %6332 = vmatmul.mubr.msk.bf16.vlgmr.msra.gmra.mxu0 %vm2655_vm3, %v4875_v6 }
0x527f   :  { %6344 = vmatpush3.bf16.msra.mxu0 %v8540_v0  ;;  %6347 = vmatprep.mubr.msk.bf16.mxu0 %vm7120_vm2, %v8957_v40 }
0x5280   :  { %6345 = vmatprep.subr.bf16.mxu0 %v8957_v40 }
0x5283   :  { %6346 = vmatpush3.bf16.msra.mxu0 %v8549_v5 }
0x5284   :  { %6359 = vmatprep.subr.bf16.mxu0 %v8957_v40 }
0x533e   :  { %v4913_v58 = vpop.f32.mrf.mxu0 }
0x533f   :  { %v4919_v60 = vadd.f32 %v4913_v58, %v2590_v59 }
0x5340   :  { %v6333_v0 = vpop.f32.mrf.mxu0 }
0x5341   :  { %7008 = vtanh.f32 %v4919_v60  ;;  %v5950_v5 = vmul.f32 -1.442695, %v4919_v60 }
0x5342   :  { %v4916_v45 = vpop.f32.mrf.mxu0 }
0x5343   :  { %7010 = vpow2.f32 %v5950_v5 }
0x5344   :  { %v6334_v35 = vpop.f32.mrf.mxu0 }
0x534e   :  { %v7009_v57 = vpop.eup %7008 }
0x534f   :  { %4929 = vrot.lane.b32.xlu0 %v7009_v57, %s7121_s10 }
0x5350   :  { %v7011_v53 = vpop.eup %7010 }
0x5351   :  { %v4923_v48 = vadd.f32 1.0, %v7011_v53 }
0x5353   :  { %7012 = vrcp.f32 %v4923_v48  ;;  %v2593_v48 = vadd.f32 %v8738_v52, %v8294_v36 }
0x5360   :  { %v7013_v4 = vpop.eup %7012 }
0x5361   :  { %v4927_v26 = vmul.f32 %v7013_v4, %v4863_v50 }
0x53c1   :  { %v4930_v15 = vpop.permute.xlu0 %4929 }
0x53c2   :  { %v4932_v28 = vmul.f32 %v7013_v4, %v4930_v15 }
0x53c4   :  { %4934 = vrot.lane.b32.xlu1 %v4932_v28, %s7122_s11 }
0x5436   :  { %v4935_v38 = vpop.permute.xlu1 %4934 }
0x5437   :  { %v4937_v12 = vadd.f32 %v4935_v38, %v4927_v26 }
0x5439   :  { %7014 = vtanh.f32 %v4937_v12 }
0x5446   :  { %v7015_v44 = vpop.eup %7014 }
0x5447   :  { %4940 = vrot.lane.b32.xlu0 %v7015_v44, %s7121_s10 }
0x54b9   :  { %v4941_v61 = vpop.permute.xlu0 %4940 }
0x54ba   :  { %v4943_v47 = vmul.f32 %v7013_v4, %v4941_v61 }
0x54bc   :  { %v4946_v2 = vpack.c.bf16 %v4943_v47, %v4943_v47 }
0x54be   :  { %4948 = vrot.lane.b32.xlu1 %v4946_v2, %s7122_s11 }
0x5530   :  { %v4949_v33 = vpop.permute.xlu1 %4948 }
0x5531   :  { %6340 = vmatmul.mubr.msk.bf16.vlgmr.msra.gmra.mxu1 %vm2655_vm3, %v4949_v33 }
0x5532   :  { %6352 = vmatpush3.bf16.msra.mxu1 %v8750_v3  ;;  %6355 = vmatprep.mubr.msk.bf16.mxu1 %vm7120_vm2, %v8957_v40 }
0x5533   :  { %6353 = vmatprep.subr.bf16.mxu1 %v8957_v40 }
0x5536   :  { %6354 = vmatpush3.bf16.msra.mxu1 %v8759_v62 }
0x5537   :  { %6367 = vmatprep.subr.bf16.mxu1 %v8957_v40 }
0x55f1   :  { %v4987_v8 = vpop.f32.mrf.mxu1 }
0x55f2   :  { %v4993_v23 = vadd.f32 %v4987_v8, %v2591_v20 }
0x55f3   :  { %v6341_v16 = vpop.f32.mrf.mxu1 }
0x55f4   :  { %7016 = vtanh.f32 %v4993_v23  ;;  %v5952_v14 = vmul.f32 -1.442695, %v4993_v23 }
0x55f5   :  { %v4990_v17 = vpop.f32.mrf.mxu1 }
0x55f6   :  { %7018 = vpow2.f32 %v5952_v14 }
0x55f7   :  { %v6342_v30 = vpop.f32.mrf.mxu1 }
0x5601   :  { %v7017_v56 = vpop.eup %7016 }
0x5602   :  { %5003 = vrot.lane.b32.xlu0 %v7017_v56, %s7121_s10 }
0x5603   :  { %v7019_v42 = vpop.eup %7018 }
0x5604   :  { %v4997_v29 = vadd.f32 1.0, %v7019_v42  ;;  %v2594_v42 = vadd.f32 %v8738_v52, %v8297_v1 }
0x5606   :  { %7020 = vrcp.f32 %v4997_v29 }
0x5613   :  { %v7021_v19 = vpop.eup %7020 }
0x5614   :  { %v5001_v9 = vmul.f32 %v7021_v19, %v4937_v12 }
0x5674   :  { %v5004_v11 = vpop.permute.xlu0 %5003 }
0x5675   :  { %v5006_v55 = vmul.f32 %v7021_v19, %v5004_v11 }
0x5677   :  { %5008 = vrot.lane.b32.xlu1 %v5006_v55, %s7122_s11 }
0x56e9   :  { %v5009_v37 = vpop.permute.xlu1 %5008 }
0x56ea   :  { %v5011_v21 = vadd.f32 %v5009_v37, %v5001_v9 }
0x56ec   :  { %7022 = vtanh.f32 %v5011_v21 }
0x56f9   :  { %v7023_v43 = vpop.eup %7022 }
0x56fa   :  { %5014 = vrot.lane.b32.xlu0 %v7023_v43, %s7121_s10 }
0x576c   :  { %v5015_v10 = vpop.permute.xlu0 %5014 }
0x576d   :  { %v5017_v7 = vmul.f32 %v7021_v19, %v5015_v10 }
0x576f   :  { %v5020_v27 = vpack.c.bf16 %v5017_v7, %v5017_v7 }
0x5771   :  { %5022 = vrot.lane.b32.xlu1 %v5020_v27, %s7122_s11 }
0x57e3   :  { %v5023_v51 = vpop.permute.xlu1 %5022 }
0x57e4   :  { %6348 = vmatmul.mubr.msk.bf16.vlgmr.msra.gmra.mxu0 %vm2655_vm3, %v5023_v51 }
0x57e5   :  { %6360 = vmatpush3.bf16.msra.mxu0 %v8750_v3  ;;  %6363 = vmatprep.mubr.msk.bf16.mxu0 %vm7120_vm2, %v8957_v40 }
0x57e6   :  { %6361 = vmatprep.subr.bf16.mxu0 %v8957_v40 }
0x57e9   :  { %6362 = vmatpush3.bf16.msra.mxu0 %v8759_v62 }
0x57ea   :  { %6375 = vmatprep.subr.bf16.mxu0 %v8957_v40 }
0x58a4   :  { %v5061_v39 = vpop.f32.mrf.mxu0 }
0x58a5   :  { %v5067_v31 = vadd.f32 %v5061_v39, %v2592_v13 }
0x58a6   :  { %v6349_v32 = vpop.f32.mrf.mxu0 }
0x58a7   :  { %7024 = vtanh.f32 %v5067_v31  ;;  %v5954_v54 = vmul.f32 -1.442695, %v5067_v31 }
0x58a8   :  { %v5064_v18 = vpop.f32.mrf.mxu0 }
0x58a9   :  { %7026 = vpow2.f32 %v5954_v54  ;;  %v2595_v54 = vadd.f32 %v8738_v52, %v8303_v46 }
0x58aa   :  { %v6350_v50 = vpop.f32.mrf.mxu0 }
0x58b4   :  { %v7025_v34 = vpop.eup %7024 }
0x58b5   :  { %5077 = vrot.lane.b32.xlu0 %v7025_v34, %s7121_s10 }
0x58b6   :  { %v7027_v49 = vpop.eup %7026 }
0x58b7   :  { %v5071_v63 = vadd.f32 1.0, %v7027_v49 }
0x58b9   :  { %7028 = vrcp.f32 %v5071_v63 }
0x58c6   :  { %v7029_v6 = vpop.eup %7028 }
0x58c7   :  { %v5075_v22 = vmul.f32 %v7029_v6, %v5011_v21 }
0x5927   :  { %v5078_v59 = vpop.permute.xlu0 %5077 }
0x5928   :  { %v5080_v58 = vmul.f32 %v7029_v6, %v5078_v59 }
0x592a   :  { %5082 = vrot.lane.b32.xlu1 %v5080_v58, %s7122_s11 }
0x599c   :  { %v5083_v60 = vpop.permute.xlu1 %5082 }
0x599d   :  { %v5085_v0 = vadd.f32 %v5083_v60, %v5075_v22 }
0x599f   :  { %7030 = vtanh.f32 %v5085_v0 }
0x59ac   :  { %v7031_v45 = vpop.eup %7030 }
0x59ad   :  { %5088 = vrot.lane.b32.xlu0 %v7031_v45, %s7121_s10 }
0x5a1f   :  { %v5089_v35 = vpop.permute.xlu0 %5088 }
0x5a20   :  { %v5091_v57 = vmul.f32 %v7029_v6, %v5089_v35 }
0x5a22   :  { %v5094_v5 = vpack.c.bf16 %v5091_v57, %v5091_v57 }
0x5a24   :  { %5096 = vrot.lane.b32.xlu1 %v5094_v5, %s7122_s11 }
0x5a96   :  { %v5097_v53 = vpop.permute.xlu1 %5096 }
0x5a97   :  { %6356 = vmatmul.mubr.msk.bf16.vlgmr.msra.gmra.mxu1 %vm2655_vm3, %v5097_v53 }
0x5a98   :  { %6368 = vmatpush3.bf16.msra.mxu1 %v8750_v3  ;;  %6371 = vmatprep.mubr.msk.bf16.mxu1 %vm7120_vm2, %v8957_v40 }
0x5a99   :  { %6369 = vmatprep.subr.bf16.mxu1 %v8957_v40 }
0x5a9c   :  { %6370 = vmatpush3.bf16.msra.mxu1 %v8759_v62 }
0x5a9d   :  { %6383 = vmatprep.subr.bf16.mxu1 %v8957_v40 }
0x5b57   :  { %v5135_v4 = vpop.f32.mrf.mxu1 }
0x5b58   :  { %v5141_v15 = vadd.f32 %v5135_v4, %v2593_v48 }
0x5b59   :  { %v6357_v28 = vpop.f32.mrf.mxu1 }
0x5b5a   :  { %7032 = vtanh.f32 %v5141_v15  ;;  %v5956_v44 = vmul.f32 -1.442695, %v5141_v15 }
0x5b5b   :  { %v5138_v26 = vpop.f32.mrf.mxu1 }
0x5b5c   :  { %7034 = vpow2.f32 %v5956_v44 }
0x5b5d   :  { %v6358_v38 = vpop.f32.mrf.mxu1 }
0x5b67   :  { %v7033_v12 = vpop.eup %7032 }
0x5b68   :  { %5151 = vrot.lane.b32.xlu0 %v7033_v12, %s7121_s10  ;;  %v2596_v12 = vadd.f32 %v8738_v52, %v8306_v24 }
0x5b69   :  { %v7035_v61 = vpop.eup %7034 }
0x5b6a   :  { %v5145_v47 = vadd.f32 1.0, %v7035_v61 }
0x5b6c   :  { %7036 = vrcp.f32 %v5145_v47 }
0x5b79   :  { %v7037_v2 = vpop.eup %7036 }
0x5b7a   :  { %v5149_v36 = vmul.f32 %v7037_v2, %v5085_v0 }
0x5bda   :  { %v5152_v33 = vpop.permute.xlu0 %5151 }
0x5bdb   :  { %v5154_v20 = vmul.f32 %v7037_v2, %v5152_v33 }
0x5bdd   :  { %5156 = vrot.lane.b32.xlu1 %v5154_v20, %s7122_s11 }
0x5c4f   :  { %v5157_v8 = vpop.permute.xlu1 %5156 }
0x5c50   :  { %v5159_v23 = vadd.f32 %v5157_v8, %v5149_v36 }
0x5c52   :  { %7038 = vtanh.f32 %v5159_v23 }
0x5c5f   :  { %v7039_v16 = vpop.eup %7038 }
0x5c60   :  { %5162 = vrot.lane.b32.xlu0 %v7039_v16, %s7121_s10 }
0x5cd2   :  { %v5163_v17 = vpop.permute.xlu0 %5162 }
0x5cd3   :  { %v5165_v30 = vmul.f32 %v7037_v2, %v5163_v17 }
0x5cd5   :  { %v5168_v56 = vpack.c.bf16 %v5165_v30, %v5165_v30 }
0x5cd7   :  { %5170 = vrot.lane.b32.xlu1 %v5168_v56, %s7122_s11 }
0x5d49   :  { %v5171_v14 = vpop.permute.xlu1 %5170 }
0x5d4a   :  { %6364 = vmatmul.mubr.msk.bf16.vlgmr.msra.gmra.mxu0 %vm2655_vm3, %v5171_v14 }
0x5d4b   :  { %6376 = vmatpush3.bf16.msra.mxu0 %v8750_v3  ;;  %6379 = vmatprep.mubr.msk.bf16.mxu0 %vm7120_vm2, %v8957_v40 }
0x5d4c   :  { %6377 = vmatprep.subr.bf16.mxu0 %v8957_v40 }
0x5d4f   :  { %6378 = vmatpush3.bf16.msra.mxu0 %v8759_v62 }
0x5d50   :  { %6391 = vmatprep.subr.bf16.mxu0 %v8957_v40 }
0x5e0a   :  { %v5209_v29 = vpop.f32.mrf.mxu0 }
0x5e0b   :  { %v5215_v19 = vadd.f32 %v5209_v29, %v2594_v42 }
0x5e0c   :  { %v6365_v11 = vpop.f32.mrf.mxu0 }
0x5e0d   :  { %7040 = vtanh.f32 %v5215_v19  ;;  %v5958_v21 = vmul.f32 -1.442695, %v5215_v19  ;;  %v2597_v19 = vadd.f32 %v8738_v52, %v8316_v25 }
0x5e0e   :  { %v5212_v55 = vpop.f32.mrf.mxu0 }
0x5e0f   :  { %7042 = vpow2.f32 %v5958_v21 }
0x5e10   :  { %v6366_v9 = vpop.f32.mrf.mxu0 }
0x5e1a   :  { %v7041_v37 = vpop.eup %7040 }
0x5e1b   :  { %5225 = vrot.lane.b32.xlu0 %v7041_v37, %s7121_s10 }
0x5e1c   :  { %v7043_v43 = vpop.eup %7042 }
0x5e1d   :  { %v5219_v10 = vadd.f32 1.0, %v7043_v43 }
0x5e1f   :  { %7044 = vrcp.f32 %v5219_v10 }
0x5e2c   :  { %v7045_v7 = vpop.eup %7044 }
0x5e2d   :  { %v5223_v1 = vmul.f32 %v7045_v7, %v5159_v23 }
0x5e8d   :  { %v5226_v27 = vpop.permute.xlu0 %5225 }
0x5e8e   :  { %v5228_v51 = vmul.f32 %v7045_v7, %v5226_v27 }
0x5e90   :  { %5230 = vrot.lane.b32.xlu1 %v5228_v51, %s7122_s11 }
0x5f02   :  { %v5231_v13 = vpop.permute.xlu1 %5230 }
0x5f03   :  { %v5233_v39 = vadd.f32 %v5231_v13, %v5223_v1 }
0x5f05   :  { %7046 = vtanh.f32 %v5233_v39 }
0x5f12   :  { %v7047_v31 = vpop.eup %7046 }
0x5f13   :  { %5236 = vrot.lane.b32.xlu0 %v7047_v31, %s7121_s10 }
0x5f85   :  { %v5237_v32 = vpop.permute.xlu0 %5236 }
0x5f86   :  { %v5239_v18 = vmul.f32 %v7045_v7, %v5237_v32 }
0x5f88   :  { %v5242_v50 = vpack.c.bf16 %v5239_v18, %v5239_v18 }
0x5f8a   :  { %5244 = vrot.lane.b32.xlu1 %v5242_v50, %s7122_s11 }
0x5ffc   :  { %v5245_v34 = vpop.permute.xlu1 %5244 }
0x5ffd   :  { %6372 = vmatmul.mubr.msk.bf16.vlgmr.msra.gmra.mxu1 %vm2655_vm3, %v5245_v34 }
0x5ffe   :  { %6384 = vmatpush3.bf16.msra.mxu1 %v8750_v3  ;;  %6387 = vmatprep.mubr.msk.bf16.mxu1 %vm7120_vm2, %v8957_v40 }
0x5fff   :  { %6385 = vmatprep.subr.bf16.mxu1 %v8957_v40 }
0x6002   :  { %6386 = vmatpush3.bf16.msra.mxu1 %v8759_v62 }
0x60bd   :  { %v5283_v49 = vpop.f32.mrf.mxu1 }
0x60be   :  { %v5289_v63 = vadd.f32 %v5283_v49, %v2595_v54  ;;  %v2598_v49 = vadd.f32 %v8738_v52, %v8320_v41  ;;  %v5967_v41 = vld [vmem:[%s8863_s4] ss:$0 sm:$0xff] }
0x60bf   :  { %v6373_v6 = vpop.f32.mrf.mxu1 }
0x60c0   :  { %7048 = vtanh.f32 %v5289_v63  ;;  %v5960_v60 = vmul.f32 -1.442695, %v5289_v63 }
0x60c1   :  { %v5286_v59 = vpop.f32.mrf.mxu1 }
0x60c2   :  { %7050 = vpow2.f32 %v5960_v60 }
0x60c3   :  { %v6374_v58 = vpop.f32.mrf.mxu1 }
0x60cd   :  { %v7049_v22 = vpop.eup %7048 }
0x60ce   :  { %5299 = vrot.lane.b32.xlu0 %v7049_v22, %s7121_s10 }
0x60cf   :  { %v7051_v0 = vpop.eup %7050 }
0x60d0   :  { %v5293_v45 = vadd.f32 1.0, %v7051_v0 }
0x60d2   :  { %7052 = vrcp.f32 %v5293_v45 }
0x60df   :  { %v7053_v35 = vpop.eup %7052 }
0x60e0   :  { %v5297_v46 = vmul.f32 %v7053_v35, %v5233_v39 }
0x6140   :  { %v5300_v57 = vpop.permute.xlu0 %5299 }
0x6141   :  { %v5302_v5 = vmul.f32 %v7053_v35, %v5300_v57 }
0x6143   :  { %5304 = vrot.lane.b32.xlu1 %v5302_v5, %s7122_s11 }
0x61b5   :  { %v5305_v53 = vpop.permute.xlu1 %5304 }
0x61b6   :  { %v5307_v48 = vadd.f32 %v5305_v53, %v5297_v46 }
0x61b8   :  { %7054 = vtanh.f32 %v5307_v48 }
0x61c5   :  { %v7055_v4 = vpop.eup %7054 }
0x61c6   :  { %5310 = vrot.lane.b32.xlu0 %v7055_v4, %s7121_s10 }
0x6238   :  { %v5311_v15 = vpop.permute.xlu0 %5310 }
0x6239   :  { %v5313_v28 = vmul.f32 %v7053_v35, %v5311_v15 }
0x623b   :  { %v5316_v26 = vpack.c.bf16 %v5313_v28, %v5313_v28 }
0x623d   :  { %5318 = vrot.lane.b32.xlu1 %v5316_v26, %s7122_s11 }
0x62af   :  { %v5319_v38 = vpop.permute.xlu1 %5318 }
0x62b0   :  { %6380 = vmatmul.mubr.msk.bf16.vlgmr.msra.gmra.mxu0 %vm2655_vm3, %v5319_v38 }
0x62b1   :  { %6392 = vmatpush3.bf16.msra.mxu0 %v8750_v3  ;;  %6395 = vmatprep.mubr.msk.bf16.mxu0 %vm7120_vm2, %v8957_v40 }
0x62b2   :  { %6393 = vmatprep.subr.bf16.mxu0 %v8957_v40 }
0x62b5   :  { %6394 = vmatpush3.bf16.msra.mxu0 %v8759_v62 }
0x6370   :  { %v5357_v44 = vpop.f32.mrf.mxu0 }
0x6371   :  { %v5363_v61 = vadd.f32 %v5357_v44, %v2596_v12 }
0x6372   :  { %v6381_v47 = vpop.f32.mrf.mxu0 }
0x6373   :  { %7056 = vtanh.f32 %v5363_v61  ;;  %v5962_v3 = vmul.f32 -1.442695, %v5363_v61  ;;  %v5968_v61 = vld [vmem:[#allocation3] ss:$0 sm:$0xff] }
0x6374   :  { %v5360_v2 = vpop.f32.mrf.mxu0 }
0x6375   :  { %7058 = vpow2.f32 %v5962_v3 }
0x6376   :  { %v6382_v33 = vpop.f32.mrf.mxu0 }
0x6380   :  { %v7057_v20 = vpop.eup %7056 }
0x6381   :  { %5373 = vrot.lane.b32.xlu0 %v7057_v20, %s7121_s10 }
0x6382   :  { %v7059_v36 = vpop.eup %7058 }
0x6383   :  { %v5367_v8 = vadd.f32 1.0, %v7059_v36 }
0x6385   :  { %7060 = vrcp.f32 %v5367_v8 }
0x6392   :  { %v7061_v40 = vpop.eup %7060 }
0x6393   :  { %v5371_v24 = vmul.f32 %v7061_v40, %v5307_v48 }
0x63f3   :  { %v5374_v23 = vpop.permute.xlu0 %5373 }
0x63f4   :  { %v5376_v62 = vmul.f32 %v7061_v40, %v5374_v23 }
0x63f6   :  { %5378 = vrot.lane.b32.xlu1 %v5376_v62, %s7122_s11 }
0x6468   :  { %v5379_v16 = vpop.permute.xlu1 %5378 }
0x6469   :  { %v5381_v17 = vadd.f32 %v5379_v16, %v5371_v24  ;;  %v5561_v16 = vld [vmem:[%s8865_s6] sm:$0x3]  ;;  %s7124_s6 = smov [#allocation4]  }
0x646b   :  { %7062 = vtanh.f32 %v5381_v17 }
0x6478   :  { %v7063_v30 = vpop.eup %7062 }
0x6479   :  { %5384 = vrot.lane.b32.xlu0 %v7063_v30, %s7121_s10 }
0x64eb   :  { %v5385_v56 = vpop.permute.xlu0 %5384 }
0x64ec   :  { %v5387_v14 = vmul.f32 %v7061_v40, %v5385_v56 }
0x64ee   :  { %v5390_v42 = vpack.c.bf16 %v5387_v14, %v5387_v14 }
0x64f0   :  { %5392 = vrot.lane.b32.xlu1 %v5390_v42, %s7122_s11 }
0x6562   :  { %v5393_v29 = vpop.permute.xlu1 %5392 }
0x6563   :  { %6388 = vmatmul.mubr.msk.bf16.vlgmr.msra.gmra.mxu1 %vm2655_vm3, %v5393_v29 }
0x6623   :  { %v5431_v11 = vpop.f32.mrf.mxu1 }
0x6624   :  { %v5437_v55 = vadd.f32 %v5431_v11, %v2597_v19 }
0x6625   :  { %v6389_v9 = vpop.f32.mrf.mxu1 }
0x6626   :  { %7064 = vtanh.f32 %v5437_v55  ;;  %v5964_v10 = vmul.f32 -1.442695, %v5437_v55 }
0x6627   :  { %v5434_v37 = vpop.f32.mrf.mxu1 }
0x6628   :  { %7066 = vpow2.f32 %v5964_v10 }
0x6629   :  { %v6390_v21 = vpop.f32.mrf.mxu1 }
0x6633   :  { %v7065_v43 = vpop.eup %7064 }
0x6634   :  { %5447 = vrot.lane.b32.xlu0 %v7065_v43, %s7121_s10 }
0x6635   :  { %v7067_v7 = vpop.eup %7066 }
0x6636   :  { %v5441_v27 = vadd.f32 1.0, %v7067_v7 }
0x6638   :  { %7068 = vrcp.f32 %v5441_v27 }
0x6645   :  { %v7069_v51 = vpop.eup %7068 }
0x6646   :  { %v5445_v25 = vmul.f32 %v7069_v51, %v5381_v17 }
0x66a6   :  { %v5448_v1 = vpop.permute.xlu0 %5447 }
0x66a7   :  { %v5450_v13 = vmul.f32 %v7069_v51, %v5448_v1 }
0x66a9   :  { %5452 = vrot.lane.b32.xlu1 %v5450_v13, %s7122_s11 }
0x671b   :  { %v5453_v39 = vpop.permute.xlu1 %5452 }
0x671c   :  { %v5455_v31 = vadd.f32 %v5453_v39, %v5445_v25 }
0x671e   :  { %7070 = vtanh.f32 %v5455_v31 }
0x672b   :  { %v7071_v32 = vpop.eup %7070 }
0x672c   :  { %5458 = vrot.lane.b32.xlu0 %v7071_v32, %s7121_s10 }
0x679e   :  { %v5459_v18 = vpop.permute.xlu0 %5458 }
0x679f   :  { %v5461_v50 = vmul.f32 %v7069_v51, %v5459_v18 }
0x67a1   :  { %v5464_v34 = vpack.c.bf16 %v5461_v50, %v5461_v50 }
0x67a3   :  { %5466 = vrot.lane.b32.xlu1 %v5464_v34, %s7122_s11 }
0x6815   :  { %v5467_v54 = vpop.permute.xlu1 %5466 }
0x6816   :  { %6396 = vmatmul.mubr.msk.bf16.vlgmr.msra.gmra.mxu0 %vm2655_vm3, %v5467_v54 }
0x68d6   :  { %v5505_v63 = vpop.f32.mrf.mxu0 }
0x68d7   :  { %v5511_v6 = vadd.f32 %v5505_v63, %v2598_v49 }
0x68d8   :  { %v6397_v59 = vpop.f32.mrf.mxu0 }
0x68d9   :  { %7072 = vtanh.f32 %v5511_v6  ;;  %v5966_v0 = vmul.f32 -1.442695, %v5511_v6 }
0x68da   :  { %v5508_v58 = vpop.f32.mrf.mxu0 }
0x68db   :  { %7074 = vpow2.f32 %v5966_v0 }
0x68dc   :  { %v6398_v22 = vpop.f32.mrf.mxu0 }
0x68e6   :  { %v7073_v60 = vpop.eup %7072 }
0x68e7   :  { %5521 = vrot.lane.b32.xlu0 %v7073_v60, %s7121_s10 }
0x68e8   :  { %v7075_v45 = vpop.eup %7074 }
0x68e9   :  { %v5515_v35 = vadd.f32 1.0, %v7075_v45 }
0x68eb   :  { %7076 = vrcp.f32 %v5515_v35 }
0x68f8   :  { %v7077_v57 = vpop.eup %7076 }
0x68f9   :  { %v5519_v52 = vmul.f32 %v7077_v57, %v5455_v31 }
0x6959   :  { %v5522_v5 = vpop.permute.xlu0 %5521 }
0x695a   :  { %v5524_v46 = vmul.f32 %v7077_v57, %v5522_v5 }
0x695c   :  { %5526 = vrot.lane.b32.xlu1 %v5524_v46, %s7122_s11 }
0x6960   :  { %5542 = vrot.lane.b32.xlu1 %v5967_v41, %s7123_s26 }
0x69ce   :  { %v5527_v53 = vpop.permute.xlu1 %5526 }
0x69cf   :  { %v5529_v48 = vadd.f32 %v5527_v53, %v5519_v52 }
0x69d1   :  { %7078 = vtanh.f32 %v5529_v48 }
0x69d2   :  { %v5543_v28 = vpop.permute.xlu1 %5542 }
0x69de   :  { %v7079_v4 = vpop.eup %7078 }
0x69df   :  { %5532 = vrot.lane.b32.xlu0 %v7079_v4, %s7121_s10 }
0x6a51   :  { %v5533_v15 = vpop.permute.xlu0 %5532 }
0x6a52   :  { %v5535_v26 = vmul.f32 %v7077_v57, %v5533_v15 }
0x6a54   :  { %v5545_v38 = vmul.f32 %v5543_v28, %v5535_v26 }
0x6a56   :  { %5547 = vrot.lane.b32.xlu0 %v5545_v38, %s7122_s11 }
0x6ac8   :  { %v5548_v12 = vpop.permute.xlu0 %5547 }
0x6ac9   :  { %v5550_v44 = vsel %vm2655_vm3, %v5548_v12, 0.0 }
0x6aca   :  { %5551 = vadd.xlane.f32.xlu1 %v5550_v44 }
0x6b53   :  { %v5552_v47 = vpop.xlane.xlu1 %5551 }
0x6b54   :  { %v5560_v2 = vadd.f32 %v5968_v61, %v5552_v47 }
0x6b56   :  { %v5565_v33 = vand.u32 2147483647, %v5560_v2  ;;  %v5969_v20 = vmul.f32 -1.442695, %v5560_v2  ;;  %v5562_v56 = vmax.f32 %v5560_v2, 0.0  ;;  %v5563_v14 = vmul.f32 %v5561_v16, %v5560_v2 }
0x6b58   :  { %v5566_v3 = vsub.f32 0.0, %v5565_v33  ;;  %7080 = vpow2.f32 %v5969_v20  ;;  %v5564_v55 = vsub.f32 %v5562_v56, %v5563_v14 }
0x6b5a   :  { %v5567_v36 = vmul.f32 1.442695, %v5566_v3 }
0x6b5c   :  { %7082 = vpow2.f32 %v5567_v36 }
0x6b65   :  { %v7081_v8 = vpop.eup %7080 }
0x6b66   :  { %v5598_v40 = vadd.f32 1.0, %v7081_v8 }
0x6b68   :  { %7084 = vrcp.f32 %v5598_v40 }
0x6b69   :  { %v7083_v23 = vpop.eup %7082 }
0x6b6a   :  { %v5569_v62 = vadd.f32 1.0, %v7083_v23  ;;  %v5572_v24 = vmul.f32 -0.5, %v7083_v23  ;;  %v5575_v42 = vand.u32 2147483647, %v7083_v23 }
0x6b6c   :  { %7086 = vlog2.f32 %v5569_v62  ;;  %v5573_v30 = vadd.f32 1.0, %v5572_v24  ;;  %vm5576_vm5 = vcmp.lt.f32.partialorder %v5575_v42, 0.0004427343 }
0x6b6e   :  { %v5574_v11 = vmul.f32 %v7083_v23, %v5573_v30 }
0x6b75   :  { %v7085_v17 = vpop.eup %7084 }
0x6b76   :  { %5601 = vst.msk [vmem:[%s8867_s8] sm:$0x3] %vm5579_vm4, %v7085_v17  ;;  %s5608_s8 = sshll.u32 %s7124_s6, 4  ;;  %s5609_s8 = int_to_ptr.vmem [resolvable:$true] %s5608_s8 }
0x6b77   :  { %s7096_s0 = scalar_lea.vmem %s5609_s8, 16  ;;  %s7100_s9 = scalar_lea.vmem %s5609_s8, 32 }
0x6b78   :  { %p7097_p0 = scmp.ne.s32.totalorder %s5609_s8, %s7096_s0  ;;  %p7101_p1 = scmp.lt.s32.totalorder %s5609_s8, %s5609_s8 }
0x6b79   :  { %v7087_v29 = vpop.eup %7086  ;;  %p7102_p2 = scmp.lt.s32.totalorder %s7100_s9, %s7096_s0 }
0x6b7a   :  { %v5571_v19 = vmul.f32 0.6931472, %v7087_v29 }
0x6b7b   :  { %p7103_p3 = por %p7102_p2, %p7101_p1 }
0x6b7c   :  { %v5577_v9 = vsel %vm5576_vm5, %v5574_v11, %v5571_v19 }
0x6b7d   :  { %v5578_v37 = vadd.f32 %v5577_v9, %v5564_v55  ;;  %p7104_p4 = pnand %p7103_p3, %p7097_p0 }
0x6b7f   :  { %v5580_v21 = vsel %vm5579_vm4, %v5578_v37, 0.0 }
0x6b80   :  { %5581 = vadd.xlane.f32.xlu0 %v5580_v21 }
0x6c09   :  { %v5582_v43 = vpop.xlane.xlu0 %5581 }
0x6c0a   :  { %v5583_v10 = vrot.slane %v5582_v43, 4 }
0x6c0c   :  { %v5584_v7 = vadd.f32 %v5583_v10, %v5582_v43 }
0x6c0e   :  { %v5585_v27 = vrot.slane %v5584_v7, 2 }
0x6c10   :  { %v5586_v51 = vadd.f32 %v5585_v27, %v5584_v7 }
0x6c12   :  { %v5587_v1 = vrot.slane %v5586_v51, 1 }
0x6c14   :  { %v5588_v13 = vadd.f32 %v5587_v1, %v5586_v51 }
0x6c16   :  { %6399 = vpush %v5588_v13 }
0x6c47   :  { %s6400_s30 = spop %6399 }
0x6c48   :  { %v5590_v25 = vstv %s6400_s30 }
0x6c49   :  { %v5592_v39 = vmul.f32 0.5, %v5590_v25 }
0x6c4b   :  { %5594 = vst.msk [vmem:[#allocation4] sm:$0x1] %vm5593_vm6, %v5592_v39 }
0x6c4c   :  { %7107 = shalt.err (!%p7104_p4)
}
0x6c4d   :  { %5611 = dma.vmem_to_hbm [thread:$0]  %s5609_s8, 16, %s8866_s7, [#allocation5]  }
0x6c4e   :  { %7116 = dma.done.wait [#allocation5], 16  }
0x6c4f   :  { %7117 = vsyncadd [#allocation5], 4294967280 }
0x6c50   :  { %5619 = vsyncpa [#allocation5], 1 }

</bundles_post_ra>
